<compile_context>
chip_gen: v5e
topology: v5e:2x2
jax: 0.10.0
libtpu: 0.0.40
codegen_flags: <defaults>
</compile_context>

<pallas_src>
import functools

import jax
import jax.numpy as jnp
from jax.experimental import pallas as pl
from jax.experimental.pallas import tpu as pltpu


C_IN, C_BB, C_NECK, EMB, N_CLS = 4, 32, 32, 16, 8
C_HEAD = 5 + EMB          # [obj, l, t, r, b] + 16-dim embedding = 21
HEAD_PAD = 128            # head channels padded to one full lane group
PMAT_ROWS = 16            # 8 class rows + 1 obj-selector row, padded to 16


# ----------------------------------------------------------------------------
# Fused kernel: backbone 3x3 -> adapter 1x1 -> neck 3x3 -> head 1x1
#               + predict() dense epilogue (sigmoid(obj) * max(emb @ S^T))
# ----------------------------------------------------------------------------
def _fused_kernel(xp_ref, w1_ref, w2_ref, w3_ref, b3_ref, w4_ref, b4_ref,
                  pmw_ref, pmb_ref,
                  feat_ref, score_ref, cls_ref,
                  be_ref,
                  *, H, W, pext, n_cls):
    Hp, Wp = H + 2, W + 2
    nf = Hp * Wp                                     # padded-flat pixel count
    c_neck = be_ref.shape[1]

    # Backbone 3x3: single MXU matmul on wrapper-built im2col patches.
    # bias + interior mask are folded into w1 (channel C_BB is the mask,
    # border rows come out exactly zero), so no mask / bias ops are needed.
    a1 = jnp.maximum(
        jnp.dot(xp_ref[...], w1_ref[...],
                preferred_element_type=jnp.float32), 0.0)        # (nf, 33) f32

    # Backbone->Neck adapter 1x1, fused in-register (bias via mask channel).
    a2 = jnp.maximum(
        jnp.dot(a1.astype(jnp.bfloat16), w2_ref[...],
                preferred_element_type=jnp.float32), 0.0)        # (nf, 32) f32
    # a2 border-ring rows are exact zeros by construction.

    # Stage the adapter output into the halo-extended buffer; only the
    # 2*pext halo rows get zeroed (re-done every grid step: safe with the
    # "parallel" grid axis on v7x megacore).
    be_ref[pl.ds(0, pext), :] = jnp.zeros((pext, c_neck), be_ref.dtype)
    be_ref[pl.ds(pext + nf, pext), :] = jnp.zeros((pext, c_neck), be_ref.dtype)
    be_ref[pl.ds(pext, nf), :] = a2.astype(be_ref.dtype)

    # Neck 3x3: one im2col matmul. The 9 taps are static row-shifted slices
    # of the halo-extended buffer, lane-concatenated into a (nf, 9*C) slab.
    taps = []
    for dh in range(3):
        for dw in range(3):
            off = (dh - 1) * Wp + (dw - 1)
            taps.append(be_ref[pl.ds(pext + off, nf), :])        # bf16
    patches = jnp.concatenate(taps, axis=-1)                     # (nf, 288)
    a3 = jnp.maximum(
        jnp.dot(patches, w3_ref[...],
                preferred_element_type=jnp.float32) + b3_ref[...], 0.0)

    # Head 1x1: output channels lane-padded to 128 (unmasked stores); write
    # back immediately as bf16 so y4 does not stay live across the epilogue.
    y4 = jnp.dot(a3.astype(jnp.bfloat16), w4_ref[...],
                 preferred_element_type=jnp.float32) + b4_ref[...]   # (nf,128)
    feat_ref[...] = y4.astype(feat_ref.dtype)

    # predict() epilogue, pixels-on-lanes. The projection matrix is folded
    # into the affine head in the wrapper, so only (nf, 32) f32 a3 feeds the
    # transposed matmul. Fully f32 -> exact argmax tie-break.
    t_mat = jax.lax.dot_general(
        pmw_ref[...], a3, (((1,), (1,)), ((), ())),
        preferred_element_type=jnp.float32) + pmb_ref[...]           # (16, nf)
    logits = t_mat[0:n_cls, :]                                       # (8, nf)
    obj = t_mat[n_cls:n_cls + 1, :]                                  # (1, nf)

    cls_vals = jnp.max(logits, axis=0, keepdims=True)                # (1, nf)
    rows = jax.lax.broadcasted_iota(
        jnp.int32, logits.shape, 0).astype(jnp.float32)
    first_hit = jnp.where(logits == cls_vals, rows, float(n_cls))
    cls_idx = jnp.min(first_hit, axis=0, keepdims=True)              # (1, nf)

    score_ref[...] = jax.nn.sigmoid(obj) * cls_vals
    cls_ref[...] = cls_idx.astype(jnp.int32)


# ----------------------------------------------------------------------------
# Wrapper: layout plumbing / weight folding in XLA, dense compute in-kernel.
# ----------------------------------------------------------------------------
@jax.jit
def model_forward_predict(params, x_nchw):
    """Returns (head NCHW (B,21,H,W), score maps (B,H,W), class maps (B,H,W))."""
    B, Cin, H, W = x_nchw.shape
    Hp, Wp = H + 2, W + 2
    nf = Hp * Wp
    pext = ((Wp + 1 + 7) // 8) * 8          # halo extension (>= Wp+1, 8-aligned)
    ne = nf + 2 * pext
    k1 = 9 * Cin                            # im2col K for the backbone conv

    f32, bf = jnp.float32, jnp.bfloat16

    # --- Backbone im2col (layout plumbing): 9 shifted windows of the padded
    #     image + a constant-1 column; border output rows zeroed so the
    #     augmented weights can fold bias + interior mask into the matmul.
    x = jnp.transpose(x_nchw, (0, 2, 3, 1))                       # NHWC
    xpp = jnp.pad(x, ((0, 0), (2, 2), (2, 2), (0, 0)))
    tap_list = [xpp[:, dh:dh + Hp, dw:dw + Wp, :]
                for dh in range(3) for dw in range(3)]
    patches = jnp.concatenate(tap_list, axis=-1)                  # (B,Hp,Wp,36)
    hh = jnp.arange(Hp)[:, None]
    ww = jnp.arange(Wp)[None, :]
    interior = ((hh >= 1) & (hh <= H) & (ww >= 1) & (ww <= W))    # (Hp, Wp)
    m = interior[None, :, :, None].astype(f32)
    xp = jnp.concatenate(
        [patches * m, jnp.broadcast_to(m, (B, Hp, Wp, 1))], axis=-1)
    xp = xp.reshape(B, nf, k1 + 1).astype(bf)                     # (B, nf, 37)

    # --- Weights (biases / mask folded where it is free on the MXU).
    w1 = jnp.zeros((k1 + 1, C_BB + 1), f32)
    w1 = w1.at[:k1, :C_BB].set(params["bb_w"].reshape(k1, C_BB))
    w1 = w1.at[k1, :C_BB].set(params["bb_b"])                     # bias row
    w1 = w1.at[k1, C_BB].set(1.0)                                 # mask channel
    w1 = w1.astype(bf)

    w2 = jnp.zeros((C_BB + 1, C_NECK), f32)
    w2 = w2.at[:C_BB, :].set(params["ad_w"])
    w2 = w2.at[C_BB, :].set(params["ad_b"])                       # bias via mask
    w2 = w2.astype(bf)

    w3 = params["neck_w"].reshape(9 * C_NECK, C_NECK).astype(bf)
    b3 = params["neck_b"].reshape(1, C_NECK)

    # Head weight/bias lane-padded 21 -> 128 so the feat store is unmasked.
    w4 = jnp.zeros((C_NECK, HEAD_PAD), f32).at[:, :C_HEAD].set(
        params["head_w"]).astype(bf)
    b4 = jnp.zeros((1, HEAD_PAD), f32).at[:, :C_HEAD].set(
        params["head_b"].reshape(1, C_HEAD))

    # Predict projection folded into the affine head:
    #   t = pmat @ y^T = (pmat @ W_head^T) @ a3^T + pmat @ b_head.
    pmat = jnp.zeros((PMAT_ROWS, C_HEAD), f32)
    pmat = pmat.at[:N_CLS, 5:5 + EMB].set(params["state_matrix"])
    pmat = pmat.at[N_CLS, 0].set(1.0)                             # obj selector
    pm_w = pmat @ params["head_w"].T                              # (16, 32) f32
    pm_b = (pmat @ params["head_b"]).reshape(PMAT_ROWS, 1)        # (16, 1)  f32

    kern = functools.partial(_fused_kernel, H=H, W=W, pext=pext, n_cls=N_CLS)
    feat, score, cls_idx = pl.pallas_call(
        kern,
        out_shape=(
            jax.ShapeDtypeStruct((B, nf, HEAD_PAD), jnp.bfloat16),
            jax.ShapeDtypeStruct((B, 1, nf), jnp.float32),
            jax.ShapeDtypeStruct((B, 1, nf), jnp.int32),
        ),
        grid_spec=pltpu.PrefetchScalarGridSpec(
            num_scalar_prefetch=0,
            grid=(B,),
            in_specs=[
                pl.BlockSpec((None, nf, k1 + 1), lambda b: (b, 0, 0)),
                pl.BlockSpec((k1 + 1, C_BB + 1), lambda b: (0, 0)),
                pl.BlockSpec((C_BB + 1, C_NECK), lambda b: (0, 0)),
                pl.BlockSpec((9 * C_NECK, C_NECK), lambda b: (0, 0)),
                pl.BlockSpec((1, C_NECK), lambda b: (0, 0)),
                pl.BlockSpec((C_NECK, HEAD_PAD), lambda b: (0, 0)),
                pl.BlockSpec((1, HEAD_PAD), lambda b: (0, 0)),
                pl.BlockSpec((PMAT_ROWS, C_NECK), lambda b: (0, 0)),
                pl.BlockSpec((PMAT_ROWS, 1), lambda b: (0, 0)),
            ],
            out_specs=(
                pl.BlockSpec((None, nf, HEAD_PAD), lambda b: (b, 0, 0)),
                pl.BlockSpec((None, 1, nf), lambda b: (b, 0, 0)),
                pl.BlockSpec((None, 1, nf), lambda b: (b, 0, 0)),
            ),
            scratch_shapes=[
                pltpu.VMEM((ne, C_NECK), jnp.bfloat16),   # halo-extended adapter act
            ],
        ),
        compiler_params=pltpu.CompilerParams(
            dimension_semantics=("parallel",)),
    )(xp, w1, w2, w3, b3, w4, b4, pm_w, pm_b)

    head = feat.reshape(B, Hp, Wp, HEAD_PAD)[:, 1:H + 1, 1:W + 1, :C_HEAD]
    head_nchw = jnp.transpose(head, (0, 3, 1, 2)).astype(jnp.float32)
    score_map = score.reshape(B, Hp, Wp)[:, 1:H + 1, 1:W + 1]
    cls_map = cls_idx.reshape(B, Hp, Wp)[:, 1:H + 1, 1:W + 1]
    return head_nchw, score_map, cls_map


def model_forward(params, x_nchw):
    """Equivalent of Model.forward(x, init_state=True): head output, NCHW."""
    return model_forward_predict(params, x_nchw)[0]


def model_predict_dense(params, x_nchw):
    """Dense portion of Model.predict() for batch element 0 (x.squeeze(0))."""
    _, score, cls = model_forward_predict(params, x_nchw)
    return score[0], cls[0]
    # TODO(synk): threshold filtering (obj > thr boolean masking with dynamic
    # shapes), the sequential NMS while-loop, bbox rescale/clamp and label
    # decode of predict() are data-dependent host-side logic with no clean
    # Pallas equivalent; they are left outside the kernel.


# TODO(synk): ProgressiveLoss / train() and the Backbone/Neck/Head class
# bodies are not provided in the source repo; deterministic synthetic conv
# stand-ins with the shapes implied by predict() are used instead.


def init_params(key):
    ks = jax.random.split(key, 9)
    s = 0.1
    return {
        "bb_w": jax.random.normal(ks[0], (3, 3, C_IN, C_BB), jnp.float32) * s,
        "bb_b": jax.random.normal(ks[1], (C_BB,), jnp.float32) * 0.05,
        "ad_w": jax.random.normal(ks[2], (C_BB, C_NECK), jnp.float32) * s,
        "ad_b": jax.random.normal(ks[3], (C_NECK,), jnp.float32) * 0.05,
        "neck_w": jax.random.normal(ks[4], (3, 3, C_NECK, C_NECK), jnp.float32) * s,
        "neck_b": jax.random.normal(ks[5], (C_NECK,), jnp.float32) * 0.05,
        "head_w": jax.random.normal(ks[6], (C_NECK, C_HEAD), jnp.float32) * s,
        "head_b": jax.random.normal(ks[7], (C_HEAD,), jnp.float32) * 0.05,
        # synthetic class-state matrix (state.get_state_matrix()): (n_cls, emb)
        "state_matrix": jax.random.normal(ks[8], (N_CLS, EMB), jnp.float32) * s,
    }


def reference_forward_predict(params, x_nchw):
    """Pure-JAX f32 reference for correctness checking."""
    x = jnp.transpose(x_nchw, (0, 2, 3, 1))

    def c3(v, w, b):
        y = jax.lax.conv_general_dilated(
            v, w, window_strides=(1, 1), padding="SAME",
            dimension_numbers=("NHWC", "HWIO", "NHWC"))
        return jnp.maximum(y + b, 0.0)

    y = c3(x, params["bb_w"], params["bb_b"])
    y = jnp.maximum(y @ params["ad_w"] + params["ad_b"], 0.0)
    y = c3(y, params["neck_w"], params["neck_b"])
    y = y @ params["head_w"] + params["head_b"]          # (B, H, W, 21)
    head = jnp.transpose(y, (0, 3, 1, 2))
    logits = y[..., 5:] @ params["state_matrix"].T
    score = jax.nn.sigmoid(y[..., 0]) * logits.max(-1)
    return head, score


if __name__ == "__main__":
    key = jax.random.PRNGKey(0)
    params = init_params(key)
    x = jax.random.normal(jax.random.PRNGKey(1), (2, C_IN, 16, 16), jnp.float32)

    head_out, score_maps, cls_maps = model_forward_predict(params, x)
    jax.block_until_ready((head_out, score_maps, cls_maps))

    assert head_out.shape == (2, C_HEAD, 16, 16)
    assert score_maps.shape == (2, 16, 16) and cls_maps.shape == (2, 16, 16)

    # bf16-tolerant check against the pure-JAX f32 reference.
    ref_head, ref_score = reference_forward_predict(params, x)
    err_h = float(jnp.max(jnp.abs(head_out - ref_head)))
    err_s = float(jnp.max(jnp.abs(score_maps - ref_score)))
    assert err_h < 0.1 and err_s < 0.1, (err_h, err_s)

    print("KERNEL_OK")
</pallas_src>

<mosaic_0001>
module attributes {stable_mosaic.version = 11 : i64} {
  func.func @_fused_kernel(%arg0: i32, %arg1: memref<1x324x37xbf16, #tpu.memory_space<vmem>>, %arg2: memref<37x33xbf16, #tpu.memory_space<vmem>>, %arg3: memref<33x32xbf16, #tpu.memory_space<vmem>>, %arg4: memref<288x32xbf16, #tpu.memory_space<vmem>>, %arg5: memref<1x32xf32, #tpu.memory_space<vmem>>, %arg6: memref<32x128xbf16, #tpu.memory_space<vmem>>, %arg7: memref<1x128xf32, #tpu.memory_space<vmem>>, %arg8: memref<16x32xf32, #tpu.memory_space<vmem>>, %arg9: memref<16x1xf32, #tpu.memory_space<vmem>>, %arg10: memref<1x324x128xbf16, #tpu.memory_space<vmem>>, %arg11: memref<1x1x324xf32, #tpu.memory_space<vmem>>, %arg12: memref<1x1x324xi32, #tpu.memory_space<vmem>>, %arg13: memref<372x32xbf16, #tpu.memory_space<vmem>>) attributes {dimension_semantics = [#tpu.dimension_semantics<parallel>], iteration_bounds = array<i64: 2>, scalar_prefetch = 0 : i64, scratch_operands = 1 : i64, tpu.core_type = #tpu.core_type<tc>, window_params = [{transform_indices = @transform_0, window_bounds = array<i64: 1, 324, 37>}, {pipeline_mode = #tpu.pipeline_mode<synchronous>, transform_indices = @transform_1, window_bounds = array<i64: 37, 33>}, {pipeline_mode = #tpu.pipeline_mode<synchronous>, transform_indices = @transform_2, window_bounds = array<i64: 33, 32>}, {pipeline_mode = #tpu.pipeline_mode<synchronous>, transform_indices = @transform_3, window_bounds = array<i64: 288, 32>}, {pipeline_mode = #tpu.pipeline_mode<synchronous>, transform_indices = @transform_4, window_bounds = array<i64: 1, 32>}, {pipeline_mode = #tpu.pipeline_mode<synchronous>, transform_indices = @transform_5, window_bounds = array<i64: 32, 128>}, {pipeline_mode = #tpu.pipeline_mode<synchronous>, transform_indices = @transform_6, window_bounds = array<i64: 1, 128>}, {pipeline_mode = #tpu.pipeline_mode<synchronous>, transform_indices = @transform_7, window_bounds = array<i64: 16, 32>}, {pipeline_mode = #tpu.pipeline_mode<synchronous>, transform_indices = @transform_8, window_bounds = array<i64: 16, 1>}, {transform_indices = @transform_9, window_bounds = array<i64: 1, 324, 128>}, {transform_indices = @transform_10, window_bounds = array<i64: 1, 1, 324>}, {transform_indices = @transform_11, window_bounds = array<i64: 1, 1, 324>}]} {
    %c0 = arith.constant 0 : index
    %c0_0 = arith.constant 0 : index
    %c0_1 = arith.constant 0 : index
    %0 = vector.load %arg1[%c0, %c0_0, %c0_1] : memref<1x324x37xbf16, #tpu.memory_space<vmem>>, vector<1x324x37xbf16>
    %1 = vector.shape_cast %0 : vector<1x324x37xbf16> to vector<324x37xbf16>
    %c0_2 = arith.constant 0 : index
    %c0_3 = arith.constant 0 : index
    %2 = vector.load %arg2[%c0_2, %c0_3] : memref<37x33xbf16, #tpu.memory_space<vmem>>, vector<37x33xbf16>
    %cst = arith.constant dense<0.000000e+00> : vector<324x33xf32>
    %3 = tpu.matmul %1, %2, %cst {dimension_numbers = #tpu.dot_dimension_numbers<[1], [0], [0], [1], [0, 0, 1, 1], [], []>} : vector<324x37xbf16>, vector<37x33xbf16>, vector<324x33xf32> -> vector<324x33xf32>
    %cst_4 = arith.constant 0.000000e+00 : f32
    %4 = vector.broadcast %cst_4 : f32 to vector<324x33xf32>
    %5 = arith.maximumf %3, %4 : vector<324x33xf32>
    %6 = arith.truncf %5 : vector<324x33xf32> to vector<324x33xbf16>
    %c0_5 = arith.constant 0 : index
    %c0_6 = arith.constant 0 : index
    %7 = vector.load %arg3[%c0_5, %c0_6] : memref<33x32xbf16, #tpu.memory_space<vmem>>, vector<33x32xbf16>
    %cst_7 = arith.constant dense<0.000000e+00> : vector<324x32xf32>
    %8 = tpu.matmul %6, %7, %cst_7 {dimension_numbers = #tpu.dot_dimension_numbers<[1], [0], [0], [1], [0, 0, 1, 1], [], []>} : vector<324x33xbf16>, vector<33x32xbf16>, vector<324x32xf32> -> vector<324x32xf32>
    %cst_8 = arith.constant 0.000000e+00 : f32
    %9 = vector.broadcast %cst_8 : f32 to vector<324x32xf32>
    %10 = arith.maximumf %8, %9 : vector<324x32xf32>
    %cst_9 = arith.constant 0.000000e+00 : bf16
    %11 = vector.broadcast %cst_9 : bf16 to vector<24x32xbf16>
    %c0_10 = arith.constant 0 : index
    %c0_11 = arith.constant 0 : index
    %12 = vector.load %arg13[%c0_10, %c0_11] : memref<372x32xbf16, #tpu.memory_space<vmem>>, vector<24x32xbf16>
    tpu.vector_store %arg13[%c0_10, %c0_11], %11 {strides = array<i32>} : memref<372x32xbf16, #tpu.memory_space<vmem>>, vector<24x32xbf16>,
    %cst_12 = arith.constant 0.000000e+00 : bf16
    %13 = vector.broadcast %cst_12 : bf16 to vector<24x32xbf16>
    %c348 = arith.constant 348 : index
    %c0_13 = arith.constant 0 : index
    %14 = vector.load %arg13[%c348, %c0_13] : memref<372x32xbf16, #tpu.memory_space<vmem>>, vector<24x32xbf16>
    tpu.vector_store %arg13[%c348, %c0_13], %13 {strides = array<i32>} : memref<372x32xbf16, #tpu.memory_space<vmem>>, vector<24x32xbf16>,
    %15 = arith.truncf %10 : vector<324x32xf32> to vector<324x32xbf16>
    %c24 = arith.constant 24 : index
    %c0_14 = arith.constant 0 : index
    %16 = vector.load %arg13[%c24, %c0_14] : memref<372x32xbf16, #tpu.memory_space<vmem>>, vector<324x32xbf16>
    tpu.vector_store %arg13[%c24, %c0_14], %15 {strides = array<i32>} : memref<372x32xbf16, #tpu.memory_space<vmem>>, vector<324x32xbf16>,
    %c5 = arith.constant 5 : index
    %c0_15 = arith.constant 0 : index
    %17 = vector.load %arg13[%c5, %c0_15] : memref<372x32xbf16, #tpu.memory_space<vmem>>, vector<324x32xbf16>
    %c6 = arith.constant 6 : index
    %c0_16 = arith.constant 0 : index
    %18 = vector.load %arg13[%c6, %c0_16] : memref<372x32xbf16, #tpu.memory_space<vmem>>, vector<324x32xbf16>
    %c7 = arith.constant 7 : index
    %c0_17 = arith.constant 0 : index
    %19 = vector.load %arg13[%c7, %c0_17] : memref<372x32xbf16, #tpu.memory_space<vmem>>, vector<324x32xbf16>
    %c23 = arith.constant 23 : index
    %c0_18 = arith.constant 0 : index
    %20 = vector.load %arg13[%c23, %c0_18] : memref<372x32xbf16, #tpu.memory_space<vmem>>, vector<324x32xbf16>
    %c24_19 = arith.constant 24 : index
    %c0_20 = arith.constant 0 : index
    %21 = vector.load %arg13[%c24_19, %c0_20] : memref<372x32xbf16, #tpu.memory_space<vmem>>, vector<324x32xbf16>
    %c25 = arith.constant 25 : index
    %c0_21 = arith.constant 0 : index
    %22 = vector.load %arg13[%c25, %c0_21] : memref<372x32xbf16, #tpu.memory_space<vmem>>, vector<324x32xbf16>
    %c41 = arith.constant 41 : index
    %c0_22 = arith.constant 0 : index
    %23 = vector.load %arg13[%c41, %c0_22] : memref<372x32xbf16, #tpu.memory_space<vmem>>, vector<324x32xbf16>
    %c42 = arith.constant 42 : index
    %c0_23 = arith.constant 0 : index
    %24 = vector.load %arg13[%c42, %c0_23] : memref<372x32xbf16, #tpu.memory_space<vmem>>, vector<324x32xbf16>
    %c43 = arith.constant 43 : index
    %c0_24 = arith.constant 0 : index
    %25 = vector.load %arg13[%c43, %c0_24] : memref<372x32xbf16, #tpu.memory_space<vmem>>, vector<324x32xbf16>
    %26 = tpu.concatenate %17, %18, %19, %20, %21, %22, %23, %24, %25 in 1 : vector<324x32xbf16>, vector<324x32xbf16>, vector<324x32xbf16>, vector<324x32xbf16>, vector<324x32xbf16>, vector<324x32xbf16>, vector<324x32xbf16>, vector<324x32xbf16>, vector<324x32xbf16> -> vector<324x288xbf16>
    %c0_25 = arith.constant 0 : index
    %c0_26 = arith.constant 0 : index
    %27 = vector.load %arg4[%c0_25, %c0_26] : memref<288x32xbf16, #tpu.memory_space<vmem>>, vector<288x32xbf16>
    %cst_27 = arith.constant dense<0.000000e+00> : vector<324x32xf32>
    %28 = tpu.matmul %26, %27, %cst_27 {dimension_numbers = #tpu.dot_dimension_numbers<[1], [0], [0], [1], [0, 0, 1, 1], [], []>} : vector<324x288xbf16>, vector<288x32xbf16>, vector<324x32xf32> -> vector<324x32xf32>
    %c0_28 = arith.constant 0 : index
    %c0_29 = arith.constant 0 : index
    %29 = vector.load %arg5[%c0_28, %c0_29] : memref<1x32xf32, #tpu.memory_space<vmem>>, vector<1x32xf32>
    %30 = vector.broadcast %29 : vector<1x32xf32> to vector<324x32xf32>
    %31 = arith.addf %28, %30 : vector<324x32xf32>
    %cst_30 = arith.constant 0.000000e+00 : f32
    %32 = vector.broadcast %cst_30 : f32 to vector<324x32xf32>
    %33 = arith.maximumf %31, %32 : vector<324x32xf32>
    %34 = arith.truncf %33 : vector<324x32xf32> to vector<324x32xbf16>
    %c0_31 = arith.constant 0 : index
    %c0_32 = arith.constant 0 : index
    %35 = vector.load %arg6[%c0_31, %c0_32] : memref<32x128xbf16, #tpu.memory_space<vmem>>, vector<32x128xbf16>
    %cst_33 = arith.constant dense<0.000000e+00> : vector<324x128xf32>
    %36 = tpu.matmul %34, %35, %cst_33 {dimension_numbers = #tpu.dot_dimension_numbers<[1], [0], [0], [1], [0, 0, 1, 1], [], []>} : vector<324x32xbf16>, vector<32x128xbf16>, vector<324x128xf32> -> vector<324x128xf32>
    %c0_34 = arith.constant 0 : index
    %c0_35 = arith.constant 0 : index
    %37 = vector.load %arg7[%c0_34, %c0_35] : memref<1x128xf32, #tpu.memory_space<vmem>>, vector<1x128xf32>
    %38 = vector.broadcast %37 : vector<1x128xf32> to vector<324x128xf32>
    %39 = arith.addf %36, %38 : vector<324x128xf32>
    %40 = arith.truncf %39 : vector<324x128xf32> to vector<324x128xbf16>
    %c0_36 = arith.constant 0 : index
    %c0_37 = arith.constant 0 : index
    %c0_38 = arith.constant 0 : index
    %41 = vector.load %arg10[%c0_36, %c0_37, %c0_38] : memref<1x324x128xbf16, #tpu.memory_space<vmem>>, vector<1x324x128xbf16>
    %42 = vector.shape_cast %41 : vector<1x324x128xbf16> to vector<324x128xbf16>
    %43 = vector.shape_cast %40 : vector<324x128xbf16> to vector<1x324x128xbf16>
    tpu.vector_store %arg10[%c0_36, %c0_37, %c0_38], %43 {strides = array<i32>} : memref<1x324x128xbf16, #tpu.memory_space<vmem>>, vector<1x324x128xbf16>,
    %c0_39 = arith.constant 0 : index
    %c0_40 = arith.constant 0 : index
    %44 = vector.load %arg8[%c0_39, %c0_40] : memref<16x32xf32, #tpu.memory_space<vmem>>, vector<16x32xf32>
    %cst_41 = arith.constant dense<0.000000e+00> : vector<16x324xf32>
    %45 = tpu.matmul %44, %33, %cst_41 {dimension_numbers = #tpu.dot_dimension_numbers<[1], [1], [0], [0], [0, 0, 1, 0], [], []>} : vector<16x32xf32>, vector<324x32xf32>, vector<16x324xf32> -> vector<16x324xf32>
    %c0_42 = arith.constant 0 : index
    %c0_43 = arith.constant 0 : index
    %46 = vector.load %arg9[%c0_42, %c0_43] : memref<16x1xf32, #tpu.memory_space<vmem>>, vector<16x1xf32>
    %47 = vector.broadcast %46 : vector<16x1xf32> to vector<16x324xf32>
    %48 = arith.addf %45, %47 : vector<16x324xf32>
    %49 = vector.extract_strided_slice %48 {offsets = [0, 0], sizes = [8, 324], strides = [1, 1]} : vector<16x324xf32> to vector<8x324xf32>
    %50 = vector.extract_strided_slice %48 {offsets = [8, 0], sizes = [1, 324], strides = [1, 1]} : vector<16x324xf32> to vector<1x324xf32>
    %cst_44 = arith.constant dense<0xFF800000> : vector<324xf32>
    %51 = vector.multi_reduction <maximumf>, %49, %cst_44 [0] : vector<8x324xf32> to vector<324xf32>
    %52 = vector.shape_cast %51 : vector<324xf32> to vector<1x324xf32>
    %53 = tpu.iota {dimensions = array<i32: 0>} : vector<8x324xi32>
    %54 = arith.sitofp %53 : vector<8x324xi32> to vector<8x324xf32>
    %55 = vector.broadcast %52 : vector<1x324xf32> to vector<8x324xf32>
    %56 = arith.cmpf oeq, %49, %55 : vector<8x324xf32>
    %cst_45 = arith.constant 8.000000e+00 : f32
    %57 = vector.broadcast %cst_45 : f32 to vector<8x324xf32>
    %58 = arith.select %56, %54, %57 : vector<8x324xi1>, vector<8x324xf32>
    %cst_46 = arith.constant dense<0x7F800000> : vector<324xf32>
    %59 = vector.multi_reduction <minimumf>, %58, %cst_46 [0] : vector<8x324xf32> to vector<324xf32>
    %60 = vector.shape_cast %59 : vector<324xf32> to vector<1x324xf32>
    %61 = arith.negf %50 : vector<1x324xf32>
    %62 = math.exp %61 : vector<1x324xf32>
    %cst_47 = arith.constant 1.000000e+00 : f32
    %63 = vector.broadcast %cst_47 : f32 to vector<1x324xf32>
    %64 = arith.addf %63, %62 : vector<1x324xf32>
    %65 = arith.divf %63, %64 : vector<1x324xf32>
    %66 = arith.mulf %65, %52 : vector<1x324xf32>
    %c0_48 = arith.constant 0 : index
    %c0_49 = arith.constant 0 : index
    %c0_50 = arith.constant 0 : index
    %67 = vector.load %arg11[%c0_48, %c0_49, %c0_50] : memref<1x1x324xf32, #tpu.memory_space<vmem>>, vector<1x1x324xf32>
    %68 = vector.shape_cast %67 : vector<1x1x324xf32> to vector<1x324xf32>
    %69 = vector.shape_cast %66 : vector<1x324xf32> to vector<1x1x324xf32>
    tpu.vector_store %arg11[%c0_48, %c0_49, %c0_50], %69 {strides = array<i32>} : memref<1x1x324xf32, #tpu.memory_space<vmem>>, vector<1x1x324xf32>,
    %70 = arith.fptosi %60 : vector<1x324xf32> to vector<1x324xi32>
    %c0_51 = arith.constant 0 : index
    %c0_52 = arith.constant 0 : index
    %c0_53 = arith.constant 0 : index
    %71 = vector.load %arg12[%c0_51, %c0_52, %c0_53] : memref<1x1x324xi32, #tpu.memory_space<vmem>>, vector<1x1x324xi32>
    %72 = vector.shape_cast %71 : vector<1x1x324xi32> to vector<1x324xi32>
    %73 = vector.shape_cast %70 : vector<1x324xi32> to vector<1x1x324xi32>
    tpu.vector_store %arg12[%c0_51, %c0_52, %c0_53], %73 {strides = array<i32>} : memref<1x1x324xi32, #tpu.memory_space<vmem>>, vector<1x1x324xi32>,
    return
  }
  func.func @transform_0(%arg0: i32) -> (i32, i32, i32) {
    %c0_i32 = arith.constant 0 : i32
    %c0_i32_0 = arith.constant 0 : i32
    %c0_i32_1 = arith.constant 0 : i32
    return %arg0, %c0_i32, %c0_i32_0 : i32, i32, i32
  }
  func.func @transform_1(%arg0: i32) -> (i32, i32) {
    %c0_i32 = arith.constant 0 : i32
    %c0_i32_0 = arith.constant 0 : i32
    %c0_i32_1 = arith.constant 0 : i32
    return %c0_i32, %c0_i32_0 : i32, i32
  }
  func.func @transform_2(%arg0: i32) -> (i32, i32) {
    %c0_i32 = arith.constant 0 : i32
    %c0_i32_0 = arith.constant 0 : i32
    %c0_i32_1 = arith.constant 0 : i32
    return %c0_i32, %c0_i32_0 : i32, i32
  }
  func.func @transform_3(%arg0: i32) -> (i32, i32) {
    %c0_i32 = arith.constant 0 : i32
    %c0_i32_0 = arith.constant 0 : i32
    %c0_i32_1 = arith.constant 0 : i32
    return %c0_i32, %c0_i32_0 : i32, i32
  }
  func.func @transform_4(%arg0: i32) -> (i32, i32) {
    %c0_i32 = arith.constant 0 : i32
    %c0_i32_0 = arith.constant 0 : i32
    %c0_i32_1 = arith.constant 0 : i32
    return %c0_i32, %c0_i32_0 : i32, i32
  }
  func.func @transform_5(%arg0: i32) -> (i32, i32) {
    %c0_i32 = arith.constant 0 : i32
    %c0_i32_0 = arith.constant 0 : i32
    %c0_i32_1 = arith.constant 0 : i32
    return %c0_i32, %c0_i32_0 : i32, i32
  }
  func.func @transform_6(%arg0: i32) -> (i32, i32) {
    %c0_i32 = arith.constant 0 : i32
    %c0_i32_0 = arith.constant 0 : i32
    %c0_i32_1 = arith.constant 0 : i32
    return %c0_i32, %c0_i32_0 : i32, i32
  }
  func.func @transform_7(%arg0: i32) -> (i32, i32) {
    %c0_i32 = arith.constant 0 : i32
    %c0_i32_0 = arith.constant 0 : i32
    %c0_i32_1 = arith.constant 0 : i32
    return %c0_i32, %c0_i32_0 : i32, i32
  }
  func.func @transform_8(%arg0: i32) -> (i32, i32) {
    %c0_i32 = arith.constant 0 : i32
    %c0_i32_0 = arith.constant 0 : i32
    %c0_i32_1 = arith.constant 0 : i32
    return %c0_i32, %c0_i32_0 : i32, i32
  }
  func.func @transform_9(%arg0: i32) -> (i32, i32, i32) {
    %c0_i32 = arith.constant 0 : i32
    %c0_i32_0 = arith.constant 0 : i32
    %c0_i32_1 = arith.constant 0 : i32
    return %arg0, %c0_i32, %c0_i32_0 : i32, i32, i32
  }
  func.func @transform_10(%arg0: i32) -> (i32, i32, i32) {
    %c0_i32 = arith.constant 0 : i32
    %c0_i32_0 = arith.constant 0 : i32
    %c0_i32_1 = arith.constant 0 : i32
    return %arg0, %c0_i32, %c0_i32_0 : i32, i32, i32
  }
  func.func @transform_11(%arg0: i32) -> (i32, i32, i32) {
    %c0_i32 = arith.constant 0 : i32
    %c0_i32_0 = arith.constant 0 : i32
    %c0_i32_1 = arith.constant 0 : i32
    return %arg0, %c0_i32, %c0_i32_0 : i32, i32, i32
  }
}

</mosaic_0001>

<bundles_post_ra>
// kernel: model_forward_predict.1
= control target key start
LH: loop header
LB: loop body
LE: loop exit
PB: predicated region body
PF: predicated region fallthrough
CT: control target
= control target key end

     0   :  { %s5250_s17 = smov 0   ;;  %s7667_s0 = inlined_call_operand.vmem [shape: bf16[2,324,37], index: 0, kind: input, shape index: {}]   ;;  %s7668_s1 = inlined_call_operand.vmem [shape: bf16[37,33], index: 1, kind: input, shape index: {}]   ;;  %s7669_s2 = inlined_call_operand.vmem [shape: bf16[33,32], index: 2, kind: input, shape index: {}]   ;;  %s7670_s3 = inlined_call_operand.vmem [shape: bf16[288,32], index: 3, kind: input, shape index: {}]   ;;  %s7671_s4 = inlined_call_operand.vmem [shape: f32[1,32], index: 4, kind: input, shape index: {}]   ;;  %s7672_s5 = inlined_call_operand.vmem [shape: bf16[32,128], index: 5, kind: input, shape index: {}]   ;;  %s7673_s6 = inlined_call_operand.vmem [shape: f32[1,128], index: 6, kind: input, shape index: {}]   ;;  %s7674_s7 = inlined_call_operand.vmem [shape: f32[16,32], index: 7, kind: input, shape index: {}]   ;;  %s7675_s8 = inlined_call_operand.vmem [shape: f32[16,1], index: 8, kind: input, shape index: {}]   ;;  %s7676_s9 = inlined_call_operand.vmem [shape: bf16[2,324,128], index: 9, kind: output, shape index: {0}]   ;;  %s7677_s10 = inlined_call_operand.vmem [shape: f32[2,1,324], index: 10, kind: output, shape index: {1}]   ;;  %s7678_s11 = inlined_call_operand.vmem [shape: s32[2,1,324], index: 11, kind: output, shape index: {2}]  }
   0x1 LB: > { %s4403_s18 = sadd.s32 4294967295, %s5183_s17   ;;  %p4407_p0 = scmp.ge.s32.totalorder %s5183_s17, 1  ;;  %s5183_s17 = sphi %s5250_s17, %s22_s17  }
   0x2   : > { %p342_p1 = scmp.lt.s32.totalorder %s5183_s17, 3 }
   0x4   : > { %p343_p2 = pnand %p4407_p0, %p342_p1 }
   0x6   : > { %346 = sbr.rel (%p343_p2) target bundleno = 1140 (0x474), region = 56 }
   0xb   : > { %v454_v0 = vld [vmem:[%s7668_s1 + $0x10] sm:$0x7]  ;;  %vm637_vm0 = vcmask 1041408   ;;  %vm638_vm1 = vcmask 1042432   ;;  %v5185_v2 = vmov 65535   ;;  %p390_p3 = scmp.lt.s32.totalorder %s4403_s18, 1 }
   0xc   : > { %v567_v1 = vunpack.c.l.b16 %v454_v0  ;;  %v639_v3 = vsel %vm637_vm0, 4294967295, %v5185_v2  ;;  %v4747_v7 = vld [vmem:[%s7668_s1 + $0x8] sm:$0xff]  ;;  %v4746_v8 = vld [vmem:[%s7668_s1] sm:$0xff]  ;;  %vm573_vm2 = vcmask 302080   ;;  %v823_v17 = vld [vmem:[%s7669_s2 + $0x10] sm:$0x1] }
   0xd   : > { %v640_v4 = vsel %vm638_vm1, %v639_v3, 0  ;;  %s7746_s18 = smov (!%p390_p3, %s4403_s18), 1  ;;  %v833_v18 = vunpack.c.l.b16 %v823_v17  ;;  %vm903_vm3 = vcmask 1040384   ;;  %v5186_v21 = vmov 0   ;;  %v4749_v24 = vld [vmem:[%s7669_s2 + $0x8] sm:$0xff]  ;;  %v4748_v26 = vld [vmem:[%s7669_s2] sm:$0xff] }
   0xe   : > { %v570_v5 = vpack.c.b16 %v567_v1, %v567_v1  ;;  %s5112_s23 = smul.u32 164, %s7746_s18  ;;  %v905_v22 = vsel %vm903_vm3, 65535, %v5186_v21  ;;  %5143 = vset.pattern.permute.xlu1 %v5186_v21  ;;  %5142 = vset.pattern.permute.xlu0 %v5186_v21  ;;  %vm839_vm4 = vcmask 269312   ;;  %vm1063_vm5 = vcmask 257024   ;;  %s5187_s16 = smov 64  }
   0xf   : > { %v836_v19 = vpack.c.b16 %v833_v18, %v833_v18  ;;  %1064 = vst.msk [vmem:[#allocation2] sm:$0xf] %vm1063_vm5, %v5186_v21  ;;  %vm1530_vm6 = vcmask 1046528   ;;  %vm1317_vm7 = vsmask.f32 7424  ;;  %s5188_s19 = smov 32  }
  0x10   : > { %v642_v6 = vand.u32 %v640_v4, %v570_v5  ;;  %s5276_s28 = scalar_lea.vmem %s7667_s0, %s5112_s23  ;;  %1065 = vst.msk [vmem:[#allocation2 + $0x4] sm:$0xf] %vm1063_vm5, %v5186_v21  ;;  %s5189_s25 = smov 96   ;;  %vm1694_vm8 = vsmask.f32 2304  ;;  %vm2213_vm11 = vcmask 261120  }
  0x11   : > { %v4726_v9 = vld [vmem:[%s5276_s28] sm:$0xff]  ;;  %v4727_v10 = vld [vmem:[%s5276_s28 + $0x8] sm:$0xff]  ;;  %v4728_v11 = vld [vmem:[%s5276_s28 + $0x10] sm:$0xff]  ;;  %v907_v23 = vand.u32 %v905_v22, %v836_v19  ;;  %1066 = vst.msk [vmem:[#allocation2 + $0x8] sm:$0xf] %vm1063_vm5, %v5186_v21  ;;  %vm2257_vm12 = vcmask 523264  }
  0x12   : > { %649 = vmatpush.bf16.msra.mxu0 %v642_v6  ;;  %5097 = vmatpush.bf16.msra.mxu3 %v642_v6  ;;  %v4729_v12 = vld [vmem:[%s5276_s28 + $0x18] sm:$0xff]  ;;  %v4730_v13 = vld [vmem:[%s5276_s28 + $0x20] sm:$0xff]  ;;  %v4731_v15 = vld [vmem:[%s5276_s28 + $0x28] sm:$0xff]  ;;  %1069 = vst.msk [vmem:[#allocation2 + $0xb0] sm:$0xf] %vm1063_vm5, %v5186_v21  ;;  %vm2300_vm13 = vcmask 785408  }
  0x13   : > { %v4738_v14 = vld [vmem:[%s5276_s28 + $0x60] sm:$0xff]  ;;  %v4739_v16 = vld [vmem:[%s5276_s28 + $0x68] sm:$0xff]  ;;  %v4732_v20 = vld [vmem:[%s5276_s28 + $0x30] sm:$0xff]  ;;  %914 = vmatpush.bf16.msra.mxu1 %v907_v23  ;;  %5100 = vmatpush.bf16.msra.mxu2 %v907_v23  ;;  %1070 = vst.msk [vmem:[#allocation2 + $0xb4] sm:$0xf] %vm1063_vm5, %v5186_v21  ;;  %vm1071_vm14 = vcmask 254976  }
  0x14   : > { %v4740_v25 = vld [vmem:[%s5276_s28 + $0x70] sm:$0xff]  ;;  %v4733_v27 = vld [vmem:[%s5276_s28 + $0x38] sm:$0xff]  ;;  %v4734_v29 = vld [vmem:[%s5276_s28 + $0x40] sm:$0xff]  ;;  %vm2027_vm9 = vsmask.f32 1280  ;;  %vm1067_vm15 = vcmask 257026  }
  0x15   : > { %v4741_v28 = vld [vmem:[%s5276_s28 + $0x78] sm:$0xff]  ;;  %v4742_v31 = vld [vmem:[%s5276_s28 + $0x80] sm:$0xff]  ;;  %v4735_v36 = vld [vmem:[%s5276_s28 + $0x48] sm:$0xff]  ;;  %vm2530_vm10 = vsmask.f32 5376  ;;  %vm4169_vm1 = vcmask 556032  }
  0x16   : > { %650 = vmatpush.bf16.msra.mxu0 %v4747_v7  ;;  %5098 = vmatpush.bf16.msra.mxu3 %v4747_v7  ;;  %v4743_v38 = vld [vmem:[%s5276_s28 + $0x88] sm:$0xff]  ;;  %v4736_v43 = vld [vmem:[%s5276_s28 + $0x50] sm:$0xff]  ;;  %v4737_v50 = vld [vmem:[%s5276_s28 + $0x58] sm:$0xff]  ;;  %1068 = vst.msk [vmem:[#allocation2 + $0xac] sm:$0xc] %vm1067_vm15, %v5186_v21  ;;  %s5113_s21 = smul.u32 3, %s7746_s18 }
  0x17   : > { %915 = vmatpush.bf16.msra.mxu1 %v4749_v24  ;;  %5101 = vmatpush.bf16.msra.mxu2 %v4749_v24  ;;  %v4744_v45 = vld [vmem:[%s5276_s28 + $0x90] sm:$0xff]  ;;  %v4745_v52 = vld [vmem:[%s5276_s28 + $0x98] sm:$0xff]  ;;  %v449_v63 = vld [vmem:[%s5276_s28 + $0xa0] sm:$0x3]  ;;  %s7271_s28 = scalar_lea.vmem %s7676_s9, %s5112_s23 }
  0x18   : > { %v536_v1 = vunpack.c.l.b16 %v449_v63  ;;  %s407_s26 = scalar_lea.vmem %s7678_s11, %s5113_s21 }
  0x1a   : > { %651 = vmatpush.bf16.msra.mxu0 %v4746_v8  ;;  %5099 = vmatpush.bf16.msra.mxu3 %v4746_v8  ;;  %v557_v4 = vpack.c.b16 %v536_v1, %v536_v1 }
  0x1b   : > { %916 = vmatpush.bf16.msra.mxu1 %v4748_v26  ;;  %5102 = vmatpush.bf16.msra.mxu2 %v4748_v26 }
  0x1d   : > { %4498 = vmatmul.msk.bf16.vlgmr.msra.gmra.mxu0 %vm573_vm2, %v4726_v9  ;;  %4510 = vmatmul.msk.bf16.vlgmr.msra.gmra.mxu3 %vm573_vm2, %v4738_v14 }
  0x2d   : > { %4499 = vmatmul.msk.bf16.gmra.mxu0 %vm573_vm2, %v4727_v10  ;;  %4511 = vmatmul.msk.bf16.gmra.mxu3 %vm573_vm2, %v4739_v16 }
  0x3d   : > { %4500 = vmatmul.msk.bf16.gmra.mxu0 %vm573_vm2, %v4728_v11  ;;  %4512 = vmatmul.msk.bf16.gmra.mxu3 %vm573_vm2, %v4740_v25 }
  0x4d   : > { %4501 = vmatmul.msk.bf16.gmra.mxu0 %vm573_vm2, %v4729_v12  ;;  %4513 = vmatmul.msk.bf16.gmra.mxu3 %vm573_vm2, %v4741_v28 }
  0x5d   : > { %4502 = vmatmul.msk.bf16.gmra.mxu0 %vm573_vm2, %v4730_v13  ;;  %4514 = vmatmul.msk.bf16.gmra.mxu3 %vm573_vm2, %v4742_v31 }
  0x6d   : > { %4503 = vmatmul.msk.bf16.gmra.mxu0 %vm573_vm2, %v4731_v15  ;;  %4515 = vmatmul.msk.bf16.gmra.mxu3 %vm573_vm2, %v4743_v38  ;;  %v5354_v38 = vld [vmem:[#allocation2 + $0x4] sm:$0xf] }
  0x7d   : > { %4504 = vmatmul.msk.bf16.gmra.mxu0 %vm573_vm2, %v4732_v20  ;;  %4516 = vmatmul.msk.bf16.gmra.mxu3 %vm573_vm2, %v4744_v45 }
  0x8d   : > { %4505 = vmatmul.msk.bf16.gmra.mxu0 %vm573_vm2, %v4733_v27  ;;  %4517 = vmatmul.msk.bf16.gmra.mxu3 %vm573_vm2, %v4745_v52 }
  0x9a   : > { %v653_v30 = vpop.f32.mrf.mxu0 }
  0x9b   : > { %v757_v33 = vmax.f32 %v653_v30, 0.0 }
  0x9d   : > { %4506 = vmatmul.msk.bf16.gmra.mxu0 %vm573_vm2, %v4734_v29  ;;  %4518 = vmatmul.msk.bf16.gmra.mxu3 %vm573_vm2, %v557_v4 }
  0xa0   : > { %v713_v59 = vpop.f32.mrf.mxu3 }
  0xa1   : > { %v781_v0 = vmax.f32 %v713_v59, 0.0 }
  0xa2   : > { %v655_v32 = vpop.f32.mrf.mxu0 }
  0xa3   : > { %v758_v34 = vmax.f32 %v655_v32, 0.0 }
  0xa5   : > { %v798_v35 = vpack.c.bf16 %v758_v34, %v757_v33 }
  0xa7   : > { %4527 = vmatmul.msk.bf16.vlgmr.msra.gmra.mxu1 %vm839_vm4, %v798_v35 }
  0xa8   : > { %v715_v3 = vpop.f32.mrf.mxu3 }
  0xa9   : > { %v782_v5 = vmax.f32 %v715_v3, 0.0 }
  0xaa   : > { %v658_v37 = vpop.f32.mrf.mxu0 }
  0xab   : > { %v759_v40 = vmax.f32 %v658_v37, 0.0  ;;  %v810_v6 = vpack.c.bf16 %v782_v5, %v781_v0 }
  0xad   : > { %4507 = vmatmul.msk.bf16.gmra.mxu0 %vm573_vm2, %v4735_v36  ;;  %4539 = vmatmul.msk.bf16.vlgmr.msra.gmra.mxu2 %vm839_vm4, %v810_v6 }
  0xb0   : > { %v718_v8 = vpop.f32.mrf.mxu3 }
  0xb1   : > { %v783_v12 = vmax.f32 %v718_v8, 0.0 }
  0xb2   : > { %v660_v39 = vpop.f32.mrf.mxu0 }
  0xb3   : > { %v760_v41 = vmax.f32 %v660_v39, 0.0  ;;  %v1197_v39 = vld [vmem:[#allocation2] sm:$0x8] }
  0xb5   : > { %v799_v42 = vpack.c.bf16 %v760_v41, %v759_v40  ;;  %v1252_v40 = vunpack.c.l.b16 %v5354_v38  ;;  %v1315_v41 = vunpack.c.l.b16 %v1197_v39 }
  0xb7   : > { %4528 = vmatmul.msk.bf16.gmra.mxu1 %vm839_vm4, %v799_v42 }
  0xb8   : > { %v720_v14 = vpop.f32.mrf.mxu3 }
  0xb9   : > { %v784_v15 = vmax.f32 %v720_v14, 0.0 }
  0xba   : > { %v663_v44 = vpop.f32.mrf.mxu0 }
  0xbb   : > { %v761_v47 = vmax.f32 %v663_v44, 0.0  ;;  %v811_v16 = vpack.c.bf16 %v784_v15, %v783_v12 }
  0xbd   : > { %4508 = vmatmul.msk.bf16.gmra.mxu0 %vm573_vm2, %v4736_v43  ;;  %4540 = vmatmul.msk.bf16.gmra.mxu2 %vm839_vm4, %v811_v16 }
  0xc0   : > { %v723_v18 = vpop.f32.mrf.mxu3 }
  0xc1   : > { %v785_v23 = vmax.f32 %v723_v18, 0.0 }
  0xc2   : > { %v665_v46 = vpop.f32.mrf.mxu0 }
  0xc3   : > { %v762_v48 = vmax.f32 %v665_v46, 0.0 }
  0xc5   : > { %v800_v49 = vpack.c.bf16 %v762_v48, %v761_v47 }
  0xc7   : > { %4529 = vmatmul.msk.bf16.gmra.mxu1 %vm839_vm4, %v800_v49  ;;  %v1316_v49 = vpack.c.b16 %v1252_v40, %v1315_v41 }
  0xc8   : > { %v725_v25 = vpop.f32.mrf.mxu3 }
  0xc9   : > { %v786_v26 = vmax.f32 %v725_v25, 0.0 }
  0xca   : > { %v668_v51 = vpop.f32.mrf.mxu0 }
  0xcb   : > { %v763_v54 = vmax.f32 %v668_v51, 0.0  ;;  %v812_v27 = vpack.c.bf16 %v786_v26, %v785_v23  ;;  %v1321_v51 = vshll.u32 %v1316_v49, 16 }
  0xcd   : > { %4509 = vmatmul.msk.bf16.gmra.mxu0 %vm573_vm2, %v4737_v50  ;;  %4541 = vmatmul.msk.bf16.gmra.mxu2 %vm839_vm4, %v812_v27  ;;  %v1323_v59 = vrot.slane %v1321_v51, 1 }
  0xd0   : > { %v728_v29 = vpop.f32.mrf.mxu3 }
  0xd1   : > { %v787_v33 = vmax.f32 %v728_v29, 0.0 }
  0xd2   : > { %v670_v53 = vpop.f32.mrf.mxu0 }
  0xd3   : > { %v764_v55 = vmax.f32 %v670_v53, 0.0 }
  0xd5   : > { %v801_v56 = vpack.c.bf16 %v764_v55, %v763_v54 }
  0xd7   : > { %4530 = vmatmul.msk.bf16.gmra.mxu1 %vm839_vm4, %v801_v56 }
  0xd8   : > { %v730_v35 = vpop.f32.mrf.mxu3 }
  0xd9   : > { %v788_v36 = vmax.f32 %v730_v35, 0.0 }
  0xda   : > { %v673_v57 = vpop.f32.mrf.mxu0 }
  0xdb   : > { %v765_v60 = vmax.f32 %v673_v57, 0.0  ;;  %v813_v37 = vpack.c.bf16 %v788_v36, %v787_v33 }
  0xdd   : > { %4542 = vmatmul.msk.bf16.gmra.mxu2 %vm839_vm4, %v813_v37 }
  0xe0   : > { %v733_v45 = vpop.f32.mrf.mxu3 }
  0xe1   : > { %v789_v53 = vmax.f32 %v733_v45, 0.0 }
  0xe2   : > { %v675_v58 = vpop.f32.mrf.mxu0 }
  0xe3   : > { %v766_v61 = vmax.f32 %v675_v58, 0.0  ;;  %v1319_v58 = vshrl.u32 %v1316_v49, 16 }
  0xe5   : > { %v802_v62 = vpack.c.bf16 %v766_v61, %v765_v60  ;;  %v1324_v1 = vor.u32 %v1323_v59, %v1319_v58 }
  0xe7   : > { %4531 = vmatmul.msk.bf16.gmra.mxu1 %vm839_vm4, %v802_v62  ;;  %v1531_v62 = vrot.slane %v1316_v49, 1 }
  0xe8   : > { %v735_v54 = vpop.f32.mrf.mxu3 }
  0xe9   : > { %v790_v56 = vmax.f32 %v735_v54, 0.0 }
  0xea   : > { %v678_v2 = vpop.f32.mrf.mxu0 }
  0xeb   : > { %v767_v9 = vmax.f32 %v678_v2, 0.0  ;;  %v814_v60 = vpack.c.bf16 %v790_v56, %v789_v53 }
  0xed   : > { %4543 = vmatmul.msk.bf16.gmra.mxu2 %vm839_vm4, %v814_v60 }
  0xf0   : > { %v738_v8 = vpop.f32.mrf.mxu3 }
  0xf1   : > { %v791_v18 = vmax.f32 %v738_v8, 0.0 }
  0xf2   : > { %v680_v7 = vpop.f32.mrf.mxu0 }
  0xf3   : > { %v768_v10 = vmax.f32 %v680_v7, 0.0 }
  0xf5   : > { %v803_v11 = vpack.c.bf16 %v768_v10, %v767_v9 }
  0xf7   : > { %4532 = vmatmul.msk.bf16.gmra.mxu1 %vm839_vm4, %v803_v11 }
  0xfa   : > { %v683_v13 = vpop.f32.mrf.mxu0 }
  0xfb   : > { %v769_v19 = vmax.f32 %v683_v13, 0.0  ;;  %v1199_v13 = vld [vmem:[#allocation2 + $0x8] sm:$0x8] }
  0xfc   : > { %v1618_v16 = vunpack.c.l.b16 %v1199_v13 }
 0x102   : > { %v685_v17 = vpop.f32.mrf.mxu0 }
 0x103   : > { %v770_v20 = vmax.f32 %v685_v17, 0.0 }
 0x105   : > { %v804_v22 = vpack.c.bf16 %v770_v20, %v769_v19  ;;  %v740_v19 = vpop.f32.mrf.mxu3 }
 0x106   : > { %v792_v23 = vmax.f32 %v740_v19, 0.0 }
 0x107   : > { %4533 = vmatmul.msk.bf16.gmra.mxu1 %vm839_vm4, %v804_v22  ;;  %v4768_v22 = vld [vmem:[%s7670_s3 + $0x88] sm:$0xff] }
 0x108   : > { %3498 = vmatpush.bf16.msrb.mxu0 %v4768_v22  ;;  %v815_v26 = vpack.c.bf16 %v792_v23, %v791_v18 }
 0x10a   : > { %v688_v24 = vpop.f32.mrf.mxu0  ;;  %4544 = vmatmul.msk.bf16.gmra.mxu2 %vm839_vm4, %v815_v26 }
 0x10b   : > { %v771_v30 = vmax.f32 %v688_v24, 0.0 }
 0x10d   : > { %v743_v45 = vpop.f32.mrf.mxu3 }
 0x112   : > { %v690_v28 = vpop.f32.mrf.mxu0 }
 0x113   : > { %v772_v31 = vmax.f32 %v690_v28, 0.0 }
 0x115   : > { %v805_v32 = vpack.c.bf16 %v772_v31, %v771_v30  ;;  %v4767_v30 = vld [vmem:[%s7670_s3 + $0x80] sm:$0xff] }
 0x116   : > { %3499 = vmatpush.bf16.msrb.mxu0 %v4767_v30 }
 0x117   : > { %4534 = vmatmul.msk.bf16.gmra.mxu1 %vm839_vm4, %v805_v32 }
 0x11a   : > { %v693_v34 = vpop.f32.mrf.mxu0 }
 0x11b   : > { %v773_v43 = vmax.f32 %v693_v34, 0.0 }
 0x122   : > { %v695_v42 = vpop.f32.mrf.mxu0 }
 0x123   : > { %v774_v44 = vmax.f32 %v695_v42, 0.0 }
 0x124   : > { %v918_v46 = vpop.f32.mrf.mxu1 }
 0x125   : > { %v806_v47 = vpack.c.bf16 %v774_v44, %v773_v43  ;;  %v1022_v48 = vmax.f32 %v918_v46, 0.0 }
 0x127   : > { %v1073_v50 = vpack.c.bf16 %v1022_v48, %v1022_v48  ;;  %4535 = vmatmul.msk.bf16.gmra.mxu1 %vm839_vm4, %v806_v47 }
 0x129   : > { %1114 = vst.msk [vmem:[#allocation2 + $0xc] sm:$0xf] %vm1063_vm5, %v1073_v50 }
 0x12a   : > { %v698_v52 = vpop.f32.mrf.mxu0 }
 0x12b   : > { %v775_v4 = vmax.f32 %v698_v52, 0.0  ;;  %v793_v52 = vmax.f32 %v743_v45, 0.0 }
 0x12c   : > { %v920_v55 = vpop.f32.mrf.mxu1 }
 0x12d   : > { %v1023_v57 = vmax.f32 %v920_v55, 0.0  ;;  %v745_v55 = vpop.f32.mrf.mxu3 }
 0x12f   : > { %v1074_v61 = vpack.c.bf16 %v1023_v57, %v1023_v57  ;;  %v794_v57 = vmax.f32 %v745_v55, 0.0 }
 0x130   : > { %v5362_v63 = vld [vmem:[#allocation2 + $0x8] sm:$0xff]  }
 0x131   : > { %1115 = vst.msk [vmem:[#allocation2 + $0x10] sm:$0xf] %vm1063_vm5, %v1074_v61  ;;  %v1532_v0 = vrot.slane %v5362_v63, 1  ;;  %v1326_v2 = vshll.u32 %v5362_v63, 16  ;;  %v4774_v15 = vunpack.c.h.b16 %v5362_v63  ;;  %v1330_v29 = vshrl.u32 %v5362_v63, 16 }
 0x132   : > { %v700_v3 = vpop.f32.mrf.mxu0  ;;  %v816_v60 = vpack.c.bf16 %v794_v57, %v793_v52 }
 0x133   : > { %v776_v5 = vmax.f32 %v700_v3, 0.0  ;;  %v1533_v6 = vsel %vm1530_vm6, %v1531_v62, %v1532_v0  ;;  %v1328_v7 = vrot.slane %v1326_v2, 1  ;;  %v1622_v25 = vpack.c.b16 %v4774_v15, %v1618_v16 }
 0x134   : > { %1572 = vrot.lane.b32.xlu1 %v1533_v6, %s5187_s16  ;;  %v923_v9 = vpop.f32.mrf.mxu1  ;;  %4545 = vmatmul.msk.bf16.gmra.mxu2 %vm839_vm4, %v816_v60 }
 0x135   : > { %v807_v10 = vpack.c.bf16 %v776_v5, %v775_v4  ;;  %v1024_v11 = vmax.f32 %v923_v9, 0.0  ;;  %v1329_v12 = vsel %vm1317_vm7, %v1324_v1, %v1328_v7  ;;  %v1625_v32 = vrot.slane %v1622_v25, 1 }
 0x136   : > { %1485 = vrot.lane.b32.xlu0 %v1329_v12, %s5188_s19  ;;  %v1332_v36 = vor.u32 %v1330_v29, %v1328_v7  ;;  %v748_v12 = vpop.f32.mrf.mxu3 }
 0x137   : > { %v1075_v14 = vpack.c.bf16 %v1024_v11, %v1024_v11  ;;  %4536 = vmatmul.msk.bf16.gmra.mxu1 %vm839_vm4, %v807_v10 }
 0x139   : > { %1116 = vst.msk [vmem:[#allocation2 + $0x14] sm:$0xf] %vm1063_vm5, %v1075_v14 }
 0x13a   : > { %v703_v17 = vpop.f32.mrf.mxu0 }
 0x13b   : > { %v777_v34 = vmax.f32 %v703_v17, 0.0 }
 0x13c   : > { %v925_v20 = vpop.f32.mrf.mxu1 }
 0x13d   : > { %v1025_v24 = vmax.f32 %v925_v20, 0.0 }
 0x13f   : > { %v1076_v27 = vpack.c.bf16 %v1025_v24, %v1025_v24 }
 0x140   : > { %v5378_v28 = vld [vmem:[#allocation2 + $0x10] sm:$0xff]  }
 0x141   : > { %1117 = vst.msk [vmem:[#allocation2 + $0x18] sm:$0xf] %vm1063_vm5, %v1076_v27  ;;  %v1534_v31 = vrot.slane %v5378_v28, 1  ;;  %v1334_v33 = vshll.u32 %v5378_v28, 16  ;;  %v4777_v44 = vunpack.c.l.b16 %v5378_v28  ;;  %v1207_v58 = vld [vmem:[#allocation2 + $0x14] sm:$0xe]  ;;  %v4778_v2 = vunpack.c.h.b16 %v5378_v28 }
 0x142   : > { %v705_v35 = vpop.f32.mrf.mxu0  ;;  %v2025_v4 = vunpack.c.l.b16 %v1207_v58 }
 0x143   : > { %v778_v37 = vmax.f32 %v705_v35, 0.0  ;;  %v1626_v39 = vsel %vm1530_vm6, %v1625_v32, %v1534_v31  ;;  %v1535_v41 = vsel %vm1530_vm6, %v1532_v0, %v1534_v31  ;;  %v5390_v42 = vrot.slane %v1334_v33, 1 }
 0x144   : > { %1631 = vrot.lane.b32.xlu2 %v1626_v39, %s5189_s25  ;;  %1574 = vrot.lane.b32.xlu1 %v1535_v41, %s5187_s16  ;;  %v928_v43 = vpop.f32.mrf.mxu1  ;;  %v1673_v50 = vpack.c.b16 %v4777_v44, %v4774_v15  ;;  %v1338_v32 = vshrl.u32 %v5378_v28, 16  ;;  %v795_v44 = vmax.f32 %v748_v12, 0.0 }
 0x145   : > { %v808_v46 = vpack.c.bf16 %v778_v37, %v777_v34  ;;  %v1026_v47 = vmax.f32 %v928_v43, 0.0  ;;  %v1337_v48 = vsel %vm1317_vm7, %v1332_v36, %v5390_v42 }
 0x146   : > { %1487 = vrot.lane.b32.xlu0 %v1337_v48, %s5188_s19  ;;  %v1887_v54 = vrot.slane %v1673_v50, 6  ;;  %v1696_v62 = vshrl.u32 %v1673_v50, 16  ;;  %v1699_v0 = vshll.u32 %v1673_v50, 16  ;;  %v750_v50 = vpop.f32.mrf.mxu3 }
 0x147   : > { %v1077_v49 = vpack.c.bf16 %v1026_v47, %v1026_v47  ;;  %4537 = vmatmul.msk.bf16.gmra.mxu1 %vm839_vm4, %v808_v46 }
 0x148   : > { %v1698_v13 = vrot.slane %v1696_v62, 5  ;;  %v1701_v14 = vrot.slane %v1699_v0, 6 }
 0x149   : > { %1118 = vst.msk [vmem:[#allocation2 + $0x1c] sm:$0xf] %vm1063_vm5, %v1077_v49 }
 0x14a   : > { %v708_v51 = vpop.f32.mrf.mxu0  ;;  %v5423_v34 = vor.u32 %v1701_v14, %v1698_v13 }
 0x14b   : > { %v779_v5 = vmax.f32 %v708_v51, 0.0 }
 0x14c   : > { %v930_v53 = vpop.f32.mrf.mxu1 }
 0x14d   : > { %v1027_v56 = vmax.f32 %v930_v53, 0.0  ;;  %v796_v53 = vmax.f32 %v750_v50, 0.0 }
 0x14e   : > { %1928 = vrot.lane.b32.xlu0 %v1887_v54, %s5188_s19 }
 0x14f   : > { %v1078_v59 = vpack.c.bf16 %v1027_v56, %v1027_v56  ;;  %v817_v62 = vpack.c.bf16 %v796_v53, %v795_v44 }
 0x150   : > { %v5401_v61 = vld [vmem:[#allocation2 + $0x18] sm:$0xff]  }
 0x151   : > { %1119 = vst.msk [vmem:[#allocation2 + $0x20] sm:$0xf] %vm1063_vm5, %v1078_v59  ;;  %v1536_v1 = vrot.slane %v5401_v61, 1  ;;  %v4781_v3 = vunpack.c.l.b16 %v5401_v61  ;;  %v1342_v33 = vshll.u32 %v5401_v61, 16  ;;  %4546 = vmatmul.msk.bf16.gmra.mxu2 %vm839_vm4, %v817_v62 }
 0x152   : > { %v710_v6 = vpop.f32.mrf.mxu0 }
 0x153   : > { %v780_v7 = vmax.f32 %v710_v6, 0.0  ;;  %v5411_v8 = vsel %vm1530_vm6, %v1534_v31, %v1536_v1  ;;  %v1674_v9 = vpack.c.b16 %v4781_v3, %v4778_v2  ;;  %v2026_v10 = vpack.c.b16 %v4781_v3, %v2025_v4 }
 0x154   : > { %1633 = vrot.lane.b32.xlu2 %v5411_v8, %s5189_s25  ;;  %v933_v11 = vpop.f32.mrf.mxu1  ;;  %v1344_v4 = vrot.slane %v1342_v33, 1 }
 0x155   : > { %v809_v15 = vpack.c.bf16 %v780_v7, %v779_v5  ;;  %v1028_v16 = vmax.f32 %v933_v11, 0.0  ;;  %v1888_v17 = vrot.slane %v1674_v9, 6  ;;  %v2029_v18 = vshrl.u32 %v2026_v10, 16 }
 0x156   : > { %v2032_v19 = vshll.u32 %v2026_v10, 16  ;;  %v2172_v20 = vrot.slane %v2026_v10, 7  ;;  %v1704_v25 = vshrl.u32 %v1674_v9, 16  ;;  %v1707_v30 = vshll.u32 %v1674_v9, 16 }
 0x157   : > { %v1079_v22 = vpack.c.bf16 %v1028_v16, %v1028_v16  ;;  %4538 = vmatmul.msk.bf16.gmra.mxu1 %vm839_vm4, %v809_v15  ;;  %v1889_v23 = vsel %vm637_vm0, %v1887_v54, %v1888_v17  ;;  %v2031_v24 = vrot.slane %v2029_v18, 6  ;;  %v1340_v10 = vor.u32 %v1338_v32, %v5390_v42 }
 0x158   : > { %1930 = vrot.lane.b32.xlu1 %v1889_v23, %s5188_s19  ;;  %v5418_v26 = vld [vmem:[#allocation2 + $0x1c] sm:$0xff]   ;;  %v2034_v27 = vrot.slane %v2032_v19, 7  ;;  %v2562_v29 = vshrl.u32 %v2172_v20, 16  ;;  %v2565_v31 = vshll.u32 %v2172_v20, 16  ;;  %v1706_v39 = vrot.slane %v1704_v25, 5 }
 0x159   : > { %1120 = vst.msk [vmem:[#allocation2 + $0x24] sm:$0xf] %vm1063_vm5, %v1079_v22  ;;  %v1890_v35 = vrot.slane %v5418_v26, 6  ;;  %v1713_v36 = vshrl.u32 %v5418_v26, 16  ;;  %v1716_v37 = vshll.u32 %v5418_v26, 16  ;;  %v2173_v43 = vrot.slane %v5418_v26, 7 }
 0x15a   : > { %v2035_v41 = vor.u32 %v2034_v27, %v2031_v24  ;;  %v1709_v45 = vrot.slane %v1707_v30, 6  ;;  %v2564_v49 = vrot.slane %v2562_v29, 2  ;;  %v2567_v55 = vrot.slane %v2565_v31, 3 }
 0x15b   : > { %v1891_v28 = vsel %vm637_vm0, %v1888_v17, %v1890_v35  ;;  %v2036_v47 = vrot.slane %v1713_v36, 6  ;;  %v2037_v48 = vrot.slane %v1716_v37, 7  ;;  %v2174_v52 = vsel %vm903_vm3, %v2172_v20, %v2173_v43 }
 0x15c   : > { %1982 = vrot.lane.b32.xlu2 %v1888_v17, %s5187_s16  ;;  %v935_v46 = vpop.f32.mrf.mxu1  ;;  %1984 = vrot.lane.b32.xlu0 %v1891_v28, %s5187_s16  ;;  %v1715_v54 = vrot.slane %v1713_v36, 5  ;;  %v2570_v56 = vshrl.u32 %v2174_v52, 16  ;;  %v2573_v57 = vshll.u32 %v2174_v52, 16  ;;  %v1710_v58 = vor.u32 %v1709_v45, %v1706_v39 }
 0x15d   : > { %v1029_v51 = vmax.f32 %v935_v46, 0.0  ;;  %v5435_v60 = vor.u32 %v2037_v48, %v2036_v47  ;;  %v1718_v0 = vrot.slane %v1716_v37, 6  ;;  %v2568_v7 = vor.u32 %v2567_v55, %v2564_v49  ;;  %v753_v49 = vpop.f32.mrf.mxu3 }
 0x15e   : > { %v2572_v2 = vrot.slane %v2570_v56, 2  ;;  %v2575_v3 = vrot.slane %v2573_v57, 3  ;;  %v5440_v5 = vsel %vm1694_vm8, %v5423_v34, %v1710_v58  ;;  %v1345_v15 = vsel %vm1317_vm7, %v1340_v10, %v1344_v4  ;;  %v978_v56 = vpop.f32.mrf.mxu2 }
 0x15f   : > { %v1080_v59 = vpack.c.bf16 %v1029_v51, %v1029_v51  ;;  %v1719_v6 = vor.u32 %v1718_v0, %v1715_v54  ;;  %v2039_v11 = vsel %vm2027_vm9, %v2035_v41, %v5435_v60  ;;  %v1346_v46 = vshrl.u32 %v5401_v61, 16 }
 0x160   : > { %2126 = vrot.lane.b32.xlu1 %v2035_v41, %s5189_s25  ;;  %v2576_v9 = vor.u32 %v2575_v3, %v2572_v2  ;;  %v5453_v16 = vld [vmem:[#allocation2 + $0x20] sm:$0xff]   ;;  %v797_v26 = vmax.f32 %v753_v49, 0.0  ;;  %v1046_v62 = vmax.f32 %v978_v56, 0.0 }
 0x161   : > { %1121 = vst.msk [vmem:[#allocation2 + $0x28] sm:$0xf] %vm1063_vm5, %v1080_v59  ;;  %v5448_v12 = vsel %vm1694_vm8, %v1710_v58, %v1719_v6  ;;  %v1538_v18 = vrot.slane %v5453_v16, 1  ;;  %v1350_v31 = vshll.u32 %v5453_v16, 16  ;;  %v1348_v50 = vor.u32 %v1346_v46, %v1344_v4 }
 0x162   : > { %v2577_v14 = vsel %vm2530_vm10, %v2568_v7, %v2576_v9  ;;  %v818_v55 = vpack.c.bf16 %v797_v26, %v797_v26 }
 0x163   : > { %4624 = vmatmul.msk.bf16.vlgmr.msrb.gmra.mxu0 %vm2213_vm11, %v2577_v14  ;;  %v1539_v25 = vsel %vm1530_vm6, %v1536_v1, %v1538_v18 }
 0x164   : > { %2128 = vrot.lane.b32.xlu2 %v2039_v11, %s5189_s25  ;;  %v938_v13 = vpop.f32.mrf.mxu1  ;;  %1489 = vrot.lane.b32.xlu0 %v1345_v15, %s5188_s19 }
 0x165   : > { %v1030_v17 = vmax.f32 %v938_v13, 0.0  ;;  %4547 = vmatmul.msk.bf16.gmra.mxu2 %vm839_vm4, %v818_v55  ;;  %v755_v0 = vpop.f32.mrf.mxu3 }
 0x167   : > { %v1081_v42 = vpack.c.bf16 %v1030_v17, %v1030_v17  ;;  %v980_v17 = vpop.f32.mrf.mxu2 }
 0x168   : > { %1576 = vrot.lane.b32.xlu1 %v5411_v8, %s5187_s16  ;;  %v5460_v19 = vld [vmem:[#allocation2 + $0x24] sm:$0xff]  }
 0x169   : > { %1122 = vst.msk [vmem:[#allocation2 + $0x2c] sm:$0xf] %vm1063_vm5, %v1081_v42  ;;  %v1892_v20 = vrot.slane %v5460_v19, 6  ;;  %v1722_v22 = vshrl.u32 %v5460_v19, 16  ;;  %v1725_v23 = vshll.u32 %v5460_v19, 16  ;;  %v2175_v24 = vrot.slane %v5460_v19, 7 }
 0x16a   : > { %v1047_v19 = vmax.f32 %v980_v17, 0.0 }
 0x16b   : > { %v2040_v8 = vrot.slane %v1722_v22, 6  ;;  %v2041_v29 = vrot.slane %v1725_v23, 7  ;;  %v2176_v30 = vsel %vm903_vm3, %v2173_v43, %v2175_v24  ;;  %v1724_v37 = vrot.slane %v1722_v22, 5 }
 0x16c   : > { %1635 = vrot.lane.b32.xlu2 %v1539_v25, %s5189_s25  ;;  %v940_v27 = vpop.f32.mrf.mxu1  ;;  %1932 = vrot.lane.b32.xlu0 %v1891_v28, %s5188_s19  ;;  %v2595_v33 = vshrl.u32 %v2176_v30, 16  ;;  %v2598_v36 = vshll.u32 %v2176_v30, 16  ;;  %v1893_v1 = vsel %vm637_vm0, %v1890_v35, %v1892_v20  ;;  %v1727_v39 = vrot.slane %v1725_v23, 6 }
 0x16d   : > { %v1031_v32 = vmax.f32 %v940_v27, 0.0  ;;  %v5479_v44 = vor.u32 %v2041_v29, %v2040_v8  ;;  %v1352_v28 = vrot.slane %v1350_v31, 1  ;;  %v1354_v31 = vshrl.u32 %v5453_v16, 16 }
 0x16e   : > { %v2597_v45 = vrot.slane %v2595_v33, 2  ;;  %v2600_v43 = vrot.slane %v2598_v36, 3  ;;  %v1728_v47 = vor.u32 %v1727_v39, %v1724_v37 }
 0x16f   : > { %v1082_v41 = vpack.c.bf16 %v1031_v32, %v1031_v32  ;;  %v2043_v51 = vsel %vm2027_vm9, %v5435_v60, %v5479_v44  ;;  %v1353_v53 = vsel %vm1317_vm7, %v1348_v50, %v1352_v28  ;;  %v1356_v37 = vor.u32 %v1354_v31, %v1352_v28  ;;  %v983_v28 = vpop.f32.mrf.mxu2  ;;  %v4757_v50 = vld [vmem:[%s7670_s3 + $0x30] sm:$0xff] }
 0x170   : > { %1986 = vrot.lane.b32.xlu1 %v1893_v1, %s5187_s16  ;;  %v2601_v48 = vor.u32 %v2600_v43, %v2597_v45  ;;  %v5485_v35 = vsel %vm1694_vm8, %v1719_v6, %v1728_v47  ;;  %v5493_v54 = vld [vmem:[#allocation2 + $0x28] sm:$0xff]   ;;  %v1048_v26 = vmax.f32 %v983_v28, 0.0 }
 0x171   : > { %1123 = vst.msk [vmem:[#allocation2 + $0x30] sm:$0xf] %vm1063_vm5, %v1082_v41  ;;  %v1540_v59 = vrot.slane %v5493_v54, 1  ;;  %v1358_v15 = vshll.u32 %v5493_v54, 16  ;;  %v1098_v41 = vpack.c.bf16 %v1047_v19, %v1047_v19 }
 0x172   : > { %v2602_v52 = vsel %vm2530_vm10, %v2576_v9, %v2601_v48  ;;  %v1097_v9 = vpack.c.bf16 %v1046_v62, %v1046_v62  ;;  %v1099_v56 = vpack.c.bf16 %v1048_v26, %v1048_v26 }
 0x173   : > { %4625 = vmatmul.msk.bf16.gmra.mxu0 %vm2213_vm11, %v2602_v52  ;;  %v1541_v7 = vsel %vm1530_vm6, %v1538_v18, %v1540_v59  ;;  %v5526_v32 = vrot.slane %v1358_v15, 1  ;;  %1139 = vst.msk [vmem:[#allocation2 + $0x70] sm:$0xf] %vm1063_vm5, %v1098_v41 }
 0x174   : > { %2130 = vrot.lane.b32.xlu2 %v2043_v51, %s5189_s25  ;;  %v943_v61 = vpop.f32.mrf.mxu1  ;;  %1491 = vrot.lane.b32.xlu0 %v1353_v53, %s5188_s19  ;;  %1138 = vst.msk [vmem:[#allocation2 + $0x6c] sm:$0xf] %vm1063_vm5, %v1097_v9 }
 0x175   : > { %v1032_v57 = vmax.f32 %v943_v61, 0.0  ;;  %v1361_v43 = vsel %vm1317_vm7, %v1356_v37, %v5526_v32  ;;  %1140 = vst.msk [vmem:[#allocation2 + $0x74] sm:$0xf] %vm1063_vm5, %v1099_v56 }
 0x177   : > { %v1083_v58 = vpack.c.bf16 %v1032_v57, %v1032_v57 }
 0x178   : > { %1578 = vrot.lane.b32.xlu1 %v1539_v25, %s5187_s16  ;;  %v5500_v60 = vld [vmem:[#allocation2 + $0x2c] sm:$0xff]  }
 0x179   : > { %1124 = vst.msk [vmem:[#allocation2 + $0x34] sm:$0xf] %vm1063_vm5, %v1083_v58  ;;  %v1894_v2 = vrot.slane %v5500_v60, 6  ;;  %v1731_v3 = vshrl.u32 %v5500_v60, 16  ;;  %v1734_v4 = vshll.u32 %v5500_v60, 16  ;;  %v2177_v6 = vrot.slane %v5500_v60, 7 }
 0x17b   : > { %v2044_v11 = vrot.slane %v1731_v3, 6  ;;  %v2045_v13 = vrot.slane %v1734_v4, 7  ;;  %v2178_v14 = vsel %vm903_vm3, %v2175_v24, %v2177_v6  ;;  %v1733_v18 = vrot.slane %v1731_v3, 5 }
 0x17c   : > { %1637 = vrot.lane.b32.xlu2 %v1541_v7, %s5189_s25  ;;  %v945_v10 = vpop.f32.mrf.mxu1  ;;  %1934 = vrot.lane.b32.xlu0 %v1893_v1, %s5188_s19  ;;  %v2620_v22 = vshrl.u32 %v2178_v14, 16  ;;  %v2623_v23 = vshll.u32 %v2178_v14, 16  ;;  %v1895_v25 = vsel %vm637_vm0, %v1892_v20, %v1894_v2  ;;  %v1736_v27 = vrot.slane %v1734_v4, 6  ;;  %v4758_v20 = vld [vmem:[%s7670_s3 + $0x38] sm:$0xff]  ;;  %v4756_v4 = vld [vmem:[%s7670_s3 + $0x28] sm:$0xff] }
 0x17d   : > { %v1033_v42 = vmax.f32 %v945_v10, 0.0  ;;  %v5522_v24 = vor.u32 %v2045_v13, %v2044_v11  ;;  %3266 = vmatpush.bf16.msrb.mxu2 %v4758_v20 }
 0x17e   : > { %v2622_v29 = vrot.slane %v2620_v22, 2  ;;  %v2625_v30 = vrot.slane %v2623_v23, 3  ;;  %v5528_v33 = vor.u32 %v1736_v27, %v1733_v18  ;;  %v1362_v22 = vshrl.u32 %v5493_v54, 16  ;;  %v4755_v18 = vld [vmem:[%s7670_s3 + $0x20] sm:$0xff]  ;;  %v4754_v54 = vld [vmem:[%s7670_s3 + $0x18] sm:$0xff] }
 0x17f   : > { %v1084_v8 = vpack.c.bf16 %v1033_v42, %v1033_v42  ;;  %v2047_v16 = vsel %vm2027_vm9, %v5479_v44, %v5522_v24 }
 0x180   : > { %1988 = vrot.lane.b32.xlu1 %v1895_v25, %s5187_s16  ;;  %v5531_v36 = vor.u32 %v2625_v30, %v2622_v29  ;;  %v5538_v1 = vsel %vm1694_vm8, %v1728_v47, %v5528_v33  ;;  %v5548_v46 = vld [vmem:[#allocation2 + $0x30] sm:$0xff]   ;;  %v1364_v27 = vor.u32 %v1362_v22, %v5526_v32 }
 0x181   : > { %1125 = vst.msk [vmem:[#allocation2 + $0x38] sm:$0xf] %vm1063_vm5, %v1084_v8  ;;  %3267 = vmatpush.bf16.msrb.mxu2 %v4757_v50  ;;  %v1366_v3 = vshll.u32 %v5548_v46, 16 }
 0x182   : > { %v2627_v39 = vsel %vm2530_vm10, %v2601_v48, %v5531_v36  ;;  %v1542_v48 = vrot.slane %v5548_v46, 1 }
 0x183   : > { %4626 = vmatmul.msk.bf16.gmra.mxu0 %vm2213_vm11, %v2627_v39  ;;  %v5591_v23 = vrot.slane %v1366_v3, 1  ;;  %v4753_v39 = vld [vmem:[%s7670_s3 + $0x10] sm:$0xff] }
 0x184   : > { %2132 = vrot.lane.b32.xlu2 %v2047_v16, %s5189_s25  ;;  %v948_v45 = vpop.f32.mrf.mxu1  ;;  %1493 = vrot.lane.b32.xlu0 %v1361_v43, %s5188_s19  ;;  %v1543_v55 = vsel %vm1530_vm6, %v1540_v59, %v1542_v48 }
 0x185   : > { %v1034_v47 = vmax.f32 %v948_v45, 0.0  ;;  %3268 = vmatpush.bf16.msrb.mxu2 %v4756_v4  ;;  %v1369_v19 = vsel %vm1317_vm7, %v1364_v27, %v5591_v23 }
 0x187   : > { %v1085_v44 = vpack.c.bf16 %v1034_v47, %v1034_v47 }
 0x188   : > { %1580 = vrot.lane.b32.xlu1 %v1541_v7, %s5187_s16  ;;  %v5555_v49 = vld [vmem:[#allocation2 + $0x34] sm:$0xff]   ;;  %v985_v7 = vpop.f32.mrf.mxu2 }
 0x189   : > { %1126 = vst.msk [vmem:[#allocation2 + $0x3c] sm:$0xf] %vm1063_vm5, %v1085_v44  ;;  %v1896_v51 = vrot.slane %v5555_v49, 6  ;;  %v1740_v52 = vshrl.u32 %v5555_v49, 16  ;;  %v1743_v61 = vshll.u32 %v5555_v49, 16  ;;  %v2179_v53 = vrot.slane %v5555_v49, 7  ;;  %3269 = vmatpush.bf16.msrb.mxu2 %v4755_v18 }
 0x18a   : > { %v4751_v49 = vld [vmem:[%s7670_s3] sm:$0xff] }
 0x18b   : > { %v2048_v58 = vrot.slane %v1740_v52, 6  ;;  %v2049_v62 = vrot.slane %v1743_v61, 7  ;;  %v2180_v0 = vsel %vm903_vm3, %v2177_v6, %v2179_v53  ;;  %v1742_v11 = vrot.slane %v1740_v52, 5 }
 0x18c   : > { %1639 = vrot.lane.b32.xlu2 %v1543_v55, %s5189_s25  ;;  %v950_v57 = vpop.f32.mrf.mxu1  ;;  %1936 = vrot.lane.b32.xlu0 %v1895_v25, %s5188_s19  ;;  %v2645_v9 = vshrl.u32 %v2180_v0, 16  ;;  %v2648_v10 = vshll.u32 %v2180_v0, 16  ;;  %v1897_v6 = vsel %vm637_vm0, %v1894_v2, %v1896_v51  ;;  %v1745_v13 = vrot.slane %v1743_v61, 6 }
 0x18d   : > { %v1035_v59 = vmax.f32 %v950_v57, 0.0  ;;  %v5587_v15 = vor.u32 %v2049_v62, %v2048_v58  ;;  %v1049_v25 = vmax.f32 %v985_v7, 0.0  ;;  %3270 = vmatpush.bf16.msrb.mxu2 %v4754_v54  ;;  %v4752_v57 = vld [vmem:[%s7670_s3 + $0x8] sm:$0xff] }
 0x18e   : > { %v2647_v17 = vrot.slane %v2645_v9, 2  ;;  %v2650_v42 = vrot.slane %v2648_v10, 3  ;;  %v5596_v60 = vor.u32 %v1745_v13, %v1742_v11 }
 0x18f   : > { %v1086_v14 = vpack.c.bf16 %v1035_v59, %v1035_v59  ;;  %v2051_v29 = vsel %vm2027_vm9, %v5522_v24, %v5587_v15  ;;  %v1100_v31 = vpack.c.bf16 %v1049_v25, %v1049_v25 }
 0x190   : > { %1990 = vrot.lane.b32.xlu1 %v1897_v6, %s5187_s16  ;;  %v5599_v2 = vor.u32 %v2650_v42, %v2647_v17  ;;  %v5608_v8 = vsel %vm1694_vm8, %v5528_v33, %v5596_v60  ;;  %v5619_v20 = vld [vmem:[#allocation2 + $0x38] sm:$0xff]   ;;  %v988_v37 = vpop.f32.mrf.mxu2 }
 0x191   : > { %1127 = vst.msk [vmem:[#allocation2 + $0x40] sm:$0xf] %vm1063_vm5, %v1086_v14  ;;  %v1050_v41 = vmax.f32 %v988_v37, 0.0  ;;  %3271 = vmatpush.bf16.msrb.mxu2 %v4753_v39  ;;  %v1374_v56 = vshll.u32 %v5619_v20, 16  ;;  %v1155_v14 = vld [vmem:[#allocation2] sm:$0xc] }
 0x192   : > { %v2652_v30 = vsel %vm2530_vm10, %v5531_v36, %v5599_v2  ;;  %1141 = vst.msk [vmem:[#allocation2 + $0x78] sm:$0xf] %vm1063_vm5, %v1100_v31  ;;  %v1544_v36 = vrot.slane %v5619_v20, 1  ;;  %v1251_v54 = vunpack.c.l.b16 %v1155_v14 }
 0x193   : > { %4627 = vmatmul.msk.bf16.gmra.mxu0 %vm2213_vm11, %v2652_v30  ;;  %v1101_v50 = vpack.c.bf16 %v1050_v41, %v1050_v41  ;;  %v5668_v13 = vrot.slane %v1374_v56, 1  ;;  %v4763_v41 = vld [vmem:[%s7670_s3 + $0x60] sm:$0xff] }
 0x194   : > { %2134 = vrot.lane.b32.xlu2 %v2051_v29, %s5189_s25  ;;  %v953_v32 = vpop.f32.mrf.mxu1  ;;  %1495 = vrot.lane.b32.xlu0 %v1369_v19, %s5188_s19  ;;  %v1545_v44 = vsel %vm1530_vm6, %v1542_v48, %v1544_v36  ;;  %v4766_v48 = vld [vmem:[%s7670_s3 + $0x78] sm:$0xff] }
 0x195   : > { %v1036_v33 = vmax.f32 %v953_v32, 0.0  ;;  %1142 = vst.msk [vmem:[#allocation2 + $0x7c] sm:$0xf] %vm1063_vm5, %v1101_v50  ;;  %3272 = vmatpush.bf16.msrb.mxu2 %v4752_v57  ;;  %3379 = vmatpush.bf16.msrb.mxu3 %v4766_v48 }
 0x197   : > { %v1087_v24 = vpack.c.bf16 %v1036_v33, %v1036_v33  ;;  %v1293_v33 = vpack.c.b16 %v1252_v40, %v1251_v54 }
 0x198   : > { %1582 = vrot.lane.b32.xlu1 %v1543_v55, %s5187_s16  ;;  %v5626_v16 = vld [vmem:[#allocation2 + $0x3c] sm:$0xff]   ;;  %v990_v58 = vpop.f32.mrf.mxu2 }
 0x199   : > { %1128 = vst.msk [vmem:[#allocation2 + $0x44] sm:$0xf] %vm1063_vm5, %v1087_v24  ;;  %v1898_v45 = vrot.slane %v5626_v16, 6  ;;  %v1749_v43 = vshrl.u32 %v5626_v16, 16  ;;  %v1752_v28 = vshll.u32 %v5626_v16, 16  ;;  %v2181_v47 = vrot.slane %v5626_v16, 7  ;;  %3273 = vmatpush.bf16.msrb.mxu2 %v4751_v49 }
 0x19a   : > { %v1051_v22 = vmax.f32 %v990_v58, 0.0  ;;  %v4761_v16 = vld [vmem:[%s7670_s3 + $0x50] sm:$0xff] }
 0x19b   : > { %v2052_v52 = vrot.slane %v1749_v43, 6  ;;  %v2053_v61 = vrot.slane %v1752_v28, 7  ;;  %v2182_v55 = vsel %vm903_vm3, %v2179_v53, %v2181_v47  ;;  %v1751_v4 = vrot.slane %v1749_v43, 5 }
 0x19c   : > { %1641 = vrot.lane.b32.xlu2 %v1545_v44, %s5189_s25  ;;  %v955_v26 = vpop.f32.mrf.mxu1  ;;  %1938 = vrot.lane.b32.xlu0 %v1897_v6, %s5188_s19  ;;  %v2670_v0 = vshrl.u32 %v2182_v55, 16  ;;  %v2673_v3 = vshll.u32 %v2182_v55, 16  ;;  %v5661_v53 = vsel %vm637_vm0, %v1896_v51, %v1898_v45  ;;  %v1754_v7 = vrot.slane %v1752_v28, 6  ;;  %v4765_v51 = vld [vmem:[%s7670_s3 + $0x70] sm:$0xff] }
 0x19d   : > { %v1037_v62 = vmax.f32 %v955_v26, 0.0  ;;  %v5663_v9 = vor.u32 %v2053_v61, %v2052_v52  ;;  %v1370_v6 = vshrl.u32 %v5548_v46, 16  ;;  %3380 = vmatpush.bf16.msrb.mxu3 %v4765_v51  ;;  %v1102_v30 = vpack.c.bf16 %v1051_v22, %v1051_v22  ;;  %v4762_v61 = vld [vmem:[%s7670_s3 + $0x58] sm:$0xff] }
 0x19e   : > { %v2672_v10 = vrot.slane %v2670_v0, 2  ;;  %v2675_v11 = vrot.slane %v2673_v3, 3  ;;  %v5676_v17 = vor.u32 %v1754_v7, %v1751_v4  ;;  %v1378_v51 = vshrl.u32 %v5619_v20, 16 }
 0x19f   : > { %v1088_v59 = vpack.c.bf16 %v1037_v62, %v1037_v62  ;;  %v1372_v46 = vor.u32 %v1370_v6, %v5591_v23  ;;  %v2055_v25 = vsel %vm2027_vm9, %v5587_v15, %v5663_v9  ;;  %v4764_v23 = vld [vmem:[%s7670_s3 + $0x68] sm:$0xff]  ;;  %1143 = vst.msk [vmem:[#allocation2 + $0x80] sm:$0xf] %vm1063_vm5, %v1102_v30 }
 0x1a0   : > { %1992 = vrot.lane.b32.xlu1 %v5661_v53, %s5187_s16  ;;  %v5679_v42 = vor.u32 %v2675_v11, %v2672_v10  ;;  %v5685_v18 = vsel %vm1694_vm8, %v5596_v60, %v5676_v17  ;;  %v5693_v29 = vld [vmem:[#allocation2 + $0x40] sm:$0xff]   ;;  %v993_v15 = vpop.f32.mrf.mxu2 }
 0x1a1   : > { %1129 = vst.msk [vmem:[#allocation2 + $0x48] sm:$0xf] %vm1063_vm5, %v1088_v59  ;;  %v1377_v31 = vsel %vm1317_vm7, %v1372_v46, %v5668_v13  ;;  %v1546_v19 = vrot.slane %v5693_v29, 1  ;;  %3381 = vmatpush.bf16.msrb.mxu3 %v4764_v23  ;;  %v1052_v43 = vmax.f32 %v993_v15, 0.0  ;;  %v1382_v56 = vshll.u32 %v5693_v29, 16 }
 0x1a2   : > { %v2677_v27 = vsel %vm2530_vm10, %v5599_v2, %v5679_v42  ;;  %v1632_v2 = vpop.permute.xlu2 %1631 }
 0x1a3   : > { %4628 = vmatmul.msk.bf16.gmra.mxu0 %vm2213_vm11, %v2677_v27  ;;  %v5719_v38 = vsel %vm1530_vm6, %v1544_v36, %v1546_v19  ;;  %v1103_v52 = vpack.c.bf16 %v1052_v43, %v1052_v43  ;;  %v5750_v22 = vrot.slane %v1382_v56, 1  ;;  %v1380_v27 = vor.u32 %v1378_v51, %v5668_v13 }
 0x1a4   : > { %2136 = vrot.lane.b32.xlu2 %v2055_v25, %s5189_s25  ;;  %v958_v60 = vpop.f32.mrf.mxu1  ;;  %1497 = vrot.lane.b32.xlu0 %v1377_v31, %s5188_s19 }
 0x1a5   : > { %v1038_v32 = vmax.f32 %v958_v60, 0.0  ;;  %3382 = vmatpush.bf16.msrb.mxu3 %v4763_v41  ;;  %1144 = vst.msk [vmem:[#allocation2 + $0x84] sm:$0xf] %vm1063_vm5, %v1103_v52  ;;  %v1385_v13 = vsel %vm1317_vm7, %v1380_v27, %v5750_v22 }
 0x1a6   : > { %v1573_v57 = vpop.permute.xlu1 %1572 }
 0x1a7   : > { %v1089_v37 = vpack.c.bf16 %v1038_v32, %v1038_v32 }
 0x1a8   : > { %v1486_v24 = vpop.permute.xlu0 %1485  ;;  %1584 = vrot.lane.b32.xlu1 %v1545_v44, %s5187_s16  ;;  %v5708_v39 = vld [vmem:[#allocation2 + $0x44] sm:$0xff]   ;;  %v995_v6 = vpop.f32.mrf.mxu2 }
 0x1a9   : > { %1130 = vst.msk [vmem:[#allocation2 + $0x4c] sm:$0xf] %vm1063_vm5, %v1089_v37  ;;  %v1758_v40 = vshrl.u32 %v5708_v39, 16  ;;  %v1761_v28 = vshll.u32 %v5708_v39, 16  ;;  %v2216_v44 = vsel %vm2213_vm11, %v1293_v33, %v1486_v24  ;;  %v1900_v50 = vrot.slane %v5708_v39, 6  ;;  %3383 = vmatpush.bf16.msrb.mxu3 %v4762_v61  ;;  %v4760_v24 = vld [vmem:[%s7670_s3 + $0x48] sm:$0xff] }
 0x1aa   : > { %v2183_v26 = vrot.slane %v5708_v39, 7  ;;  %v2259_v0 = vsel %vm2257_vm12, %v2216_v44, %v1573_v57  ;;  %v1053_v46 = vmax.f32 %v995_v6, 0.0 }
 0x1ab   : > { %v2056_v55 = vrot.slane %v1758_v40, 6  ;;  %v2057_v58 = vrot.slane %v1761_v28, 7  ;;  %v1760_v59 = vrot.slane %v1758_v40, 5 }
 0x1ac   : > { %1643 = vrot.lane.b32.xlu2 %v5719_v38, %s5189_s25  ;;  %v960_v36 = vpop.f32.mrf.mxu1  ;;  %1940 = vrot.lane.b32.xlu0 %v5661_v53, %s5188_s19  ;;  %v2184_v62 = vsel %vm903_vm3, %v2181_v47, %v2183_v26  ;;  %v1901_v53 = vsel %vm637_vm0, %v1898_v45, %v1900_v50  ;;  %v1763_v47 = vrot.slane %v1761_v28, 6  ;;  %v2302_v45 = vsel %vm2300_vm13, %v2259_v0, %v1632_v2 }
 0x1ad   : > { %v1039_v48 = vmax.f32 %v960_v36, 0.0  ;;  %v2695_v4 = vshrl.u32 %v2184_v62, 16  ;;  %v2698_v7 = vshll.u32 %v2184_v62, 16  ;;  %v5746_v11 = vor.u32 %v2057_v58, %v2056_v55  ;;  %3384 = vmatpush.bf16.msrb.mxu3 %v4761_v16  ;;  %v4759_v36 = vld [vmem:[%s7670_s3 + $0x40] sm:$0xff] }
 0x1ae   : > { %v1634_v3 = vpop.permute.xlu2 %1633  ;;  %v5760_v54 = vor.u32 %v1763_v47, %v1760_v59  ;;  %v1104_v23 = vpack.c.bf16 %v1053_v46, %v1053_v46  ;;  %v2534_v15 = vshll.u32 %v2302_v45, 16  ;;  %v1386_v47 = vshrl.u32 %v5693_v29, 16 }
 0x1af   : > { %v1090_v10 = vpack.c.bf16 %v1039_v48, %v1039_v48  ;;  %v2697_v14 = vrot.slane %v2695_v4, 2  ;;  %v2700_v49 = vrot.slane %v2698_v7, 3  ;;  %v2059_v20 = vsel %vm2027_vm9, %v5663_v9, %v5746_v11 }
 0x1b0   : > { %1994 = vrot.lane.b32.xlu1 %v1901_v53, %s5187_s16  ;;  %v5765_v30 = vld [vmem:[#allocation2 + $0x48] sm:$0xff]   ;;  %v5776_v32 = vsel %vm1694_vm8, %v5676_v17, %v5760_v54  ;;  %v2531_v9 = vshrl.u32 %v2302_v45, 16  ;;  %1145 = vst.msk [vmem:[#allocation2 + $0x88] sm:$0xf] %vm1063_vm5, %v1104_v23  ;;  %v998_v17 = vpop.f32.mrf.mxu2  ;;  %v2536_v28 = vrot.slane %v2534_v15, 3 }
 0x1b1   : > { %1131 = vst.msk [vmem:[#allocation2 + $0x50] sm:$0xf] %vm1063_vm5, %v1090_v10  ;;  %v5757_v25 = vor.u32 %v2700_v49, %v2697_v14  ;;  %3385 = vmatpush.bf16.msrb.mxu3 %v4760_v24  ;;  %v1054_v61 = vmax.f32 %v998_v17, 0.0 }
 0x1b2   : > { %v2533_v40 = vrot.slane %v2531_v9, 2 }
 0x1b3   : > { %v2702_v31 = vsel %vm2530_vm10, %v5679_v42, %v5757_v25  ;;  %v1548_v42 = vrot.slane %v5765_v30, 1  ;;  %v1105_v62 = vpack.c.bf16 %v1054_v61, %v1054_v61 }
 0x1b4   : > { %2138 = vrot.lane.b32.xlu2 %v2059_v20, %s5189_s25  ;;  %v963_v60 = vpop.f32.mrf.mxu1  ;;  %4629 = vmatmul.msk.bf16.gmra.mxu0 %vm2213_vm11, %v2702_v31  ;;  %v2537_v27 = vor.u32 %v2536_v28, %v2533_v40 }
 0x1b5   : > { %v1040_v2 = vmax.f32 %v963_v60, 0.0  ;;  %1499 = vrot.lane.b32.xlu0 %v1385_v13, %s5188_s19  ;;  %1146 = vst.msk [vmem:[#allocation2 + $0x8c] sm:$0xf] %vm1063_vm5, %v1105_v62  ;;  %3386 = vmatpush.bf16.msrb.mxu3 %v4759_v36 }
 0x1b6   : > { %v5781_v37 = vpop.permute.xlu2 %1982  ;;  %v1575_v44 = vpop.permute.xlu1 %1574 }
 0x1b7   : > { %v1091_v33 = vpack.c.bf16 %v1040_v2, %v1040_v2 }
 0x1b8   : > { %v1488_v41 = vpop.permute.xlu0 %1487  ;;  %1586 = vrot.lane.b32.xlu1 %v5719_v38, %s5187_s16  ;;  %v5789_v43 = vld [vmem:[#allocation2 + $0x4c] sm:$0xff]   ;;  %v1549_v38 = vsel %vm1530_vm6, %v1546_v19, %v1548_v42  ;;  %v1390_v19 = vshll.u32 %v5765_v30, 16  ;;  %v1000_v29 = vpop.f32.mrf.mxu2 }
 0x1b9   : > { %1132 = vst.msk [vmem:[#allocation2 + $0x54] sm:$0xf] %vm1063_vm5, %v1091_v33  ;;  %v2218_v52 = vsel %vm2213_vm11, %v5362_v63, %v1488_v41  ;;  %v1767_v56 = vshrl.u32 %v5789_v43, 16  ;;  %v1770_v57 = vshll.u32 %v5789_v43, 16  ;;  %v1902_v48 = vrot.slane %v5789_v43, 6 }
 0x1ba   : > { %v2261_v55 = vsel %vm2257_vm12, %v2218_v52, %v1575_v44  ;;  %v2185_v58 = vrot.slane %v5789_v43, 7  ;;  %v5834_v31 = vrot.slane %v1390_v19, 1  ;;  %v1055_v9 = vmax.f32 %v1000_v29, 0.0 }
 0x1bb   : > { %v2304_v63 = vsel %vm2300_vm13, %v2261_v55, %v1634_v3  ;;  %v2060_v59 = vrot.slane %v1767_v56, 6  ;;  %v2061_v3 = vrot.slane %v1770_v57, 7  ;;  %v1903_v45 = vsel %vm637_vm0, %v1900_v50, %v1902_v48 }
 0x1bc   : > { %v2538_v0 = vshrl.u32 %v2304_v63, 16  ;;  %v2541_v4 = vshll.u32 %v2304_v63, 16  ;;  %1645 = vrot.lane.b32.xlu2 %v1549_v38, %s5189_s25  ;;  %v965_v7 = vpop.f32.mrf.mxu1  ;;  %v2186_v6 = vsel %vm903_vm3, %v2183_v26, %v2185_v58  ;;  %v1388_v50 = vor.u32 %v1386_v47, %v5750_v22 }
 0x1bd   : > { %v1041_v10 = vmax.f32 %v965_v7, 0.0  ;;  %1942 = vrot.lane.b32.xlu0 %v1901_v53, %s5188_s19  ;;  %v2720_v46 = vshrl.u32 %v2186_v6, 16  ;;  %v2723_v53 = vshll.u32 %v2186_v6, 16  ;;  %v5829_v26 = vor.u32 %v2061_v3, %v2060_v59 }
 0x1be   : > { %v2540_v14 = vrot.slane %v2538_v0, 2  ;;  %v2543_v49 = vrot.slane %v2541_v4, 3  ;;  %v5822_v51 = vpop.permute.xlu2 %2128  ;;  %v1393_v24 = vsel %vm1317_vm7, %v1388_v50, %v5834_v31  ;;  %v1106_v41 = vpack.c.bf16 %v1055_v9, %v1055_v9 }
 0x1bf   : > { %v1092_v16 = vpack.c.bf16 %v1041_v10, %v1041_v10  ;;  %v2722_v23 = vrot.slane %v2720_v46, 2  ;;  %v2725_v60 = vrot.slane %v2723_v53, 3  ;;  %v2063_v15 = vsel %vm2027_vm9, %v5746_v11, %v5829_v26 }
 0x1c0   : > { %1996 = vrot.lane.b32.xlu1 %v1903_v45, %s5187_s16  ;;  %v5832_v20 = vor.u32 %v2543_v49, %v2540_v14  ;;  %v5851_v17 = vld [vmem:[#allocation2 + $0x50] sm:$0xff]   ;;  %1147 = vst.msk [vmem:[#allocation2 + $0x90] sm:$0xf] %vm1063_vm5, %v1106_v41  ;;  %v1929_v11 = vpop.permute.xlu0 %1928  ;;  %v1394_v14 = vshrl.u32 %v5765_v30, 16 }
 0x1c1   : > { %1133 = vst.msk [vmem:[#allocation2 + $0x58] sm:$0xf] %vm1063_vm5, %v1092_v16  ;;  %v5839_v39 = vor.u32 %v2725_v60, %v2722_v23  ;;  %v1550_v44 = vrot.slane %v5851_v17, 1  ;;  %v1398_v36 = vshll.u32 %v5851_v17, 16  ;;  %v2345_v49 = vsel %vm2213_vm11, %v5423_v34, %v1929_v11 }
 0x1c2   : > { %v2545_v13 = vsel %vm2530_vm10, %v2537_v27, %v5832_v20  ;;  %v1396_v50 = vor.u32 %v1394_v14, %v5834_v31 }
 0x1c3   : > { %3274 = vmatmul.bf16.vlgmr.msrb.gmra.mxu2 %v2545_v13  ;;  %v2727_v33 = vsel %vm2530_vm10, %v5757_v25, %v5839_v39  ;;  %v1003_v25 = vpop.f32.mrf.mxu2  ;;  %v5899_v16 = vrot.slane %v1398_v36, 1 }
 0x1c4   : > { %2140 = vrot.lane.b32.xlu2 %v2063_v15, %s5189_s25  ;;  %v968_v2 = vpop.f32.mrf.mxu1  ;;  %4630 = vmatmul.msk.bf16.gmra.mxu0 %vm2213_vm11, %v2727_v33  ;;  %v1056_v61 = vmax.f32 %v1003_v25, 0.0 }
 0x1c5   : > { %v1042_v22 = vmax.f32 %v968_v2, 0.0  ;;  %1501 = vrot.lane.b32.xlu0 %v1393_v24, %s5188_s19  ;;  %v2407_v2 = vsel %vm2257_vm12, %v2345_v49, %v5781_v37  ;;  %v1401_v31 = vsel %vm1317_vm7, %v1396_v50, %v5899_v16  ;;  %v5158_v49 = vld [vmem:[#allocation2 + $0x10] sm:$0xff]  }
 0x1c6   : > { %v5855_v40 = vpop.permute.xlu2 %1635  ;;  %v1107_v7 = vpack.c.bf16 %v1056_v61, %v1056_v61 }
 0x1c7   : > { %v1093_v28 = vpack.c.bf16 %v1042_v22, %v1042_v22 }
 0x1c8   : > { %1588 = vrot.lane.b32.xlu1 %v1549_v38, %s5187_s16  ;;  %v5860_v52 = vld [vmem:[#allocation2 + $0x54] sm:$0xff]   ;;  %v1551_v38 = vsel %vm1530_vm6, %v1548_v42, %v1550_v44  ;;  %1148 = vst.msk [vmem:[#allocation2 + $0x94] sm:$0xf] %vm1063_vm5, %v1107_v7 }
 0x1c9   : > { %1134 = vst.msk [vmem:[#allocation2 + $0x5c] sm:$0xf] %vm1063_vm5, %v1093_v28  ;;  %v1904_v63 = vrot.slane %v5860_v52, 6  ;;  %v1776_v62 = vshrl.u32 %v5860_v52, 16  ;;  %v1779_v0 = vshll.u32 %v5860_v52, 16  ;;  %v2187_v4 = vrot.slane %v5860_v52, 7 }
 0x1ca   : > { %v1931_v55 = vpop.permute.xlu1 %1930 }
 0x1cb   : > { %v2064_v19 = vrot.slane %v1776_v62, 6  ;;  %v2065_v10 = vrot.slane %v1779_v0, 7  ;;  %v2188_v3 = vsel %vm903_vm3, %v2185_v58, %v2187_v4  ;;  %v2348_v46 = vsel %vm2213_vm11, %v5440_v5, %v1931_v55  ;;  %v1005_v23 = vpop.f32.mrf.mxu2 }
 0x1cc   : > { %1647 = vrot.lane.b32.xlu2 %v1551_v38, %s5189_s25  ;;  %v970_v59 = vpop.f32.mrf.mxu1  ;;  %v2745_v42 = vshrl.u32 %v2188_v3, 16  ;;  %v2748_v47 = vshll.u32 %v2188_v3, 16  ;;  %v5897_v58 = vsel %vm637_vm0, %v1902_v48, %v1904_v63  ;;  %v1057_v60 = vmax.f32 %v1005_v23, 0.0 }
 0x1cd   : > { %v1043_v6 = vmax.f32 %v970_v59, 0.0  ;;  %1944 = vrot.lane.b32.xlu0 %v1903_v45, %s5188_s19  ;;  %v5901_v27 = vor.u32 %v2065_v10, %v2064_v19 }
 0x1ce   : > { %v5890_v53 = vpop.permute.xlu2 %2130  ;;  %v1985_v45 = vpop.permute.xlu0 %1984  ;;  %v2747_v29 = vrot.slane %v2745_v42, 2  ;;  %v2750_v34 = vrot.slane %v2748_v47, 3  ;;  %v1108_v24 = vpack.c.bf16 %v1057_v60, %v1057_v60 }
 0x1cf   : > { %v1094_v30 = vpack.c.bf16 %v1043_v6, %v1043_v6  ;;  %v2409_v5 = vsel %vm2257_vm12, %v2348_v46, %v1985_v45  ;;  %v2067_v22 = vsel %vm2027_vm9, %v5829_v26, %v5901_v27 }
 0x1d0   : > { %1998 = vrot.lane.b32.xlu1 %v5897_v58, %s5187_s16  ;;  %v2451_v48 = vsel %vm2300_vm13, %v2409_v5, %v5822_v51  ;;  %v5909_v13 = vor.u32 %v2750_v34, %v2747_v29  ;;  %v5923_v11 = vld [vmem:[#allocation2 + $0x58] sm:$0xff]   ;;  %1149 = vst.msk [vmem:[#allocation2 + $0x98] sm:$0xf] %vm1063_vm5, %v1108_v24  ;;  %v1402_v24 = vshrl.u32 %v5851_v17, 16 }
 0x1d1   : > { %1135 = vst.msk [vmem:[#allocation2 + $0x60] sm:$0xf] %vm1063_vm5, %v1094_v30  ;;  %v2553_v9 = vshrl.u32 %v2451_v48, 16  ;;  %v2556_v15 = vshll.u32 %v2451_v48, 16  ;;  %v1552_v10 = vrot.slane %v5923_v11, 1  ;;  %v1406_v30 = vshll.u32 %v5923_v11, 16 }
 0x1d2   : > { %v2127_v33 = vpop.permute.xlu1 %2126  ;;  %v2752_v51 = vsel %vm2530_vm10, %v5839_v39, %v5909_v13 }
 0x1d3   : > { %v2449_v41 = vsel %vm2300_vm13, %v2407_v2, %v2127_v33  ;;  %v2555_v28 = vrot.slane %v2553_v9, 2  ;;  %v2558_v25 = vrot.slane %v2556_v15, 3  ;;  %v1008_v3 = vpop.f32.mrf.mxu2  ;;  %v1553_v60 = vsel %vm1530_vm6, %v1550_v44, %v1552_v10 }
 0x1d4   : > { %v2546_v37 = vshrl.u32 %v2449_v41, 16  ;;  %v2549_v61 = vshll.u32 %v2449_v41, 16  ;;  %2142 = vrot.lane.b32.xlu2 %v2067_v22, %s5189_s25  ;;  %v973_v36 = vpop.f32.mrf.mxu1  ;;  %4631 = vmatmul.msk.bf16.gmra.mxu0 %vm2213_vm11, %v2752_v51  ;;  %v1058_v14 = vmax.f32 %v1008_v3, 0.0 }
 0x1d5   : > { %v1044_v55 = vmax.f32 %v973_v36, 0.0  ;;  %1503 = vrot.lane.b32.xlu0 %v1401_v31, %s5188_s19  ;;  %v5933_v42 = vor.u32 %v2558_v25, %v2555_v28 }
 0x1d6   : > { %v2548_v26 = vrot.slane %v2546_v37, 2  ;;  %v2551_v39 = vrot.slane %v2549_v61, 3  ;;  %v5929_v7 = vpop.permute.xlu2 %1637  ;;  %v1490_v19 = vpop.permute.xlu0 %1489  ;;  %v1109_v50 = vpack.c.bf16 %v1058_v14, %v1058_v14 }
 0x1d7   : > { %v1095_v59 = vpack.c.bf16 %v1044_v55, %v1044_v55  ;;  %v2220_v46 = vsel %vm2213_vm11, %v5158_v49, %v1490_v19 }
 0x1d8   : > { %v2552_v6 = vor.u32 %v2551_v39, %v2548_v26  ;;  %1590 = vrot.lane.b32.xlu1 %v1551_v38, %s5187_s16  ;;  %v5935_v47 = vld [vmem:[#allocation2 + $0x5c] sm:$0xff]   ;;  %1150 = vst.msk [vmem:[#allocation2 + $0x9c] sm:$0xf] %vm1063_vm5, %v1109_v50 }
 0x1d9   : > { %1136 = vst.msk [vmem:[#allocation2 + $0x64] sm:$0xf] %vm1063_vm5, %v1095_v59  ;;  %v1906_v34 = vrot.slane %v5935_v47, 6  ;;  %v1785_v38 = vshrl.u32 %v5935_v47, 16  ;;  %v1788_v23 = vshll.u32 %v5935_v47, 16  ;;  %v2189_v48 = vrot.slane %v5935_v47, 7 }
 0x1da   : > { %v1577_v45 = vpop.permute.xlu1 %1576  ;;  %v2560_v29 = vsel %vm2530_vm10, %v2552_v6, %v5933_v42  ;;  %v1404_v59 = vor.u32 %v1402_v24, %v5899_v16 }
 0x1db   : > { %v2263_v5 = vsel %vm2257_vm12, %v2220_v46, %v1577_v45  ;;  %3387 = vmatmul.bf16.vlgmr.msrb.gmra.mxu3 %v2560_v29  ;;  %v2068_v2 = vrot.slane %v1785_v38, 6  ;;  %v2069_v33 = vrot.slane %v1788_v23, 7  ;;  %v5975_v17 = vsel %vm637_vm0, %v1904_v63, %v1906_v34  ;;  %v1010_v55 = vpop.f32.mrf.mxu2 }
 0x1dc   : > { %v2306_v9 = vsel %vm2300_vm13, %v2263_v5, %v5855_v40  ;;  %1649 = vrot.lane.b32.xlu2 %v1553_v60, %s5189_s25  ;;  %v975_v15 = vpop.f32.mrf.mxu1  ;;  %v2190_v40 = vsel %vm903_vm3, %v2187_v4, %v2189_v48  ;;  %v1059_v19 = vmax.f32 %v1010_v55, 0.0 }
 0x1dd   : > { %v2578_v41 = vshrl.u32 %v2306_v9, 16  ;;  %v2581_v22 = vshll.u32 %v2306_v9, 16  ;;  %v1045_v44 = vmax.f32 %v975_v15, 0.0  ;;  %1946 = vrot.lane.b32.xlu0 %v5897_v58, %s5188_s19  ;;  %v2770_v31 = vshrl.u32 %v2190_v40, 16 }
 0x1de   : > { %v5968_v51 = vpop.permute.xlu2 %2132  ;;  %v2773_v28 = vshll.u32 %v2190_v40, 16  ;;  %v5977_v58 = vrot.slane %v1406_v30, 1  ;;  %v1933_v36 = vpop.permute.xlu0 %1932  ;;  %v5979_v4 = vor.u32 %v2069_v33, %v2068_v2 }
 0x1df   : > { %v2580_v25 = vrot.slane %v2578_v41, 2  ;;  %v2583_v37 = vrot.slane %v2581_v22, 3  ;;  %v1096_v61 = vpack.c.bf16 %v1045_v44, %v1045_v44  ;;  %v2772_v26 = vrot.slane %v2770_v31, 2  ;;  %v5159_v44 = vld [vmem:[#allocation2 + $0x18] sm:$0xff]  }
 0x1e0   : > { %2000 = vrot.lane.b32.xlu1 %v5975_v17, %s5187_s16  ;;  %v2775_v39 = vrot.slane %v2773_v28, 3  ;;  %v2351_v3 = vsel %vm2213_vm11, %v5448_v12, %v1933_v36  ;;  %v5989_v14 = vpop.f32.mrf.mxu0  ;;  %v2071_v45 = vsel %vm2027_vm9, %v5901_v27, %v5979_v4  ;;  %v1409_v16 = vsel %vm1317_vm7, %v1404_v59, %v5977_v58  ;;  %v6008_v5 = vld [vmem:[#allocation2 + $0x60] sm:$0xff]  }
 0x1e1   : > { %1137 = vst.msk [vmem:[#allocation2 + $0x68] sm:$0xf] %vm1063_vm5, %v1096_v61  ;;  %v5984_v63 = vor.u32 %v2583_v37, %v2580_v25  ;;  %v1554_v33 = vrot.slane %v6008_v5, 1  ;;  %v1414_v22 = vshll.u32 %v6008_v5, 16 }
 0x1e2   : > { %v1987_v6 = vpop.permute.xlu1 %1986  ;;  %v5991_v49 = vor.u32 %v2775_v39, %v2772_v26 }
 0x1e3   : > { %v2411_v46 = vsel %vm2257_vm12, %v2351_v3, %v1987_v6  ;;  %v2585_v30 = vsel %vm2530_vm10, %v5832_v20, %v5984_v63  ;;  %v1110_v20 = vpack.c.bf16 %v1059_v19, %v1059_v19  ;;  %v1013_v24 = vpop.f32.mrf.mxu2  ;;  %v6037_v55 = vsel %vm1530_vm6, %v1552_v10, %v1554_v33  ;;  %v6054_v6 = vld [vmem:[#allocation2 + $0x6c] sm:$0xff]  }
 0x1e4   : > { %v2453_v12 = vsel %vm2300_vm13, %v2411_v46, %v5890_v53  ;;  %3279 = vmatmul.bf16.gmra.mxu2 %v2585_v30  ;;  %2144 = vrot.lane.b32.xlu2 %v2071_v45, %s5189_s25  ;;  %v2777_v29 = vsel %vm2530_vm10, %v5909_v13, %v5991_v49 }
 0x1e5   : > { %v2586_v50 = vshrl.u32 %v2453_v12, 16  ;;  %v2589_v9 = vshll.u32 %v2453_v12, 16  ;;  %4632 = vmatmul.msk.bf16.gmra.mxu0 %vm2213_vm11, %v2777_v29  ;;  %1505 = vrot.lane.b32.xlu0 %v1409_v16, %s5188_s19  ;;  %1151 = vst.msk [vmem:[#allocation2 + $0xa0] sm:$0xf] %vm1063_vm5, %v1110_v20  ;;  %v6058_v16 = vrot.slane %v1414_v22, 1  ;;  %v1060_v12 = vmax.f32 %v1013_v24, 0.0 }
 0x1e6   : > { %v6012_v27 = vpop.permute.xlu2 %1639  ;;  %v1492_v2 = vpop.permute.xlu0 %1491  ;;  %v7680_v24 = vshrl.u32 %v6054_v6, 16  ;;  %v7679_v22 = vshll.u32 %v6054_v6, 16 }
 0x1e7   : > { %v2588_v53 = vrot.slane %v2586_v50, 2  ;;  %v2591_v15 = vrot.slane %v2589_v9, 3  ;;  %v2222_v40 = vsel %vm2213_vm11, %v5159_v44, %v1492_v2  ;;  %v2193_v44 = vrot.slane %v6054_v6, 7 }
 0x1e8   : > { %1592 = vrot.lane.b32.xlu1 %v1553_v60, %s5187_s16  ;;  %v6017_v13 = vld [vmem:[#allocation2 + $0x64] sm:$0xff]   ;;  %v6023_v28 = vpop.f32.mrf.mxu0 }
 0x1e9   : > { %v6019_v41 = vor.u32 %v2591_v15, %v2588_v53  ;;  %v1794_v25 = vshrl.u32 %v6017_v13, 16  ;;  %v1797_v37 = vshll.u32 %v6017_v13, 16  ;;  %v2191_v61 = vrot.slane %v6017_v13, 7 }
 0x1ea   : > { %v1579_v31 = vpop.permute.xlu1 %1578  ;;  %v1908_v26 = vrot.slane %v6017_v13, 6 }
 0x1eb   : > { %v2265_v60 = vsel %vm2257_vm12, %v2222_v40, %v1579_v31  ;;  %v2593_v36 = vsel %vm2530_vm10, %v5933_v42, %v6019_v41  ;;  %v2072_v59 = vrot.slane %v1794_v25, 6  ;;  %v2073_v42 = vrot.slane %v1797_v37, 7 }
 0x1ec   : > { %v2308_v39 = vsel %vm2300_vm13, %v2265_v60, %v5929_v7  ;;  %3392 = vmatmul.bf16.gmra.mxu3 %v2593_v36  ;;  %1651 = vrot.lane.b32.xlu2 %v6037_v55, %s5189_s25  ;;  %v2192_v10 = vsel %vm903_vm3, %v2189_v48, %v2191_v61  ;;  %v1410_v7 = vshrl.u32 %v5923_v11, 16  ;;  %v6065_v48 = vsel %vm637_vm0, %v1906_v34, %v1908_v26 }
 0x1ed   : > { %v2603_v19 = vshrl.u32 %v2308_v39, 16  ;;  %v2606_v3 = vshll.u32 %v2308_v39, 16  ;;  %1948 = vrot.lane.b32.xlu0 %v5975_v17, %s5188_s19  ;;  %v2795_v30 = vshrl.u32 %v2192_v10, 16  ;;  %v2798_v45 = vshll.u32 %v2192_v10, 16  ;;  %v1015_v17 = vpop.f32.mrf.mxu2  ;;  %v6085_v39 = vld [vmem:[#allocation2 + $0x74] sm:$0xff]  }
 0x1ee   : > { %v6056_v46 = vpop.permute.xlu2 %2134  ;;  %v1935_v50 = vpop.permute.xlu0 %1934  ;;  %v6067_v11 = vor.u32 %v2073_v42, %v2072_v59  ;;  %v1412_v15 = vor.u32 %v1410_v7, %v5977_v58  ;;  %v1111_v58 = vpack.c.bf16 %v1060_v12, %v1060_v12 }
 0x1ef   : > { %v2605_v29 = vrot.slane %v2603_v19, 2  ;;  %v2608_v20 = vrot.slane %v2606_v3, 3  ;;  %v2797_v9 = vrot.slane %v2795_v30, 2  ;;  %v2800_v53 = vrot.slane %v2798_v45, 3  ;;  %v6094_v19 = vld [vmem:[#allocation2 + $0x68] sm:$0xff]  }
 0x1f0   : > { %2002 = vrot.lane.b32.xlu1 %v6065_v48, %s5187_s16  ;;  %v2354_v34 = vsel %vm2213_vm11, %v5485_v35, %v1935_v50  ;;  %v6079_v31 = vpop.f32.mrf.mxu0  ;;  %v1417_v36 = vsel %vm1317_vm7, %v1412_v15, %v6058_v16  ;;  %v2075_v35 = vsel %vm2027_vm9, %v5979_v4, %v6067_v11  ;;  %v1061_v3 = vmax.f32 %v1015_v17, 0.0  ;;  %1152 = vst.msk [vmem:[#allocation2 + $0xa4] sm:$0xf] %vm1063_vm5, %v1111_v58  ;;  %v6117_v50 = vld [vmem:[#allocation2 + $0x7c] sm:$0xff]  }
 0x1f1   : > { %v6072_v2 = vor.u32 %v2608_v20, %v2605_v29  ;;  %v6081_v60 = vor.u32 %v2800_v53, %v2797_v9  ;;  %v1556_v29 = vrot.slane %v6094_v19, 1  ;;  %v1812_v20 = vshrl.u32 %v6085_v39, 16 }
 0x1f2   : > { %v1989_v40 = vpop.permute.xlu1 %1988  ;;  %v1112_v45 = vpack.c.bf16 %v1061_v3, %v1061_v3  ;;  %v1769_v58 = vrot.slane %v1767_v56, 5  ;;  %v1778_v56 = vrot.slane %v1776_v62, 5  ;;  %v1824_v47 = vshll.u32 %v6117_v50, 16 }
 0x1f3   : > { %v2413_v59 = vsel %vm2257_vm12, %v2354_v34, %v1989_v40  ;;  %v2610_v42 = vsel %vm2530_vm10, %v5984_v63, %v6072_v2  ;;  %v2802_v7 = vsel %vm2530_vm10, %v5991_v49, %v6081_v60  ;;  %v2194_v63 = vsel %vm903_vm3, %v2191_v61, %v2193_v44 }
 0x1f4   : > { %v2455_v10 = vsel %vm2300_vm13, %v2413_v59, %v5968_v51  ;;  %3284 = vmatmul.bf16.gmra.mxu2 %v2610_v42  ;;  %2146 = vrot.lane.b32.xlu2 %v2075_v35, %s5189_s25  ;;  %v1910_v51 = vrot.slane %v6054_v6, 6  ;;  %v2076_v49 = vrot.slane %v7680_v24, 6  ;;  %v2077_v61 = vrot.slane %v7679_v22, 7  ;;  %1153 = vst.msk [vmem:[#allocation2 + $0xa8] sm:$0xf] %vm1063_vm5, %v1112_v45 }
 0x1f5   : > { %v2611_v4 = vshrl.u32 %v2455_v10, 16  ;;  %v2614_v30 = vshll.u32 %v2455_v10, 16  ;;  %4633 = vmatmul.msk.bf16.gmra.mxu0 %vm2213_vm11, %v2802_v7  ;;  %1507 = vrot.lane.b32.xlu0 %v1417_v36, %s5188_s19  ;;  %v2820_v15 = vshrl.u32 %v2194_v63, 16  ;;  %v2823_v34 = vshll.u32 %v2194_v63, 16  ;;  %v1018_v3 = vpop.f32.mrf.mxu2  ;;  %v5160_v7 = vld [vmem:[#allocation2 + $0x20] sm:$0xff]  }
 0x1f6   : > { %v6109_v12 = vpop.permute.xlu2 %1641  ;;  %v1494_v53 = vpop.permute.xlu0 %1493  ;;  %v1815_v40 = vshll.u32 %v6085_v39, 16  ;;  %v1821_v36 = vshrl.u32 %v6117_v50, 16  ;;  %v1418_v42 = vshrl.u32 %v6008_v5, 16  ;;  %v1422_v35 = vshll.u32 %v6094_v19, 16 }
 0x1f7   : > { %v2613_v17 = vrot.slane %v2611_v4, 2  ;;  %v2616_v9 = vrot.slane %v2614_v30, 3  ;;  %v1772_v10 = vrot.slane %v1770_v57, 6  ;;  %v1062_v30 = vmax.f32 %v1018_v3, 0.0 }
 0x1f8   : > { %1594 = vrot.lane.b32.xlu1 %v6037_v55, %s5187_s16  ;;  %v2224_v55 = vsel %vm2213_vm11, %v5160_v7, %v1494_v53  ;;  %v6133_v4 = vpop.f32.mrf.mxu0  ;;  %v1781_v45 = vrot.slane %v1779_v0, 6  ;;  %v1557_v57 = vsel %vm1530_vm6, %v1554_v33, %v1556_v29  ;;  %v2825_v52 = vrot.slane %v2823_v34, 3 }
 0x1f9   : > { %v6126_v59 = vor.u32 %v2616_v9, %v2613_v17  ;;  %v2822_v9 = vrot.slane %v2820_v15, 2  ;;  %v1113_v62 = vpack.c.bf16 %v1062_v30, %v1062_v30  ;;  %v1787_v0 = vrot.slane %v1785_v38, 5 }
 0x1fa   : > { %v1581_v63 = vpop.permute.xlu1 %1580  ;;  %v1773_v5 = vor.u32 %v1772_v10, %v1769_v58  ;;  %v1782_v7 = vor.u32 %v1781_v45, %v1778_v56  ;;  %v6164_v15 = vrot.slane %v1422_v35, 1  ;;  %v1790_v38 = vrot.slane %v1788_v23, 6 }
 0x1fb   : > { %v2267_v17 = vsel %vm2257_vm12, %v2224_v55, %v1581_v63  ;;  %v2618_v43 = vsel %vm2530_vm10, %v6019_v41, %v6126_v59  ;;  %1154 = vst.msk [vmem:[#allocation2 + $0xac] sm:$0x3] %vm1071_vm14, %v1113_v62  ;;  %v6180_v35 = vor.u32 %v2825_v52, %v2822_v9  ;;  %v1817_v63 = vrot.slane %v1815_v40, 6 }
 0x1fc   : > { %v2310_v53 = vsel %vm2300_vm13, %v2267_v17, %v6012_v27  ;;  %3397 = vmatmul.bf16.gmra.mxu3 %v2618_v43  ;;  %1653 = vrot.lane.b32.xlu2 %v1557_v57, %s5189_s25  ;;  %v6162_v27 = vsel %vm637_vm0, %v1908_v26, %v1910_v51  ;;  %v6173_v55 = vsel %vm1694_vm8, %v5760_v54, %v1773_v5  ;;  %v2195_v45 = vrot.slane %v6085_v39, 7 }
 0x1fd   : > { %v2628_v3 = vshrl.u32 %v2310_v53, 16  ;;  %v2631_v41 = vshll.u32 %v2310_v53, 16  ;;  %1950 = vrot.lane.b32.xlu0 %v6065_v48, %s5188_s19  ;;  %v1814_v48 = vrot.slane %v1812_v20, 5  ;;  %v6176_v26 = vsel %vm1694_vm8, %v1773_v5, %v1782_v7  ;;  %v1020_v17 = vpop.f32.mrf.mxu2 }
 0x1fe   : > { %v6155_v33 = vpop.permute.xlu2 %2136  ;;  %v1937_v10 = vpop.permute.xlu0 %1936  ;;  %v6183_v23 = vor.u32 %v1790_v38, %v1787_v0  ;;  %v6189_v56 = vor.u32 %v2077_v61, %v2076_v49  ;;  %v1420_v54 = vor.u32 %v1418_v42, %v6058_v16  ;;  %v2827_v0 = vsel %vm2530_vm10, %v6081_v60, %v6180_v35 }
 0x1ff   : > { %v2630_v34 = vrot.slane %v2628_v3, 2  ;;  %v2633_v58 = vrot.slane %v2631_v41, 3  ;;  %v2357_v43 = vsel %vm2213_vm11, %v5538_v1, %v1937_v10  ;;  %v6201_v62 = vor.u32 %v1817_v63, %v1814_v48 }
 0x200   : > { %2004 = vrot.lane.b32.xlu1 %v6162_v27, %s5187_s16  ;;  %v6195_v53 = vpop.f32.mrf.mxu0  ;;  %v6199_v52 = vsel %vm1694_vm8, %v1782_v7, %v6183_v23  ;;  %v2079_v61 = vsel %vm2027_vm9, %v6067_v11, %v6189_v56  ;;  %v1425_v1 = vsel %vm1317_vm7, %v1420_v54, %v6164_v15  ;;  %v1826_v3 = vrot.slane %v1824_v47, 6 }
 0x201   : > { %v6187_v30 = vor.u32 %v2633_v58, %v2630_v34  ;;  %v6233_v34 = vld [vmem:[#allocation2 + $0x70] sm:$0xff]   ;;  %v1912_v54 = vrot.slane %v6085_v39, 6 }
 0x202   : > { %v1991_v9 = vpop.permute.xlu1 %1990  ;;  %v1558_v58 = vrot.slane %v6233_v34, 1 }
 0x203   : > { %v2415_v49 = vsel %vm2257_vm12, %v2357_v43, %v1991_v9  ;;  %v2635_v16 = vsel %vm2530_vm10, %v6072_v2, %v6187_v30  ;;  %v1823_v2 = vrot.slane %v1821_v36, 5  ;;  %v5161_v43 = vld [vmem:[#allocation2 + $0x28] sm:$0xff]   ;;  %v6279_v13 = vsel %vm637_vm0, %v1910_v51, %v1912_v54 }
 0x204   : > { %v2457_v42 = vsel %vm2300_vm13, %v2415_v49, %v6056_v46  ;;  %3289 = vmatmul.bf16.gmra.mxu2 %v2635_v16  ;;  %2148 = vrot.lane.b32.xlu2 %v2079_v61, %s5189_s25  ;;  %v2196_v46 = vsel %vm903_vm3, %v2193_v44, %v2195_v45  ;;  %v2080_v61 = vrot.slane %v1812_v20, 6 }
 0x205   : > { %v2636_v11 = vshrl.u32 %v2457_v42, 16  ;;  %v2639_v41 = vshll.u32 %v2457_v42, 16  ;;  %4634 = vmatmul.msk.bf16.gmra.mxu0 %vm2213_vm11, %v2827_v0  ;;  %1509 = vrot.lane.b32.xlu0 %v1425_v1, %s5188_s19  ;;  %v6231_v60 = vor.u32 %v1826_v3, %v1823_v2  ;;  %v2845_v10 = vshrl.u32 %v2196_v46, 16 }
 0x206   : > { %v6229_v5 = vpop.permute.xlu2 %1643  ;;  %v1496_v48 = vpop.permute.xlu0 %1495  ;;  %v2848_v17 = vshll.u32 %v2196_v46, 16  ;;  %v2081_v1 = vrot.slane %v1815_v40, 7  ;;  %v1796_v2 = vrot.slane %v1794_v25, 5  ;;  %v1799_v3 = vrot.slane %v1797_v37, 6 }
 0x207   : > { %v2638_v7 = vrot.slane %v2636_v11, 2  ;;  %v2641_v38 = vrot.slane %v2639_v41, 3  ;;  %v6240_v63 = vsel %vm1694_vm8, %v6201_v62, %v6231_v60  ;;  %v2226_v9 = vsel %vm2213_vm11, %v5161_v43, %v1496_v48 }
 0x208   : > { %1596 = vrot.lane.b32.xlu1 %v1557_v57, %s5187_s16  ;;  %v6246_v16 = vpop.f32.mrf.mxu0  ;;  %v1559_v57 = vsel %vm1530_vm6, %v1556_v29, %v1558_v58  ;;  %v2847_v20 = vrot.slane %v2845_v10, 2  ;;  %v2850_v41 = vrot.slane %v2848_v17, 3  ;;  %v1426_v25 = vshrl.u32 %v6094_v19, 16 }
 0x209   : > { %v6242_v44 = vor.u32 %v2641_v38, %v2638_v7  ;;  %v1430_v37 = vshll.u32 %v6233_v34, 16  ;;  %v6285_v48 = vor.u32 %v2081_v1, %v2080_v61 }
 0x20a   : > { %v1583_v49 = vpop.permute.xlu1 %1582  ;;  %v1428_v51 = vor.u32 %v1426_v25, %v6164_v15 }
 0x20b   : > { %v2269_v42 = vsel %vm2257_vm12, %v2226_v9, %v1583_v49  ;;  %v2643_v0 = vsel %vm2530_vm10, %v6126_v59, %v6242_v44  ;;  %v6270_v59 = vor.u32 %v1799_v3, %v1796_v2  ;;  %v6299_v9 = vor.u32 %v2850_v41, %v2847_v20 }
 0x20c   : > { %v2312_v29 = vsel %vm2300_vm13, %v2269_v42, %v6109_v12  ;;  %3402 = vmatmul.bf16.gmra.mxu3 %v2643_v0  ;;  %1655 = vrot.lane.b32.xlu2 %v1559_v57, %s5189_s25  ;;  %v6283_v12 = vld [vmem:[#allocation2 + $0x84] sm:$0xff]   ;;  %v2197_v49 = vrot.slane %v6117_v50, 7  ;;  %v1432_v42 = vrot.slane %v1430_v37, 1  ;;  %v2083_v2 = vsel %vm2027_vm9, %v6189_v56, %v6285_v48 }
 0x20d   : > { %v2653_v40 = vshrl.u32 %v2312_v29, 16  ;;  %v2656_v11 = vshll.u32 %v2312_v29, 16  ;;  %1952 = vrot.lane.b32.xlu0 %v6162_v27, %s5188_s19  ;;  %v6290_v10 = vsel %vm1694_vm8, %v6183_v23, %v6270_v59  ;;  %v1830_v19 = vshrl.u32 %v6283_v12, 16  ;;  %v6316_v29 = vld [vmem:[#allocation2 + $0x78] sm:$0xff]  }
 0x20e   : > { %v6272_v46 = vpop.permute.xlu2 %2138  ;;  %v1939_v38 = vpop.permute.xlu0 %1938  ;;  %v1833_v17 = vshll.u32 %v6283_v12, 16  ;;  %v2852_v3 = vsel %vm2530_vm10, %v6180_v35, %v6299_v9  ;;  %v1433_v20 = vsel %vm1317_vm7, %v1428_v51, %v1432_v42  ;;  %v1560_v41 = vrot.slane %v6316_v29, 1 }
 0x20f   : > { %v2655_v7 = vrot.slane %v2653_v40, 2  ;;  %v2658_v27 = vrot.slane %v2656_v11, 3  ;;  %v2360_v61 = vsel %vm2213_vm11, %v5608_v8, %v1939_v38 }
 0x210   : > { %2006 = vrot.lane.b32.xlu1 %v6279_v13, %s5187_s16  ;;  %v6304_v1 = vpop.f32.mrf.mxu0  ;;  %v1835_v56 = vrot.slane %v1833_v17, 6 }
 0x211   : > { %v6297_v43 = vor.u32 %v2658_v27, %v2655_v7 }
 0x212   : > { %v1993_v23 = vpop.permute.xlu1 %1992 }
 0x213   : > { %v2417_v0 = vsel %vm2257_vm12, %v2360_v61, %v1993_v23  ;;  %v2660_v15 = vsel %vm2530_vm10, %v6187_v30, %v6297_v43  ;;  %v1832_v30 = vrot.slane %v1830_v19, 5 }
 0x214   : > { %v2459_v8 = vsel %vm2300_vm13, %v2417_v0, %v6155_v33  ;;  %3294 = vmatmul.bf16.gmra.mxu2 %v2660_v15  ;;  %2150 = vrot.lane.b32.xlu2 %v2083_v2, %s5189_s25  ;;  %v2198_v33 = vsel %vm903_vm3, %v2195_v45, %v2197_v49  ;;  %v5162_v45 = vld [vmem:[#allocation2 + $0x30] sm:$0xff]  }
 0x215   : > { %v2661_v40 = vshrl.u32 %v2459_v8, 16  ;;  %v2664_v11 = vshll.u32 %v2459_v8, 16  ;;  %4635 = vmatmul.msk.bf16.gmra.mxu0 %vm2213_vm11, %v2852_v3  ;;  %1511 = vrot.lane.b32.xlu0 %v1433_v20, %s5188_s19  ;;  %v6336_v25 = vor.u32 %v1835_v56, %v1832_v30  ;;  %v2870_v38 = vshrl.u32 %v2198_v33, 16 }
 0x216   : > { %v6333_v35 = vpop.permute.xlu2 %1645  ;;  %v1498_v27 = vpop.permute.xlu0 %1497  ;;  %v2873_v51 = vshll.u32 %v2198_v33, 16  ;;  %v1914_v3 = vrot.slane %v6117_v50, 6  ;;  %v1434_v8 = vshrl.u32 %v6233_v34, 16  ;;  %v2084_v30 = vrot.slane %v1821_v36, 6 }
 0x217   : > { %v2663_v37 = vrot.slane %v2661_v40, 2  ;;  %v2666_v7 = vrot.slane %v2664_v11, 3  ;;  %v6342_v61 = vsel %vm1694_vm8, %v6231_v60, %v6336_v25  ;;  %v2228_v0 = vsel %vm2213_vm11, %v5162_v45, %v1498_v27 }
 0x218   : > { %1598 = vrot.lane.b32.xlu1 %v1559_v57, %s5187_s16  ;;  %v6347_v2 = vpop.f32.mrf.mxu0  ;;  %v1561_v57 = vsel %vm1530_vm6, %v1558_v58, %v1560_v41  ;;  %v2085_v56 = vrot.slane %v1824_v47, 7  ;;  %v2872_v58 = vrot.slane %v2870_v38, 2  ;;  %v2875_v34 = vrot.slane %v2873_v51, 3 }
 0x219   : > { %v6344_v23 = vor.u32 %v2666_v7, %v2663_v37  ;;  %v1438_v11 = vshll.u32 %v6316_v29, 16  ;;  %v1436_v51 = vor.u32 %v1434_v8, %v1432_v42 }
 0x21a   : > { %v1585_v15 = vpop.permute.xlu1 %1584  ;;  %v6377_v27 = vor.u32 %v2085_v56, %v2084_v30  ;;  %v6380_v38 = vor.u32 %v2875_v34, %v2872_v58 }
 0x21b   : > { %v2271_v60 = vsel %vm2257_vm12, %v2228_v0, %v1585_v15  ;;  %v2668_v20 = vsel %vm2530_vm10, %v6242_v44, %v6344_v23  ;;  %v6382_v45 = vrot.slane %v1438_v11, 1  ;;  %v2199_v15 = vrot.slane %v6283_v12, 7 }
 0x21c   : > { %v2314_v40 = vsel %vm2300_vm13, %v2271_v60, %v6229_v5  ;;  %3407 = vmatmul.bf16.gmra.mxu3 %v2668_v20  ;;  %1657 = vrot.lane.b32.xlu2 %v1561_v57, %s5189_s25  ;;  %v1915_v5 = vsel %vm637_vm0, %v1912_v54, %v1914_v3  ;;  %v6393_v20 = vld [vmem:[#allocation2 + $0x80] sm:$0xff]   ;;  %v2877_v58 = vsel %vm2530_vm10, %v6299_v9, %v6380_v38 }
 0x21d   : > { %v2678_v33 = vshrl.u32 %v2314_v40, 16  ;;  %v2681_v37 = vshll.u32 %v2314_v40, 16  ;;  %1954 = vrot.lane.b32.xlu0 %v6279_v13, %s5188_s19  ;;  %v6384_v13 = vld [vmem:[#allocation2 + $0x8c] sm:$0xff]   ;;  %v2087_v40 = vsel %vm2027_vm9, %v6285_v48, %v6377_v27  ;;  %v1441_v34 = vsel %vm1317_vm7, %v1436_v51, %v6382_v45 }
 0x21e   : > { %v6370_v44 = vpop.permute.xlu2 %2140  ;;  %v1941_v47 = vpop.permute.xlu0 %1940  ;;  %v1839_v30 = vshrl.u32 %v6384_v13, 16  ;;  %v1842_v42 = vshll.u32 %v6384_v13, 16  ;;  %v1562_v48 = vrot.slane %v6393_v20, 1 }
 0x21f   : > { %v2680_v36 = vrot.slane %v2678_v33, 2  ;;  %v2683_v7 = vrot.slane %v2681_v37, 3  ;;  %v2363_v39 = vsel %vm2213_vm11, %v5685_v18, %v1941_v47 }
 0x220   : > { %2008 = vrot.lane.b32.xlu1 %v1915_v5, %s5187_s16  ;;  %v6391_v54 = vpop.f32.mrf.mxu0  ;;  %v1841_v9 = vrot.slane %v1839_v30, 5  ;;  %v1844_v37 = vrot.slane %v1842_v42, 6 }
 0x221   : > { %v6386_v0 = vor.u32 %v2683_v7, %v2680_v36 }
 0x222   : > { %v1995_v60 = vpop.permute.xlu1 %1994 }
 0x223   : > { %v2419_v8 = vsel %vm2257_vm12, %v2363_v39, %v1995_v60  ;;  %v2685_v56 = vsel %vm2530_vm10, %v6297_v43, %v6386_v0  ;;  %v6427_v60 = vor.u32 %v1844_v37, %v1841_v9  ;;  %v1442_v9 = vshrl.u32 %v6316_v29, 16 }
 0x224   : > { %v2461_v18 = vsel %vm2300_vm13, %v2419_v8, %v6272_v46  ;;  %3299 = vmatmul.bf16.gmra.mxu2 %v2685_v56  ;;  %2152 = vrot.lane.b32.xlu2 %v2087_v40, %s5189_s25  ;;  %v2200_v46 = vsel %vm903_vm3, %v2197_v49, %v2199_v15  ;;  %v1563_v49 = vsel %vm1530_vm6, %v1560_v41, %v1562_v48  ;;  %v5163_v56 = vld [vmem:[#allocation2 + $0x38] sm:$0xff]  }
 0x225   : > { %v2686_v11 = vshrl.u32 %v2461_v18, 16  ;;  %v2689_v33 = vshll.u32 %v2461_v18, 16  ;;  %4636 = vmatmul.msk.bf16.gmra.mxu0 %vm2213_vm11, %v2877_v58  ;;  %1513 = vrot.lane.b32.xlu0 %v1441_v34, %s5188_s19  ;;  %v2895_v51 = vshrl.u32 %v2200_v46, 16  ;;  %v2898_v39 = vshll.u32 %v2200_v46, 16 }
 0x226   : > { %v6420_v43 = vpop.permute.xlu2 %1647  ;;  %v2088_v34 = vrot.slane %v1830_v19, 6  ;;  %v2089_v46 = vrot.slane %v1833_v17, 7 }
 0x227   : > { %v2688_v36 = vrot.slane %v2686_v11, 2  ;;  %v2691_v7 = vrot.slane %v2689_v33, 3  ;;  %v1500_v47 = vpop.permute.xlu0 %1499  ;;  %v6445_v11 = vsel %vm1694_vm8, %v6336_v25, %v6427_v60  ;;  %v2897_v19 = vrot.slane %v2895_v51, 2 }
 0x228   : > { %1600 = vrot.lane.b32.xlu1 %v1561_v57, %s5187_s16  ;;  %v2230_v40 = vsel %vm2213_vm11, %v5163_v56, %v1500_v47  ;;  %v6437_v58 = vpop.f32.mrf.mxu0  ;;  %v1916_v57 = vrot.slane %v6283_v12, 6  ;;  %v2900_v25 = vrot.slane %v2898_v39, 3  ;;  %v1444_v39 = vor.u32 %v1442_v9, %v6382_v45 }
 0x229   : > { %v6429_v8 = vor.u32 %v2691_v7, %v2688_v36  ;;  %v1446_v36 = vshll.u32 %v6393_v20, 16 }
 0x22a   : > { %v1587_v18 = vpop.permute.xlu1 %1586  ;;  %v1917_v29 = vsel %vm637_vm0, %v1914_v3, %v1916_v57  ;;  %v6469_v51 = vor.u32 %v2900_v25, %v2897_v19 }
 0x22b   : > { %v2273_v33 = vsel %vm2257_vm12, %v2230_v40, %v1587_v18  ;;  %v2693_v41 = vsel %vm2530_vm10, %v6344_v23, %v6429_v8  ;;  %v6472_v18 = vld [vmem:[#allocation2 + $0x94] sm:$0xff]  }
 0x22c   : > { %v2316_v37 = vsel %vm2300_vm13, %v2273_v33, %v6333_v35  ;;  %3412 = vmatmul.bf16.gmra.mxu3 %v2693_v41  ;;  %1659 = vrot.lane.b32.xlu2 %v1563_v49, %s5189_s25  ;;  %v6466_v35 = vor.u32 %v2089_v46, %v2088_v34  ;;  %v2201_v41 = vrot.slane %v6384_v13, 7  ;;  %v6481_v34 = vld [vmem:[#allocation2 + $0x88] sm:$0xff]   ;;  %v1848_v46 = vshrl.u32 %v6472_v18, 16 }
 0x22d   : > { %v2703_v7 = vshrl.u32 %v2316_v37, 16  ;;  %v2706_v47 = vshll.u32 %v2316_v37, 16  ;;  %1956 = vrot.lane.b32.xlu0 %v1915_v5, %s5188_s19  ;;  %v1448_v5 = vrot.slane %v1446_v36, 1  ;;  %v1851_v19 = vshll.u32 %v6472_v18, 16 }
 0x22e   : > { %v6459_v23 = vpop.permute.xlu2 %2142  ;;  %v2091_v25 = vsel %vm2027_vm9, %v6377_v27, %v6466_v35  ;;  %v2902_v36 = vsel %vm2530_vm10, %v6380_v38, %v6469_v51  ;;  %v1564_v27 = vrot.slane %v6481_v34, 1  ;;  %v1850_v38 = vrot.slane %v1848_v46, 5 }
 0x22f   : > { %v2705_v56 = vrot.slane %v2703_v7, 2  ;;  %v2708_v17 = vrot.slane %v2706_v47, 3  ;;  %v1943_v40 = vpop.permute.xlu0 %1942  ;;  %v1449_v7 = vsel %vm1317_vm7, %v1444_v39, %v1448_v5 }
 0x230   : > { %2010 = vrot.lane.b32.xlu1 %v1917_v29, %s5187_s16  ;;  %v2366_v50 = vsel %vm2213_vm11, %v5776_v32, %v1943_v40 }
 0x231   : > { %v6474_v33 = vor.u32 %v2708_v17, %v2705_v56  ;;  %v6479_v3 = vpop.f32.mrf.mxu0  ;;  %v1853_v17 = vrot.slane %v1851_v19, 6 }
 0x232   : > { %v1997_v37 = vpop.permute.xlu1 %1996 }
 0x233   : > { %v2421_v45 = vsel %vm2257_vm12, %v2366_v50, %v1997_v37  ;;  %v2710_v9 = vsel %vm2530_vm10, %v6386_v0, %v6474_v33 }
 0x234   : > { %v2463_v32 = vsel %vm2300_vm13, %v2421_v45, %v6370_v44  ;;  %3304 = vmatmul.bf16.gmra.mxu2 %v2710_v9  ;;  %2154 = vrot.lane.b32.xlu2 %v2091_v25, %s5189_s25  ;;  %v2202_v44 = vsel %vm903_vm3, %v2199_v15, %v2201_v41  ;;  %v6514_v9 = vor.u32 %v1853_v17, %v1850_v38  ;;  %v2092_v38 = vrot.slane %v1839_v30, 6 }
 0x235   : > { %v2711_v47 = vshrl.u32 %v2463_v32, 16  ;;  %v2714_v56 = vshll.u32 %v2463_v32, 16  ;;  %4637 = vmatmul.msk.bf16.gmra.mxu0 %vm2213_vm11, %v2902_v36  ;;  %1515 = vrot.lane.b32.xlu0 %v1449_v7, %s5188_s19  ;;  %v2920_v37 = vshrl.u32 %v2202_v44, 16  ;;  %v2923_v45 = vshll.u32 %v2202_v44, 16  ;;  %v5164_v7 = vld [vmem:[#allocation2 + $0x40] sm:$0xff]  }
 0x236   : > { %v6507_v0 = vpop.permute.xlu2 %1649  ;;  %v1565_v15 = vsel %vm1530_vm6, %v1562_v48, %v1564_v27  ;;  %v1450_v32 = vshrl.u32 %v6393_v20, 16  ;;  %v1454_v36 = vshll.u32 %v6481_v34, 16  ;;  %v1918_v44 = vrot.slane %v6384_v13, 6 }
 0x237   : > { %v2713_v40 = vrot.slane %v2711_v47, 2  ;;  %v2716_v39 = vrot.slane %v2714_v56, 3  ;;  %v1502_v50 = vpop.permute.xlu0 %1501  ;;  %v6534_v17 = vsel %vm1694_vm8, %v6427_v60, %v6514_v9  ;;  %v2922_v30 = vrot.slane %v2920_v37, 2 }
 0x238   : > { %1602 = vrot.lane.b32.xlu1 %v1563_v49, %s5187_s16  ;;  %v2232_v47 = vsel %vm2213_vm11, %v5164_v7, %v1502_v50  ;;  %7698 = vst [vmem:[#allocation3_spill] sm:$0xff] %v6534_v17  ;;  %v2925_v50 = vrot.slane %v2923_v45, 3  ;;  %v6553_v22 = vrot.slane %v1454_v36, 1  ;;  %v1919_v21 = vsel %vm637_vm0, %v1916_v57, %v1918_v44  ;;  %v4769_v17 = vld [vmem:[%s7672_s5] sm:$0xff] }
 0x239   : > { %v6516_v25 = vor.u32 %v2716_v39, %v2713_v40  ;;  %v6526_v56 = vpop.f32.mrf.mxu0  ;;  %v2093_v40 = vrot.slane %v1842_v42, 7  ;;  %v7682_v36 = vrot.slane %v6472_v18, 7 }
 0x23a   : > { %v1589_v49 = vpop.permute.xlu1 %1588 }
 0x23b   : > { %v2275_v20 = vsel %vm2257_vm12, %v2232_v47, %v1589_v49  ;;  %v2718_v48 = vsel %vm2530_vm10, %v6429_v8, %v6516_v25  ;;  %v6547_v47 = vld [vmem:[#allocation2 + $0x98] sm:$0xff]   ;;  %v6549_v8 = vld [vmem:[#allocation2 + $0xa0] sm:$0xff]   ;;  %v1452_v49 = vor.u32 %v1450_v32, %v1448_v5  ;;  %v6560_v37 = vor.u32 %v2093_v40, %v2092_v38  ;;  %v6576_v38 = vld [vmem:[#allocation2 + $0x90] sm:$0xff]  }
 0x23c   : > { %v2318_v39 = vsel %vm2300_vm13, %v2275_v20, %v6420_v43  ;;  %3417 = vmatmul.bf16.gmra.mxu3 %v2718_v48  ;;  %1661 = vrot.lane.b32.xlu2 %v1565_v15, %s5189_s25  ;;  %v4846_v45 = vunpack.c.h.b16 %v6547_v47  ;;  %v6567_v5 = vunpack.c.l.b16 %v6549_v8 }
 0x23d   : > { %v2728_v60 = vshrl.u32 %v2318_v39, 16  ;;  %v2731_v7 = vshll.u32 %v2318_v39, 16  ;;  %1958 = vrot.lane.b32.xlu0 %v1917_v29, %s5188_s19  ;;  %v6563_v29 = vor.u32 %v2925_v50, %v2922_v30  ;;  %v2095_v50 = vsel %vm2027_vm9, %v6466_v35, %v6560_v37 }
 0x23e   : > { %v6551_v42 = vpop.permute.xlu2 %2144  ;;  %v7681_v35 = vrot.slane %v6576_v38, 1 }
 0x23f   : > { %v2730_v43 = vrot.slane %v2728_v60, 2  ;;  %v2733_v20 = vrot.slane %v2731_v7, 3  ;;  %v1945_v48 = vpop.permute.xlu0 %1944  ;;  %v1457_v60 = vsel %vm1317_vm7, %v1452_v49, %v6553_v22  ;;  %v2927_v7 = vsel %vm2530_vm10, %v6469_v51, %v6563_v29 }
 0x240   : > { %2012 = vrot.lane.b32.xlu1 %v1919_v21, %s5187_s16  ;;  %v2369_v12 = vsel %vm2213_vm11, %v6173_v55, %v1945_v48 }
 0x241   : > { %v6569_v32 = vor.u32 %v2733_v20, %v2730_v43  ;;  %v6574_v57 = vpop.f32.mrf.mxu0  ;;  %v6594_v43 = vpack.c.b16 %v6567_v5, %v4846_v45 }
 0x242   : > { %v1999_v39 = vpop.permute.xlu1 %1998  ;;  %7699 = vst [vmem:[#allocation4_spill] sm:$0xff] %v6574_v57 }
 0x243   : > { %v2423_v40 = vsel %vm2257_vm12, %v2369_v12, %v1999_v39  ;;  %v2735_v30 = vsel %vm2530_vm10, %v6474_v33, %v6569_v32  ;;  %v7683_v51 = vshrl.u32 %v6594_v43, 16 }
 0x244   : > { %v2465_v55 = vsel %vm2300_vm13, %v2423_v40, %v6459_v23  ;;  %3309 = vmatmul.bf16.gmra.mxu2 %v2735_v30  ;;  %2156 = vrot.lane.b32.xlu2 %v2095_v50, %s5189_s25  ;;  %v2204_v23 = vsel %vm903_vm3, %v2201_v41, %v7682_v36  ;;  %v1458_v30 = vshrl.u32 %v6481_v34, 16  ;;  %v7684_v50 = vshll.u32 %v6594_v43, 16 }
 0x245   : > { %v2736_v33 = vshrl.u32 %v2465_v55, 16  ;;  %v2739_v20 = vshll.u32 %v2465_v55, 16  ;;  %4638 = vmatmul.msk.bf16.gmra.mxu0 %vm2213_vm11, %v2927_v7  ;;  %1517 = vrot.lane.b32.xlu0 %v1457_v60, %s5188_s19  ;;  %v2945_v39 = vshrl.u32 %v2204_v23, 16  ;;  %v2948_v40 = vshll.u32 %v2204_v23, 16  ;;  %v6610_v60 = vld [vmem:[#allocation2 + $0xa8] sm:$0xf] }
 0x246   : > { %v6604_v49 = vpop.permute.xlu2 %1651  ;;  %v6619_v41 = vsel %vm1530_vm6, %v1564_v27, %v7681_v35  ;;  %v7687_v7 = vrot.slane %v6472_v18, 6  ;;  %v1859_v34 = vrot.slane %v7683_v51, 5  ;;  %v7701_v13 = vunpack.c.l.b16 %v6610_v60 }
 0x247   : > { %v2738_v48 = vrot.slane %v2736_v33, 2  ;;  %v2741_v45 = vrot.slane %v2739_v20, 3  ;;  %v1504_v12 = vpop.permute.xlu0 %1503  ;;  %v5165_v33 = vld [vmem:[#allocation2 + $0x48] sm:$0xff]  }
 0x248   : > { %1604 = vrot.lane.b32.xlu1 %v1565_v15, %s5187_s16  ;;  %v1462_v15 = vshll.u32 %v6576_v38, 16  ;;  %v2234_v20 = vsel %vm2213_vm11, %v5165_v33, %v1504_v12  ;;  %v1619_v12 = vunpack.c.h.b16 %v6549_v8  ;;  %v4770_v33 = vld [vmem:[%s7672_s5 + $0x8] sm:$0xff] }
 0x249   : > { %v6612_v55 = vor.u32 %v2741_v45, %v2738_v48  ;;  %v6624_v24 = vpop.f32.mrf.mxu0  ;;  %v2096_v48 = vrot.slane %v1848_v46, 6  ;;  %v2097_v45 = vrot.slane %v1851_v19, 7  ;;  %v2947_v46 = vrot.slane %v2945_v39, 2  ;;  %3756 = vmatpush.bf16.msrb.mxu1 %v4770_v33 }
 0x24a   : > { %v1591_v23 = vpop.permute.xlu1 %1590  ;;  %7700 = vst [vmem:[#allocation5_spill] sm:$0xff] %v6624_v24  ;;  %v2950_v19 = vrot.slane %v2948_v40, 3  ;;  %v1460_v39 = vor.u32 %v1458_v30, %v6553_v22  ;;  %v1202_v30 = vld [vmem:[#allocation2 + $0xac] sm:$0x3] }
 0x24b   : > { %v2277_v27 = vsel %vm2257_vm12, %v2234_v20, %v1591_v23  ;;  %v2743_v35 = vsel %vm2530_vm10, %v6516_v25, %v6612_v55  ;;  %v1862_v20 = vrot.slane %v7684_v50, 6  ;;  %v6663_v25 = vor.u32 %v2097_v45, %v2096_v48 }
 0x24c   : > { %v2320_v36 = vsel %vm2300_vm13, %v2277_v27, %v6507_v0  ;;  %3422 = vmatmul.bf16.gmra.mxu3 %v2743_v35  ;;  %1663 = vrot.lane.b32.xlu2 %v6619_v41, %s5189_s25  ;;  %v6656_v35 = vsel %vm637_vm0, %v1918_v44, %v7687_v7  ;;  %v6670_v44 = vpack.c.b16 %v7701_v13, %v1619_v12  ;;  %v7703_v48 = vrot.slane %v6594_v43, 7  ;;  %v5166_v7 = vld [vmem:[#allocation2 + $0x50] sm:$0xff]  }
 0x24d   : > { %v2753_v23 = vshrl.u32 %v2320_v36, 16  ;;  %v2756_v51 = vshll.u32 %v2320_v36, 16  ;;  %1960 = vrot.lane.b32.xlu0 %v1919_v21, %s5188_s19  ;;  %v6659_v36 = vrot.slane %v1462_v15, 1  ;;  %v6661_v21 = vor.u32 %v1862_v20, %v1859_v34  ;;  %3757 = vmatpush.bf16.msrb.mxu1 %v4769_v17 }
 0x24e   : > { %v6649_v0 = vpop.permute.xlu2 %2146  ;;  %v6674_v22 = vor.u32 %v2950_v19, %v2947_v46  ;;  %v7704_v45 = vrot.slane %v6472_v18, 7  ;;  %v7686_v12 = vshrl.u32 %v6670_v44, 16  ;;  %v7685_v33 = vshll.u32 %v6670_v44, 16 }
 0x24f   : > { %v2755_v40 = vrot.slane %v2753_v23, 2  ;;  %v2758_v27 = vrot.slane %v2756_v51, 3  ;;  %v1947_v50 = vpop.permute.xlu0 %1946  ;;  %v6679_v51 = vsel %vm1694_vm8, %v6514_v9, %v6661_v21  ;;  %v6694_v9 = vunpack.c.l.b16 %v1202_v30 }
 0x250   : > { %2014 = vrot.lane.b32.xlu1 %v6656_v35, %s5187_s16  ;;  %7702 = vst [vmem:[#allocation6_spill] sm:$0xff] %v6679_v51  ;;  %v2206_v34 = vsel %vm903_vm3, %v7704_v45, %v7703_v48  ;;  %v2372_v46 = vsel %vm2213_vm11, %v6176_v26, %v1947_v50  ;;  %v1465_v13 = vsel %vm1317_vm7, %v1460_v39, %v6659_v36  ;;  %v3275_v48 = vpop.f32.mrf.mxu2  ;;  %v1868_v17 = vrot.slane %v7686_v12, 5 }
 0x251   : > { %v6681_v15 = vor.u32 %v2758_v27, %v2755_v40  ;;  %v6692_v20 = vpop.f32.mrf.mxu0  ;;  %v2099_v27 = vsel %vm2027_vm9, %v6560_v37, %v6663_v25  ;;  %v2952_v50 = vsel %vm2530_vm10, %v6563_v29, %v6674_v22  ;;  %v2970_v30 = vshrl.u32 %v2206_v34, 16 }
 0x252   : > { %v2001_v19 = vpop.permute.xlu1 %2000  ;;  %7705 = vst [vmem:[#allocation7_spill] sm:$0xff] %v6692_v20  ;;  %v1693_v29 = vpack.c.b16 %v6694_v9, %v6694_v9 }
 0x253   : > { %v2425_v23 = vsel %vm2257_vm12, %v2372_v46, %v2001_v19  ;;  %v2760_v40 = vsel %vm2530_vm10, %v6569_v32, %v6681_v15  ;;  %v6712_v32 = vrot.slane %v6547_v47, 1 }
 0x254   : > { %v2467_v26 = vsel %vm2300_vm13, %v2425_v23, %v6551_v42  ;;  %3314 = vmatmul.bf16.gmra.mxu2 %v2760_v40  ;;  %2158 = vrot.lane.b32.xlu2 %v2099_v27, %s5189_s25  ;;  %v1871_v42 = vrot.slane %v7685_v33, 6  ;;  %v7706_v40 = vrot.slane %v6576_v38, 1  ;;  %v1878_v57 = vshll.u32 %v1693_v29, 16 }
 0x255   : > { %v2761_v37 = vshrl.u32 %v2467_v26, 16  ;;  %v2764_v45 = vshll.u32 %v2467_v26, 16  ;;  %4639 = vmatmul.msk.bf16.gmra.mxu0 %vm2213_vm11, %v2952_v50  ;;  %1519 = vrot.lane.b32.xlu0 %v1465_v13, %s5188_s19  ;;  %v2973_v13 = vshll.u32 %v2206_v34, 16  ;;  %v1466_v26 = vshrl.u32 %v6576_v38, 16 }
 0x256   : > { %v6720_v39 = vpop.permute.xlu2 %1653  ;;  %v6730_v27 = vsel %vm1530_vm6, %v7706_v40, %v6712_v32  ;;  %v1470_v50 = vshll.u32 %v6547_v47, 16  ;;  %v1872_v12 = vor.u32 %v1871_v42, %v1868_v17  ;;  %v7708_v40 = vshrl.u32 %v6594_v43, 16 }
 0x257   : > { %v2763_v46 = vrot.slane %v2761_v37, 2  ;;  %v2766_v19 = vrot.slane %v2764_v45, 3  ;;  %v1506_v23 = vpop.permute.xlu0 %1505  ;;  %v2972_v45 = vrot.slane %v2970_v30, 2  ;;  %v1875_v34 = vshrl.u32 %v1693_v29, 16 }
 0x258   : > { %1606 = vrot.lane.b32.xlu1 %v6619_v41, %s5187_s16  ;;  %v2236_v41 = vsel %vm2213_vm11, %v5166_v7, %v1506_v23  ;;  %v2100_v24 = vrot.slane %v7708_v40, 6  ;;  %v7709_v30 = vshll.u32 %v6594_v43, 16  ;;  %v6750_v7 = vsel %vm1694_vm8, %v6661_v21, %v1872_v12  ;;  %v1196_v21 = vld [vmem:[#allocation2 + $0xa4] sm:$0x1] }
 0x259   : > { %v6734_v33 = vor.u32 %v2766_v19, %v2763_v46  ;;  %v6738_v20 = vpop.f32.mrf.mxu0  ;;  %7710 = vst [vmem:[#allocation9_spill] sm:$0xff] %v6750_v7  ;;  %v2975_v29 = vrot.slane %v2973_v13, 3  ;;  %v1880_v19 = vrot.slane %v1878_v57, 6  ;;  %v3277_v57 = vpop.f32.mrf.mxu2  ;;  %v7711_v7 = vrot.slane %v6594_v43, 6 }
 0x25a   : > { %v1593_v51 = vpop.permute.xlu1 %1592  ;;  %7707 = vst [vmem:[#allocation8_spill] sm:$0xff] %v6738_v20  ;;  %v2101_v17 = vrot.slane %v7709_v30, 7 }
 0x25b   : > { %v2279_v38 = vsel %vm2257_vm12, %v2236_v41, %v1593_v51  ;;  %v2768_v46 = vsel %vm2530_vm10, %v6612_v55, %v6734_v33  ;;  %v1877_v51 = vrot.slane %v1875_v34, 5  ;;  %v6759_v55 = vld [vmem:[%s7671_s4] ss:$0 sm:$0xff] }
 0x25c   : > { %v2322_v42 = vsel %vm2300_vm13, %v2279_v38, %v6604_v49  ;;  %3427 = vmatmul.bf16.gmra.mxu3 %v2768_v46  ;;  %1665 = vrot.lane.b32.xlu2 %v6730_v27, %s5189_s25  ;;  %v1468_v38 = vor.u32 %v1466_v26, %v6659_v36  ;;  %v6766_v46 = vrot.slane %v1470_v50, 1  ;;  %v6779_v36 = vor.u32 %v2975_v29, %v2972_v45 }
 0x25d   : > { %v2778_v23 = vshrl.u32 %v2322_v42, 16  ;;  %v2781_v41 = vshll.u32 %v2322_v42, 16  ;;  %1962 = vrot.lane.b32.xlu0 %v6656_v35, %s5188_s19  ;;  %v1881_v13 = vor.u32 %v1880_v19, %v1877_v51  ;;  %v7712_v42 = vrot.slane %v6472_v18, 6 }
 0x25e   : > { %v3388_v40 = vpop.f32.mrf.mxu3  ;;  %v6763_v49 = vpop.permute.xlu2 %2148  ;;  %v6775_v35 = vor.u32 %v2101_v17, %v2100_v24  ;;  %v1292_v26 = vunpack.c.l.b16 %v1196_v21  ;;  %v3276_v51 = vadd.f32 %v6759_v55, %v3275_v48  ;;  %v2207_v18 = vrot.slane %v6670_v44, 7 }
 0x25f   : > { %v2780_v34 = vrot.slane %v2778_v23, 2  ;;  %v2783_v30 = vrot.slane %v2781_v41, 3  ;;  %v1949_v37 = vpop.permute.xlu0 %1948  ;;  %v6773_v20 = vsel %vm637_vm0, %v7712_v42, %v7711_v7  ;;  %v6782_v50 = vsel %vm1694_vm8, %v1872_v12, %v1881_v13 }
 0x260   : > { %2016 = vrot.lane.b32.xlu1 %v6773_v20, %s5187_s16  ;;  %v2375_v7 = vsel %vm2213_vm11, %v6199_v52, %v1949_v37  ;;  %v1473_v45 = vsel %vm1317_vm7, %v1468_v38, %v6766_v46  ;;  %v3389_v29 = vadd.f32 %v3388_v40, %v3276_v51  ;;  %v2103_v48 = vsel %vm2027_vm9, %v6663_v25, %v6775_v35 }
 0x261   : > { %v6785_v19 = vor.u32 %v2783_v30, %v2780_v34  ;;  %v2977_v37 = vsel %vm2530_vm10, %v6674_v22, %v6779_v36  ;;  %v7688_v41 = vrot.slane %v6549_v8, 1  ;;  %v6809_v21 = vpack.c.b16 %v1292_v26, %v6567_v5  ;;  %v1198_v22 = vld [vmem:[#allocation2 + $0xa4] sm:$0x3] }
 0x262   : > { %v6790_v24 = vpop.f32.mrf.mxu0  ;;  %v2003_v17 = vpop.permute.xlu1 %2002  ;;  %v7713_v25 = vrot.slane %v6594_v43, 7  ;;  %v6822_v30 = vadd.f32 %v5989_v14, %v3389_v29 }
 0x263   : > { %v2427_v23 = vsel %vm2257_vm12, %v2375_v7, %v2003_v17  ;;  %v2785_v12 = vsel %vm2530_vm10, %v6681_v15, %v6785_v19  ;;  %v3278_v15 = vadd.f32 %v6759_v55, %v3277_v57  ;;  %v1628_v14 = vsel %vm1530_vm6, %v6712_v32, %v7688_v41 }
 0x264   : > { %v2469_v52 = vsel %vm2300_vm13, %v2427_v23, %v6649_v0  ;;  %3319 = vmatmul.bf16.gmra.mxu2 %v2785_v12  ;;  %2160 = vrot.lane.b32.xlu2 %v2103_v48, %s5189_s25  ;;  %v2208_v0 = vsel %vm903_vm3, %v7713_v25, %v2207_v18  ;;  %v1474_v23 = vshrl.u32 %v6547_v47, 16  ;;  %v1528_v12 = vunpack.c.l.b16 %v1198_v22  ;;  %v6847_v22 = vld [vmem:[#allocation2 + $0xac] sm:$0xff] }
 0x265   : > { %v2786_v40 = vshrl.u32 %v2469_v52, 16  ;;  %v2789_v38 = vshll.u32 %v2469_v52, 16  ;;  %4640 = vmatmul.msk.bf16.gmra.mxu0 %vm2213_vm11, %v2977_v37  ;;  %1521 = vrot.lane.b32.xlu0 %v1473_v45, %s5188_s19  ;;  %v2995_v17 = vshrl.u32 %v2208_v0, 16  ;;  %v2998_v45 = vshll.u32 %v2208_v0, 16  ;;  %v5167_v37 = vld [vmem:[#allocation2 + $0x58] sm:$0xff]  }
 0x266   : > { %v3390_v13 = vpop.f32.mrf.mxu3  ;;  %v6819_v34 = vpop.permute.xlu2 %1655  ;;  %v1478_v29 = vshll.u32 %v6809_v21, 16  ;;  %v6841_v47 = vrot.slane %v6670_v44, 6  ;;  %v7715_v25 = vshll.u32 %v6670_v44, 16 }
 0x267   : > { %v2788_v57 = vrot.slane %v2786_v40, 2  ;;  %v2791_v42 = vrot.slane %v2789_v38, 3  ;;  %v3391_v26 = vadd.f32 %v3390_v13, %v3278_v15  ;;  %v3280_v51 = vpop.f32.mrf.mxu2  ;;  %v1508_v7 = vpop.permute.xlu0 %1507  ;;  %v7689_v13 = vmax.f32 %v6822_v30, 0.0 }
 0x268   : > { %1608 = vrot.lane.b32.xlu1 %v6730_v27, %s5187_s16  ;;  %v2238_v27 = vsel %vm2213_vm11, %v5167_v37, %v1508_v7  ;;  %v2105_v0 = vrot.slane %v7715_v25, 7  ;;  %v2997_v37 = vrot.slane %v2995_v17, 2  ;;  %v1476_v25 = vor.u32 %v1474_v23, %v6766_v46 }
 0x269   : > { %v6828_v48 = vadd.f32 %v6023_v28, %v3391_v26  ;;  %v6830_v52 = vor.u32 %v2791_v42, %v2788_v57  ;;  %v7714_v28 = vshrl.u32 %v6670_v44, 16  ;;  %v2209_v17 = vrot.slane %v6847_v22, 7 }
 0x26a   : > { %v6838_v15 = vpop.f32.mrf.mxu0  ;;  %v1595_v40 = vpop.permute.xlu1 %1594 }
 0x26b   : > { %v2104_v38 = vrot.slane %v7714_v28, 6  ;;  %v7690_v57 = vmax.f32 %v6828_v48, 0.0  ;;  %v2281_v42 = vsel %vm2257_vm12, %v2238_v27, %v1595_v40  ;;  %v2793_v26 = vsel %vm2530_vm10, %v6734_v33, %v6830_v52 }
 0x26c   : > { %v2324_v7 = vsel %vm2300_vm13, %v2281_v42, %v6720_v39  ;;  %3432 = vmatmul.bf16.gmra.mxu3 %v2793_v26  ;;  %1667 = vrot.lane.b32.xlu2 %v1628_v14, %s5189_s25  ;;  %v3000_v28 = vrot.slane %v2998_v45, 3  ;;  %v6865_v33 = vrot.slane %v1478_v29, 1  ;;  %v6870_v14 = vpack.c.b16 %v1528_v12, %v6567_v5 }
 0x26d   : > { %v3646_v41 = vpack.c.bf16 %v7690_v57, %v7689_v13  ;;  %v2803_v27 = vshrl.u32 %v2324_v7, 16  ;;  %v2806_v40 = vshll.u32 %v2324_v7, 16  ;;  %1964 = vrot.lane.b32.xlu0 %v6773_v20, %s5188_s19  ;;  %v7716_v26 = vrot.slane %v6594_v43, 6 }
 0x26e   : > { %v6867_v39 = vpop.permute.xlu2 %2150  ;;  %v6880_v29 = vor.u32 %v2105_v0, %v2104_v38  ;;  %v6884_v5 = vor.u32 %v3000_v28, %v2997_v37  ;;  %v7691_v0 = vrot.slane %v6870_v14, 1  ;;  %v2210_v37 = vsel %vm903_vm3, %v2207_v18, %v2209_v17  ;;  %v1208_v18 = vld [vmem:[#allocation2 + $0xb4] sm:$0xf] }
 0x26f   : > { %v2805_v46 = vrot.slane %v2803_v27, 2  ;;  %v2808_v45 = vrot.slane %v2806_v40, 3  ;;  %v3282_v23 = vpop.f32.mrf.mxu2  ;;  %v3393_v42 = vpop.f32.mrf.mxu3  ;;  %4653 = vmatmul.msk.bf16.vlgmr.msrb.gmra.mxu1 %vm2213_vm11, %v3646_v41  ;;  %v6878_v20 = vsel %vm637_vm0, %v7716_v26, %v6841_v47  ;;  %v1481_v27 = vsel %vm1317_vm7, %v1476_v25, %v6865_v33 }
 0x270   : > { %v1951_v7 = vpop.permute.xlu0 %1950  ;;  %2018 = vrot.lane.b32.xlu1 %v6878_v20, %s5187_s16  ;;  %v3281_v41 = vadd.f32 %v6759_v55, %v3280_v51  ;;  %v2107_v51 = vsel %vm2027_vm9, %v6775_v35, %v6880_v29  ;;  %v7717_v25 = vunpack.c.l.b16 %v6610_v60  ;;  %v3002_v35 = vsel %vm2530_vm10, %v6779_v36, %v6884_v5 }
 0x271   : > { %v6886_v12 = vor.u32 %v2808_v45, %v2805_v46  ;;  %v2378_v43 = vsel %vm2213_vm11, %v6290_v10, %v1951_v7  ;;  %v3020_v60 = vshrl.u32 %v2210_v37, 16  ;;  %v2112_v36 = vshll.u32 %v6847_v22, 16 }
 0x272   : > { %v6893_v40 = vpop.f32.mrf.mxu0  ;;  %v2005_v38 = vpop.permute.xlu1 %2004  ;;  %v6911_v46 = vpack.c.b16 %v6694_v9, %v7717_v25  ;;  %v3394_v45 = vadd.f32 %v3393_v42, %v3281_v41  ;;  %v3283_v9 = vadd.f32 %v6759_v55, %v3282_v23  ;;  %v2109_v42 = vshrl.u32 %v6847_v22, 16 }
 0x273   : > { %v2429_v28 = vsel %vm2257_vm12, %v2378_v43, %v2005_v38  ;;  %v2810_v10 = vsel %vm2530_vm10, %v6785_v19, %v6886_v12 }
 0x274   : > { %v2471_v44 = vsel %vm2300_vm13, %v2429_v28, %v6763_v49  ;;  %2162 = vrot.lane.b32.xlu2 %v2107_v51, %s5189_s25  ;;  %3324 = vmatmul.bf16.gmra.mxu2 %v2810_v10  ;;  %v1571_v49 = vsel %vm1530_vm6, %v6712_v32, %v7691_v0  ;;  %v2169_v51 = vunpack.c.l.b16 %v1208_v18  ;;  %v6932_v23 = vadd.f32 %v6079_v31, %v3394_v45  ;;  %v5168_v31 = vld [vmem:[#allocation2 + $0x60] sm:$0xff]  }
 0x275   : > { %v2811_v26 = vshrl.u32 %v2471_v44, 16  ;;  %v2814_v7 = vshll.u32 %v2471_v44, 16  ;;  %4641 = vmatmul.msk.bf16.gmra.mxu0 %vm2213_vm11, %v3002_v35  ;;  %1523 = vrot.lane.b32.xlu0 %v1481_v27, %s5188_s19  ;;  %v1629_v27 = vrot.slane %v6911_v46, 1  ;;  %v7718_v32 = vshrl.u32 %v6054_v6, 16 }
 0x276   : > { %v6922_v19 = vpop.permute.xlu2 %1657  ;;  %v3023_v35 = vshll.u32 %v2210_v37, 16  ;;  %v3022_v0 = vrot.slane %v3020_v60, 2  ;;  %v1203_v37 = vld [vmem:[#allocation2 + $0xac] sm:$0x7] }
 0x277   : > { %v2813_v41 = vrot.slane %v2811_v26, 2  ;;  %v2816_v43 = vrot.slane %v2814_v7, 3  ;;  %v3285_v38 = vpop.f32.mrf.mxu2  ;;  %v3395_v28 = vpop.f32.mrf.mxu3  ;;  %v1805_v44 = vrot.slane %v7718_v32, 5  ;;  %v1978_v26 = vrot.slane %v6847_v22, 6 }
 0x278   : > { %v3396_v10 = vadd.f32 %v3395_v28, %v3283_v9  ;;  %1610 = vrot.lane.b32.xlu1 %v1571_v49, %s5187_s16  ;;  %v1510_v25 = vpop.permute.xlu0 %1509  ;;  %v7719_v7 = vshll.u32 %v6054_v6, 16  ;;  %v2111_v28 = vrot.slane %v2109_v42, 6  ;;  %v2114_v32 = vrot.slane %v2112_v36, 7 }
 0x279   : > { %v6937_v13 = vor.u32 %v2816_v43, %v2813_v41  ;;  %v2240_v45 = vsel %vm2213_vm11, %v5168_v31, %v1510_v25  ;;  %v7720_v6 = vrot.slane %v6549_v8, 1  ;;  %v2170_v43 = vpack.c.b16 %v2169_v51, %v2169_v51 }
 0x27a   : > { %v1808_v57 = vrot.slane %v7719_v7, 6  ;;  %v6943_v18 = vadd.f32 %v6133_v4, %v3396_v10  ;;  %v6946_v9 = vpop.f32.mrf.mxu0  ;;  %v1597_v49 = vpop.permute.xlu1 %1596  ;;  %v7692_v10 = vmax.f32 %v6932_v23, 0.0  ;;  %v3025_v36 = vrot.slane %v3023_v35, 3  ;;  %v1206_v7 = vld [vmem:[#allocation2 + $0xb4] sm:$0x7] }
 0x27b   : > { %v2283_v41 = vsel %vm2257_vm12, %v2240_v45, %v1597_v49  ;;  %v1630_v60 = vsel %vm1530_vm6, %v7720_v6, %v1629_v27  ;;  %v2818_v4 = vsel %vm2530_vm10, %v6830_v52, %v6937_v13  ;;  %v1884_v52 = vunpack.c.l.b16 %v1203_v37 }
 0x27c   : > { %v7693_v25 = vmax.f32 %v6943_v18, 0.0  ;;  %v2326_v42 = vsel %vm2300_vm13, %v2283_v41, %v6819_v34  ;;  %1669 = vrot.lane.b32.xlu2 %v1630_v60, %s5189_s25  ;;  %3437 = vmatmul.bf16.gmra.mxu3 %v2818_v4  ;;  %v6964_v45 = vor.u32 %v1808_v57, %v1805_v44  ;;  %v1979_v34 = vsel %vm637_vm0, %v6841_v47, %v1978_v26 }
 0x27d   : > { %v2828_v8 = vshrl.u32 %v2326_v42, 16  ;;  %v2831_v31 = vshll.u32 %v2326_v42, 16  ;;  %1966 = vrot.lane.b32.xlu0 %v6878_v20, %s5188_s19  ;;  %v6976_v35 = vor.u32 %v2114_v32, %v2111_v28  ;;  %v1482_v41 = vshrl.u32 %v6809_v21, 16 }
 0x27e   : > { %v3647_v51 = vpack.c.bf16 %v7693_v25, %v7692_v10  ;;  %v6970_v49 = vpop.permute.xlu2 %2152  ;;  %v1975_v6 = vunpack.c.l.b16 %v1206_v7  ;;  %v2211_v60 = vrot.slane %v2170_v43, 7  ;;  %v6981_v42 = vor.u32 %v3025_v36, %v3022_v0 }
 0x27f   : > { %v2830_v20 = vrot.slane %v2828_v8, 2  ;;  %v2833_v57 = vrot.slane %v2831_v31, 3  ;;  %v3287_v44 = vpop.f32.mrf.mxu2  ;;  %v3398_v37 = vpop.f32.mrf.mxu3  ;;  %v1810_v28 = vsel %vm1694_vm8, %v6270_v59, %v6964_v45  ;;  %v1885_v10 = vpack.c.b16 %v1884_v52, %v1884_v52 }
 0x280   : > { %4654 = vmatmul.msk.bf16.gmra.mxu1 %vm2213_vm11, %v3647_v51  ;;  %2020 = vrot.lane.b32.xlu1 %v1979_v34, %s5187_s16  ;;  %v1953_v4 = vpop.permute.xlu0 %1952  ;;  %v3286_v8 = vadd.f32 %v6759_v55, %v3285_v38  ;;  %v2116_v51 = vsel %vm2027_vm9, %v6880_v29, %v6976_v35  ;;  %v1484_v0 = vor.u32 %v1482_v41, %v6865_v33 }
 0x281   : > { %v6986_v32 = vor.u32 %v2833_v57, %v2830_v20  ;;  %v2381_v31 = vsel %vm2213_vm11, %v1810_v28, %v1953_v4  ;;  %v1977_v52 = vpack.c.b16 %v1975_v6, %v1975_v6  ;;  %v2212_v38 = vsel %vm903_vm3, %v2209_v17, %v2211_v60 }
 0x282   : > { %v6990_v7 = vpop.f32.mrf.mxu0  ;;  %v2007_v43 = vpop.permute.xlu1 %2006  ;;  %v3399_v34 = vadd.f32 %v3398_v37, %v3286_v8  ;;  %v3027_v33 = vsel %vm2530_vm10, %v6884_v5, %v6981_v42  ;;  %v3288_v17 = vadd.f32 %v6759_v55, %v3287_v44  ;;  %v3045_v37 = vshrl.u32 %v2212_v38, 16 }
 0x283   : > { %v2431_v36 = vsel %vm2257_vm12, %v2381_v31, %v2007_v43  ;;  %v2835_v59 = vsel %vm2530_vm10, %v6886_v12, %v6986_v32  ;;  %v1926_v12 = vrot.slane %v1885_v10, 6  ;;  %v2118_v28 = vshrl.u32 %v1977_v52, 16 }
 0x284   : > { %v2473_v20 = vsel %vm2300_vm13, %v2431_v36, %v6867_v39  ;;  %2164 = vrot.lane.b32.xlu2 %v2116_v51, %s5189_s25  ;;  %3329 = vmatmul.bf16.gmra.mxu2 %v2835_v59  ;;  %v2121_v8 = vshll.u32 %v1977_v52, 16  ;;  %v7015_v5 = vadd.f32 %v6195_v53, %v3399_v34  ;;  %v7721_v43 = vrot.slane %v6870_v14, 1  ;;  %v5169_v59 = vld [vmem:[#allocation2 + $0x68] sm:$0xff]  }
 0x285   : > { %v2836_v29 = vshrl.u32 %v2473_v20, 16  ;;  %v2839_v41 = vshll.u32 %v2473_v20, 16  ;;  %4642 = vmatmul.msk.bf16.gmra.mxu0 %vm2213_vm11, %v3027_v33  ;;  %1525 = vrot.lane.b32.xlu0 %v1484_v0, %s5188_s19  ;;  %v3048_v51 = vshll.u32 %v2212_v38, 16  ;;  %v1927_v0 = vsel %vm637_vm0, %v6841_v47, %v1926_v12 }
 0x286   : > { %v7012_v57 = vpop.permute.xlu2 %1659  ;;  %v1980_v33 = vrot.slane %v1977_v52, 6  ;;  %v7694_v47 = vmax.f32 %v7015_v5, 0.0 }
 0x287   : > { %v2838_v39 = vrot.slane %v2836_v29, 2  ;;  %v2841_v6 = vrot.slane %v2839_v41, 3  ;;  %v3290_v60 = vpop.f32.mrf.mxu2  ;;  %v3400_v4 = vpop.f32.mrf.mxu3  ;;  %v3047_v29 = vrot.slane %v3045_v37, 2  ;;  %v2120_v41 = vrot.slane %v2118_v28, 6 }
 0x288   : > { %v3401_v31 = vadd.f32 %v3400_v4, %v3288_v17  ;;  %1612 = vrot.lane.b32.xlu1 %v7721_v43, %s5187_s16  ;;  %v1512_v10 = vpop.permute.xlu0 %1511  ;;  %v2123_v17 = vrot.slane %v2121_v8, 7  ;;  %v3050_v52 = vrot.slane %v3048_v51, 3  ;;  %v1981_v46 = vsel %vm637_vm0, %v1978_v26, %v1980_v33 }
 0x289   : > { %v7020_v44 = vor.u32 %v2841_v6, %v2838_v39  ;;  %v2242_v20 = vsel %vm2213_vm11, %v5169_v59, %v1512_v10  ;;  %v1819_v10 = vsel %vm1694_vm8, %v6964_v45, %v6201_v62 }
 0x28a   : > { %v7025_v36 = vadd.f32 %v6246_v16, %v3401_v31  ;;  %v7028_v53 = vpop.f32.mrf.mxu0  ;;  %v1599_v34 = vpop.permute.xlu1 %1598  ;;  %v3051_v43 = vor.u32 %v3050_v52, %v3047_v29 }
 0x28b   : > { %v2285_v14 = vsel %vm2257_vm12, %v2242_v20, %v1599_v34  ;;  %v2843_v38 = vsel %vm2530_vm10, %v6937_v13, %v7020_v44 }
 0x28c   : > { %v7695_v16 = vmax.f32 %v7025_v36, 0.0  ;;  %v2328_v12 = vsel %vm2300_vm13, %v2285_v14, %v6922_v19  ;;  %1671 = vrot.lane.b32.xlu2 %v1629_v27, %s5189_s25  ;;  %3442 = vmatmul.bf16.gmra.mxu3 %v2843_v38  ;;  %v2124_v27 = vor.u32 %v2123_v17, %v2120_v41  ;;  %v3052_v45 = vsel %vm2530_vm10, %v6981_v42, %v3051_v43 }
 0x28d   : > { %v2853_v37 = vshrl.u32 %v2328_v12, 16  ;;  %v2856_v39 = vshll.u32 %v2328_v12, 16  ;;  %1968 = vrot.lane.b32.xlu0 %v1927_v0, %s5188_s19  ;;  %v3291_v0 = vadd.f32 %v6759_v55, %v3290_v60  ;;  %s403_s19 = scalar_lea.vmem %s7677_s10, %s5113_s21 }
 0x28e   : > { %v3648_v13 = vpack.c.bf16 %v7695_v16, %v7694_v47  ;;  %v7046_v6 = vpop.permute.xlu2 %2154  ;;  %v2125_v34 = vsel %vm2027_vm9, %v6976_v35, %v2124_v27 }
 0x28f   : > { %v2855_v4 = vrot.slane %v2853_v37, 2  ;;  %v2858_v28 = vrot.slane %v2856_v39, 3  ;;  %v3292_v19 = vpop.f32.mrf.mxu2  ;;  %v3403_v8 = vpop.f32.mrf.mxu3 }
 0x290   : > { %4655 = vmatmul.msk.bf16.gmra.mxu1 %vm2213_vm11, %v3648_v13  ;;  %2022 = vrot.lane.b32.xlu1 %v1981_v46, %s5187_s16  ;;  %v1955_v31 = vpop.permute.xlu0 %1954  ;;  %v3404_v29 = vadd.f32 %v3403_v8, %v3291_v0  ;;  %v3293_v38 = vadd.f32 %v6759_v55, %v3292_v19  ;;  %v5170_v13 = vld [vmem:[#allocation2 + $0x70] sm:$0xff]  }
 0x291   : > { %v2859_v51 = vor.u32 %v2858_v28, %v2855_v4  ;;  %v2384_v59 = vsel %vm2213_vm11, %v1819_v10, %v1955_v31 }
 0x292   : > { %v7058_v20 = vpop.f32.mrf.mxu0  ;;  %v2009_v22 = vpop.permute.xlu1 %2008 }
 0x293   : > { %v2433_v26 = vsel %vm2257_vm12, %v2384_v59, %v2009_v22  ;;  %v2860_v33 = vsel %vm2530_vm10, %v6986_v32, %v2859_v51 }
 0x294   : > { %v2475_v62 = vsel %vm2300_vm13, %v2433_v26, %v6970_v49  ;;  %2166 = vrot.lane.b32.xlu2 %v2125_v34, %s5189_s25  ;;  %3334 = vmatmul.bf16.gmra.mxu2 %v2860_v33  ;;  %v7075_v49 = vadd.f32 %v6304_v1, %v3404_v29 }
 0x295   : > { %v2861_v60 = vshrl.u32 %v2475_v62, 16  ;;  %v2864_v14 = vshll.u32 %v2475_v62, 16  ;;  %4643 = vmatmul.msk.bf16.gmra.mxu0 %vm2213_vm11, %v3052_v45 }
 0x296   : > { %v7072_v35 = vpop.permute.xlu2 %1661  ;;  %v7696_v1 = vmax.f32 %v7075_v49, 0.0 }
 0x297   : > { %v2863_v41 = vrot.slane %v2861_v60, 2  ;;  %v2866_v32 = vrot.slane %v2864_v14, 3  ;;  %v3295_v17 = vpop.f32.mrf.mxu2  ;;  %v3405_v12 = vpop.f32.mrf.mxu3 }
 0x298   : > { %v3406_v52 = vadd.f32 %v3405_v12, %v3293_v38  ;;  %v1514_v37 = vpop.permute.xlu0 %1513  ;;  %v3296_v62 = vadd.f32 %v6759_v55, %v3295_v17 }
 0x299   : > { %v2867_v39 = vor.u32 %v2866_v32, %v2863_v41  ;;  %v2244_v4 = vsel %vm2213_vm11, %v5170_v13, %v1514_v37 }
 0x29a   : > { %v7078_v42 = vadd.f32 %v6347_v2, %v3406_v52  ;;  %v7081_v28 = vpop.f32.mrf.mxu0  ;;  %v1601_v19 = vpop.permute.xlu1 %1600 }
 0x29b   : > { %v2287_v8 = vsel %vm2257_vm12, %v2244_v4, %v1601_v19  ;;  %v2868_v46 = vsel %vm2530_vm10, %v7020_v44, %v2867_v39 }
 0x29c   : > { %v7697_v27 = vmax.f32 %v7078_v42, 0.0  ;;  %v2330_v31 = vsel %vm2300_vm13, %v2287_v8, %v7012_v57  ;;  %3447 = vmatmul.bf16.gmra.mxu3 %v2868_v46 }
 0x29d   : > { %v2878_v2 = vshrl.u32 %v2330_v31, 16  ;;  %v2881_v10 = vshll.u32 %v2330_v31, 16 }
 0x29e   : > { %v3649_v0 = vpack.c.bf16 %v7697_v27, %v7696_v1  ;;  %v2157_v59 = vpop.permute.xlu2 %2156 }
 0x29f   : > { %v2880_v22 = vrot.slane %v2878_v2, 2  ;;  %v2883_v26 = vrot.slane %v2881_v10, 3  ;;  %v3297_v34 = vpop.f32.mrf.mxu2  ;;  %v3408_v44 = vpop.f32.mrf.mxu3  ;;  %v5171_v2 = vld [vmem:[#allocation2 + $0x78] sm:$0xff]  }
 0x2a0   : > { %4656 = vmatmul.msk.bf16.gmra.mxu1 %vm2213_vm11, %v3649_v0  ;;  %v1957_v33 = vpop.permute.xlu0 %1956  ;;  %v3409_v41 = vadd.f32 %v3408_v44, %v3296_v62  ;;  %v3298_v17 = vadd.f32 %v6759_v55, %v3297_v34 }
 0x2a1   : > { %v2884_v29 = vor.u32 %v2883_v26, %v2880_v22  ;;  %v2387_v57 = vsel %vm2213_vm11, %v6240_v63, %v1957_v33 }
 0x2a2   : > { %v7098_v45 = vpop.f32.mrf.mxu0  ;;  %v2011_v60 = vpop.permute.xlu1 %2010  ;;  %v7107_v8 = vadd.f32 %v6391_v54, %v3409_v41 }
 0x2a3   : > { %v2435_v14 = vsel %vm2257_vm12, %v2387_v57, %v2011_v60  ;;  %v2885_v38 = vsel %vm2530_vm10, %v2859_v51, %v2884_v29 }
 0x2a4   : > { %v2477_v32 = vsel %vm2300_vm13, %v2435_v14, %v7046_v6  ;;  %3339 = vmatmul.bf16.gmra.mxu2 %v2885_v38  ;;  %v3613_v34 = vmax.f32 %v7107_v8, 0.0 }
 0x2a5   : > { %v2886_v12 = vshrl.u32 %v2477_v32, 16  ;;  %v2889_v52 = vshll.u32 %v2477_v32, 16  ;;  %4644 = vmatmul.msk.bf16.gmra.mxu0 %vm2213_vm11, %v3051_v43 }
 0x2a6   : > { %v1664_v37 = vpop.permute.xlu2 %1663 }
 0x2a7   : > { %v2888_v63 = vrot.slane %v2886_v12, 2  ;;  %v2891_v13 = vrot.slane %v2889_v52, 3  ;;  %v3300_v4 = vpop.f32.mrf.mxu2  ;;  %v3410_v19 = vpop.f32.mrf.mxu3 }
 0x2a8   : > { %v3411_v51 = vadd.f32 %v3410_v19, %v3298_v17  ;;  %v1516_v46 = vpop.permute.xlu0 %1515  ;;  %v3301_v12 = vadd.f32 %v6759_v55, %v3300_v4 }
 0x2a9   : > { %v2892_v31 = vor.u32 %v2891_v13, %v2888_v63  ;;  %v2246_v10 = vsel %vm2213_vm11, %v5171_v2, %v1516_v46 }
 0x2aa   : > { %v7110_v6 = vadd.f32 %v6437_v58, %v3411_v51  ;;  %v7113_v43 = vpop.f32.mrf.mxu0  ;;  %v1603_v0 = vpop.permute.xlu1 %1602 }
 0x2ab   : > { %v2289_v22 = vsel %vm2257_vm12, %v2246_v10, %v1603_v0  ;;  %v2893_v26 = vsel %vm2530_vm10, %v2867_v39, %v2892_v31 }
 0x2ac   : > { %v3614_v54 = vmax.f32 %v7110_v6, 0.0  ;;  %v2332_v44 = vsel %vm2300_vm13, %v2289_v22, %v7072_v35  ;;  %3452 = vmatmul.bf16.gmra.mxu3 %v2893_v26 }
 0x2ad   : > { %v2903_v58 = vshrl.u32 %v2332_v44, 16  ;;  %v2906_v33 = vshll.u32 %v2332_v44, 16 }
 0x2ae   : > { %v3650_v62 = vpack.c.bf16 %v3614_v54, %v3613_v34  ;;  %v2159_v57 = vpop.permute.xlu2 %2158 }
 0x2af   : > { %v2905_v60 = vrot.slane %v2903_v58, 2  ;;  %v2908_v14 = vrot.slane %v2906_v33, 3  ;;  %v3302_v38 = vpop.f32.mrf.mxu2  ;;  %v3413_v39 = vpop.f32.mrf.mxu3 }
 0x2b0   : > { %4657 = vmatmul.msk.bf16.gmra.mxu1 %vm2213_vm11, %v3650_v62  ;;  %v1959_v41 = vpop.permute.xlu0 %1958  ;;  %v3414_v19 = vadd.f32 %v3413_v39, %v3301_v12  ;;  %v3303_v10 = vadd.f32 %v6759_v55, %v3302_v38 }
 0x2b1   : > { %v2909_v32 = vor.u32 %v2908_v14, %v2905_v60  ;;  %v2390_v35 = vsel %vm2213_vm11, %v6342_v61, %v1959_v41 }
 0x2b2   : > { %v7129_v52 = vpop.f32.mrf.mxu0  ;;  %v2013_v17 = vpop.permute.xlu1 %2012  ;;  %v7136_v61 = vadd.f32 %v6479_v3, %v3414_v19 }
 0x2b3   : > { %v2437_v63 = vsel %vm2257_vm12, %v2390_v35, %v2013_v17  ;;  %v2910_v13 = vsel %vm2530_vm10, %v2884_v29, %v2909_v32 }
 0x2b4   : > { %v2479_v51 = vsel %vm2300_vm13, %v2437_v63, %v2157_v59  ;;  %3344 = vmatmul.bf16.gmra.mxu2 %v2910_v13  ;;  %v5172_v59 = vld [vmem:[#allocation2 + $0x80] sm:$0xff]   ;;  %v3615_v3 = vmax.f32 %v7136_v61, 0.0 }
 0x2b5   : > { %v2911_v46 = vshrl.u32 %v2479_v51, 16  ;;  %v2914_v2 = vshll.u32 %v2479_v51, 16 }
 0x2b6   : > { %v1666_v33 = vpop.permute.xlu2 %1665 }
 0x2b7   : > { %v2913_v0 = vrot.slane %v2911_v46, 2  ;;  %v2916_v4 = vrot.slane %v2914_v2, 3  ;;  %v3305_v22 = vpop.f32.mrf.mxu2  ;;  %v3415_v26 = vpop.f32.mrf.mxu3 }
 0x2b8   : > { %v3416_v44 = vadd.f32 %v3415_v26, %v3303_v10  ;;  %v1518_v58 = vpop.permute.xlu0 %1517  ;;  %v3306_v10 = vadd.f32 %v6759_v55, %v3305_v22 }
 0x2b9   : > { %v2917_v62 = vor.u32 %v2916_v4, %v2913_v0  ;;  %v2248_v60 = vsel %vm2213_vm11, %v5172_v59, %v1518_v58 }
 0x2ba   : > { %v7139_v29 = vadd.f32 %v6526_v56, %v3416_v44  ;;  %v7142_v14 = vpop.f32.mrf.mxu0  ;;  %v1605_v38 = vpop.permute.xlu1 %1604 }
 0x2bb   : > { %v2291_v39 = vsel %vm2257_vm12, %v2248_v60, %v1605_v38  ;;  %v2918_v41 = vsel %vm2530_vm10, %v2892_v31, %v2917_v62 }
 0x2bc   : > { %v3616_v12 = vmax.f32 %v7139_v29, 0.0  ;;  %v2334_v35 = vsel %vm2300_vm13, %v2291_v39, %v1664_v37  ;;  %3457 = vmatmul.bf16.gmra.mxu3 %v2918_v41 }
 0x2bd   : > { %v2928_v17 = vshrl.u32 %v2334_v35, 16  ;;  %v2931_v56 = vshll.u32 %v2334_v35, 16 }
 0x2be   : > { %v3651_v63 = vpack.c.bf16 %v3616_v12, %v3615_v3  ;;  %v2161_v58 = vpop.permute.xlu2 %2160 }
 0x2bf   : > { %v2930_v13 = vrot.slane %v2928_v17, 2  ;;  %v2933_v19 = vrot.slane %v2931_v56, 3  ;;  %v3307_v51 = vpop.f32.mrf.mxu2  ;;  %v3418_v46 = vpop.f32.mrf.mxu3  ;;  %v7722_v56 = vld [vmem:[#allocation4_spill] sm:$0xff] }
 0x2c0   : > { %4658 = vmatmul.msk.bf16.gmra.mxu1 %vm2213_vm11, %v3651_v63  ;;  %v1961_v31 = vpop.permute.xlu0 %1960  ;;  %v3419_v59 = vadd.f32 %v3418_v46, %v3306_v10  ;;  %v3308_v41 = vadd.f32 %v6759_v55, %v3307_v51  ;;  %v5173_v46 = vld [vmem:[#allocation2 + $0x88] sm:$0xff]  }
 0x2c1   : > { %v2934_v2 = vor.u32 %v2933_v19, %v2930_v13  ;;  %v2393_v37 = vsel %vm2213_vm11, %v6445_v11, %v1961_v31 }
 0x2c2   : > { %v7157_v0 = vpop.f32.mrf.mxu0  ;;  %v2015_v4 = vpop.permute.xlu1 %2014  ;;  %v7164_v63 = vadd.f32 %v7722_v56, %v3419_v59 }
 0x2c3   : > { %v2439_v26 = vsel %vm2257_vm12, %v2393_v37, %v2015_v4  ;;  %v2935_v44 = vsel %vm2530_vm10, %v2909_v32, %v2934_v2  ;;  %v7723_v32 = vld [vmem:[#allocation5_spill] sm:$0xff] }
 0x2c4   : > { %v2481_v60 = vsel %vm2300_vm13, %v2439_v26, %v2159_v57  ;;  %3349 = vmatmul.bf16.gmra.mxu2 %v2935_v44  ;;  %v3617_v44 = vmax.f32 %v7164_v63, 0.0 }
 0x2c5   : > { %v2936_v38 = vshrl.u32 %v2481_v60, 16  ;;  %v2939_v39 = vshll.u32 %v2481_v60, 16 }
 0x2c7   : > { %v2938_v22 = vrot.slane %v2936_v38, 2  ;;  %v2941_v35 = vrot.slane %v2939_v39, 3  ;;  %v3310_v17 = vpop.f32.mrf.mxu2  ;;  %v3420_v11 = vpop.f32.mrf.mxu3 }
 0x2c8   : > { %v3421_v13 = vadd.f32 %v3420_v11, %v3308_v41  ;;  %v1520_v19 = vpop.permute.xlu0 %1519  ;;  %v1668_v41 = vpop.permute.xlu2 %1667 }
 0x2c9   : > { %v2942_v31 = vor.u32 %v2941_v35, %v2938_v22  ;;  %v2250_v57 = vsel %vm2213_vm11, %v5173_v46, %v1520_v19 }
 0x2ca   : > { %v7167_v37 = vadd.f32 %v7723_v32, %v3421_v13  ;;  %v7170_v10 = vpop.f32.mrf.mxu0  ;;  %v1607_v4 = vpop.permute.xlu1 %1606  ;;  %v3311_v32 = vadd.f32 %v6759_v55, %v3310_v17 }
 0x2cb   : > { %v2293_v51 = vsel %vm2257_vm12, %v2250_v57, %v1607_v4  ;;  %v2943_v26 = vsel %vm2530_vm10, %v2917_v62, %v2942_v31 }
 0x2cc   : > { %v3618_v59 = vmax.f32 %v7167_v37, 0.0  ;;  %v2336_v60 = vsel %vm2300_vm13, %v2293_v51, %v1666_v33  ;;  %3462 = vmatmul.bf16.gmra.mxu3 %v2943_v26  ;;  %v7724_v33 = vld [vmem:[#allocation3_spill] sm:$0xff] }
 0x2cd   : > { %v2953_v38 = vshrl.u32 %v2336_v60, 16  ;;  %v2956_v39 = vshll.u32 %v2336_v60, 16 }
 0x2ce   : > { %v3652_v22 = vpack.c.bf16 %v3618_v59, %v3617_v44 }
 0x2cf   : > { %v2955_v35 = vrot.slane %v2953_v38, 2  ;;  %v2958_v11 = vrot.slane %v2956_v39, 3  ;;  %v3312_v56 = vpop.f32.mrf.mxu2  ;;  %v3423_v13 = vpop.f32.mrf.mxu3 }
 0x2d0   : > { %4659 = vmatmul.msk.bf16.gmra.mxu1 %vm2213_vm11, %v3652_v22  ;;  %v1963_v62 = vpop.permute.xlu0 %1962  ;;  %v3424_v60 = vadd.f32 %v3423_v13, %v3311_v32  ;;  %v2163_v27 = vpop.permute.xlu2 %2162  ;;  %v5174_v13 = vld [vmem:[#allocation2 + $0x90] sm:$0xff]  }
 0x2d1   : > { %v2959_v19 = vor.u32 %v2958_v11, %v2955_v35  ;;  %v2396_v46 = vsel %vm2213_vm11, %v7724_v33, %v1963_v62  ;;  %v3313_v35 = vadd.f32 %v6759_v55, %v3312_v56  ;;  %v7725_v62 = vld [vmem:[#allocation7_spill] sm:$0xff] }
 0x2d2   : > { %v7185_v57 = vpop.f32.mrf.mxu0  ;;  %v2017_v4 = vpop.permute.xlu1 %2016  ;;  %v3537_v33 = vadd.f32 %v7725_v62, %v3424_v60 }
 0x2d3   : > { %v2441_v51 = vsel %vm2257_vm12, %v2396_v46, %v2017_v4  ;;  %v2960_v26 = vsel %vm2530_vm10, %v2934_v2, %v2959_v19  ;;  %v7726_v4 = vld [vmem:[#allocation8_spill] sm:$0xff] }
 0x2d4   : > { %v2483_v38 = vsel %vm2300_vm13, %v2441_v51, %v2161_v58  ;;  %3354 = vmatmul.bf16.gmra.mxu2 %v2960_v26 }
 0x2d5   : > { %v2961_v39 = vshrl.u32 %v2483_v38, 16  ;;  %v2964_v22 = vshll.u32 %v2483_v38, 16  ;;  %v3619_v38 = vmax.f32 %v3537_v33, 0.0  ;;  %v7727_v33 = vld [vmem:[#allocation6_spill] sm:$0xff] }
 0x2d7   : > { %v2963_v11 = vrot.slane %v2961_v39, 2  ;;  %v2966_v17 = vrot.slane %v2964_v22, 3  ;;  %v3315_v25 = vpop.f32.mrf.mxu2  ;;  %v3425_v47 = vpop.f32.mrf.mxu3 }
 0x2d8   : > { %v3426_v16 = vadd.f32 %v3425_v47, %v3313_v35  ;;  %v1522_v1 = vpop.permute.xlu0 %1521 }
 0x2d9   : > { %v2967_v46 = vor.u32 %v2966_v17, %v2963_v11  ;;  %v2252_v58 = vsel %vm2213_vm11, %v5174_v13, %v1522_v1 }
 0x2da   : > { %v3539_v2 = vadd.f32 %v7726_v4, %v3426_v16  ;;  %v7194_v32 = vpop.f32.mrf.mxu0  ;;  %v1609_v51 = vpop.permute.xlu1 %1608 }
 0x2db   : > { %v2295_v56 = vsel %vm2257_vm12, %v2252_v58, %v1609_v51  ;;  %v2968_v26 = vsel %vm2530_vm10, %v2942_v31, %v2967_v46  ;;  %v3316_v31 = vadd.f32 %v6759_v55, %v3315_v25 }
 0x2dc   : > { %v3620_v39 = vmax.f32 %v3539_v2, 0.0  ;;  %v2338_v60 = vsel %vm2300_vm13, %v2295_v56, %v1668_v41  ;;  %3467 = vmatmul.bf16.gmra.mxu3 %v2968_v26  ;;  %v1670_v56 = vpop.permute.xlu2 %1669 }
 0x2dd   : > { %v2978_v47 = vshrl.u32 %v2338_v60, 16  ;;  %v2981_v22 = vshll.u32 %v2338_v60, 16 }
 0x2de   : > { %v3653_v35 = vpack.c.bf16 %v3620_v39, %v3619_v38  ;;  %4674 = vmatpush.xpose.msk.msra.mxu2 %vm2213_vm11, %v3620_v39 }
 0x2df   : > { %v2980_v16 = vrot.slane %v2978_v47, 2  ;;  %v2983_v11 = vrot.slane %v2981_v22, 3  ;;  %v3317_v1 = vpop.f32.mrf.mxu2  ;;  %v3428_v17 = vpop.f32.mrf.mxu3 }
 0x2e0   : > { %4660 = vmatmul.msk.bf16.gmra.mxu1 %vm2213_vm11, %v3653_v35  ;;  %v1965_v62 = vpop.permute.xlu0 %1964  ;;  %v3429_v26 = vadd.f32 %v3428_v17, %v3316_v31  ;;  %v3318_v25 = vadd.f32 %v6759_v55, %v3317_v1  ;;  %v5175_v31 = vld [vmem:[#allocation2 + $0x98] sm:$0xff]  }
 0x2e1   : > { %v2984_v4 = vor.u32 %v2983_v11, %v2980_v16  ;;  %v2399_v2 = vsel %vm2213_vm11, %v7727_v33, %v1965_v62 }
 0x2e2   : > { %v7204_v41 = vpop.f32.mrf.mxu0  ;;  %4675 = vmatpush.xpose.msk.msra.mxu2 %vm2213_vm11, %v3619_v38  ;;  %v2019_v13 = vpop.permute.xlu1 %2018  ;;  %v7215_v11 = vadd.f32 %v6790_v24, %v3429_v26 }
 0x2e3   : > { %v2443_v58 = vsel %vm2257_vm12, %v2399_v2, %v2019_v13  ;;  %v2985_v51 = vsel %vm2530_vm10, %v2959_v19, %v2984_v4 }
 0x2e4   : > { %v2485_v39 = vsel %vm2300_vm13, %v2443_v58, %v2163_v27  ;;  %3359 = vmatmul.bf16.gmra.mxu2 %v2985_v51  ;;  %v3621_v33 = vmax.f32 %v7215_v11, 0.0  ;;  %v2165_v26 = vpop.permute.xlu2 %2164 }
 0x2e5   : > { %v2986_v60 = vshrl.u32 %v2485_v39, 16  ;;  %v2989_v47 = vshll.u32 %v2485_v39, 16 }
 0x2e6   : > { %4676 = vmatpush.xpose.msk.msra.mxu2 %vm2213_vm11, %v3618_v59 }
 0x2e7   : > { %v2988_v22 = vrot.slane %v2986_v60, 2  ;;  %v2991_v38 = vrot.slane %v2989_v47, 3  ;;  %v3320_v35 = vpop.f32.mrf.mxu2  ;;  %v3430_v16 = vpop.f32.mrf.mxu3  ;;  %v7245_v47 = vld [vmem:[%s7673_s6] ss:$0 sm:$0xff] }
 0x2e8   : > { %v3431_v19 = vadd.f32 %v3430_v16, %v3318_v25  ;;  %v1524_v17 = vpop.permute.xlu0 %1523 }
 0x2e9   : > { %v7217_v62 = vor.u32 %v2991_v38, %v2988_v22  ;;  %v2254_v55 = vsel %vm2213_vm11, %v5175_v31, %v1524_v17  ;;  %v7250_v22 = vld [vmem:[%s7671_s4] ss:$0 sm:$0xff] }
 0x2ea   : > { %v7220_v27 = vadd.f32 %v6838_v15, %v3431_v19  ;;  %v7223_v37 = vpop.f32.mrf.mxu0  ;;  %4677 = vmatpush.xpose.msk.msra.mxu2 %vm2213_vm11, %v3617_v44  ;;  %v1611_v59 = vpop.permute.xlu1 %1610  ;;  %v3321_v29 = vadd.f32 %v7250_v22, %v3320_v35 }
 0x2eb   : > { %v2297_v24 = vsel %vm2257_vm12, %v2254_v55, %v1611_v59  ;;  %v2993_v1 = vsel %vm2530_vm10, %v2967_v46, %v7217_v62 }
 0x2ec   : > { %v3622_v15 = vmax.f32 %v7220_v27, 0.0  ;;  %v2340_v2 = vsel %vm2300_vm13, %v2297_v24, %v1670_v56  ;;  %3472 = vmatmul.bf16.gmra.mxu3 %v2993_v1  ;;  %v3759_v13 = vpop.f32.mrf.mxu1 }
 0x2ed   : > { %v3003_v58 = vshrl.u32 %v2340_v2, 16  ;;  %v3006_v51 = vshll.u32 %v2340_v2, 16  ;;  %v3760_v24 = vadd.f32 %v7245_v47, %v3759_v13 }
 0x2ee   : > { %v3654_v63 = vpack.c.bf16 %v3622_v15, %v3621_v33  ;;  %4678 = vmatpush.xpose.msk.msra.mxu2 %vm2213_vm11, %v3616_v12  ;;  %v7728_v12 = vld [vmem:[#allocation9_spill] sm:$0xff] }
 0x2ef   : > { %v3005_v44 = vrot.slane %v3003_v58, 2  ;;  %v3008_v46 = vrot.slane %v3006_v51, 3  ;;  %v3322_v39 = vpop.f32.mrf.mxu2  ;;  %v3433_v60 = vpop.f32.mrf.mxu3 }
 0x2f0   : > { %4661 = vmatmul.msk.bf16.gmra.mxu1 %vm2213_vm11, %v3654_v63  ;;  %v1967_v56 = vpop.permute.xlu0 %1966  ;;  %v3434_v55 = vadd.f32 %v3433_v60, %v3321_v29  ;;  %v3323_v61 = vadd.f32 %v7250_v22, %v3322_v39  ;;  %v1672_v39 = vpop.permute.xlu2 %1671 }
 0x2f1   : > { %v3009_v25 = vor.u32 %v3008_v46, %v3005_v44  ;;  %v2402_v38 = vsel %vm2213_vm11, %v7728_v12, %v1967_v56 }
 0x2f2   : > { %v7255_v16 = vpop.f32.mrf.mxu0  ;;  %4679 = vmatpush.xpose.msk.msra.mxu2 %vm2213_vm11, %v3615_v3  ;;  %v2021_v19 = vpop.permute.xlu1 %2020  ;;  %v7277_v63 = vadd.f32 %v6893_v40, %v3434_v55 }
 0x2f3   : > { %v2445_v17 = vsel %vm2257_vm12, %v2402_v38, %v2021_v19  ;;  %v3010_v31 = vsel %vm2530_vm10, %v2984_v4, %v3009_v25 }
 0x2f4   : > { %v2487_v59 = vsel %vm2300_vm13, %v2445_v17, %v2165_v26  ;;  %3364 = vmatmul.bf16.gmra.mxu2 %v3010_v31  ;;  %v3761_v35 = vpop.f32.mrf.mxu1  ;;  %v3623_v38 = vmax.f32 %v7277_v63, 0.0 }
 0x2f5   : > { %v3011_v1 = vshrl.u32 %v2487_v59, 16  ;;  %v3014_v2 = vshll.u32 %v2487_v59, 16  ;;  %v3762_v58 = vadd.f32 %v7245_v47, %v3761_v35 }
 0x2f6   : > { %4680 = vmatpush.xpose.msk.msra.mxu2 %vm2213_vm11, %v3614_v54 }
 0x2f7   : > { %v3013_v3 = vrot.slane %v3011_v1, 2  ;;  %v3016_v4 = vrot.slane %v3014_v2, 3  ;;  %v4850_v13 = vpack.c.bf16 %v3762_v58, %v3760_v24  ;;  %v3325_v51 = vpop.f32.mrf.mxu2  ;;  %v3435_v26 = vpop.f32.mrf.mxu3 }
 0x2f8   : > { %v3436_v44 = vadd.f32 %v3435_v26, %v3323_v61  ;;  %v1526_v46 = vpop.permute.xlu0 %1525  ;;  %v3326_v2 = vadd.f32 %v7250_v22, %v3325_v51 }
 0x2f9   : > { %4851 = vst [vmem:[%s7271_s28] sm:$0xff] %v4850_v13   ;;  %v3017_v60 = vor.u32 %v3016_v4, %v3013_v3  ;;  %v2256_v6 = vsel %vm2213_vm11, %v6809_v21, %v1526_v46  ;;  %v7730_v3 = vmax.f32 %v7075_v49, 0.0  ;;  %v2167_v4 = vpop.permute.xlu2 %2166 }
 0x2fa   : > { %v7281_v56 = vadd.f32 %v6946_v9, %v3436_v44  ;;  %v7285_v54 = vpop.f32.mrf.mxu0  ;;  %4681 = vmatpush.xpose.msk.msra.mxu2 %vm2213_vm11, %v3613_v34  ;;  %v1613_v29 = vpop.permute.xlu1 %1612  ;;  %v7729_v34 = vmax.f32 %v7078_v42, 0.0 }
 0x2fb   : > { %v2299_v40 = vsel %vm2257_vm12, %v2256_v6, %v1613_v29  ;;  %v3018_v12 = vsel %vm2530_vm10, %v7217_v62, %v3017_v60 }
 0x2fc   : > { %v3624_v9 = vmax.f32 %v7281_v56, 0.0  ;;  %v2342_v19 = vsel %vm2300_vm13, %v2299_v40, %v1672_v39  ;;  %3477 = vmatmul.bf16.gmra.mxu3 %v3018_v12  ;;  %v7731_v40 = vmax.f32 %v7025_v36, 0.0  ;;  %v7732_v36 = vmax.f32 %v7015_v5, 0.0 }
 0x2fd   : > { %v3028_v21 = vshrl.u32 %v2342_v19, 16  ;;  %v3031_v17 = vshll.u32 %v2342_v19, 16  ;;  %v3764_v31 = vpop.f32.mrf.mxu1 }
 0x2fe   : > { %v3655_v8 = vpack.c.bf16 %v3624_v9, %v3623_v38  ;;  %4682 = vmatpush.xpose.msk.msra.mxu2 %vm2213_vm11, %v7729_v34  ;;  %v3765_v6 = vadd.f32 %v7245_v47, %v3764_v31 }
 0x2ff   : > { %v3030_v62 = vrot.slane %v3028_v21, 2  ;;  %v3033_v55 = vrot.slane %v3031_v17, 3  ;;  %v3327_v59 = vpop.f32.mrf.mxu2  ;;  %v3438_v35 = vpop.f32.mrf.mxu3 }
 0x300   : > { %4662 = vmatmul.msk.bf16.gmra.mxu1 %vm2213_vm11, %v3655_v8  ;;  %v1969_v24 = vpop.permute.xlu0 %1968  ;;  %v3439_v44 = vadd.f32 %v3438_v35, %v3326_v2  ;;  %v3328_v49 = vadd.f32 %v7250_v22, %v3327_v59  ;;  %v7733_v2 = vmax.f32 %v6943_v18, 0.0 }
 0x301   : > { %v3034_v1 = vor.u32 %v3033_v55, %v3030_v62  ;;  %v2405_v58 = vsel %vm2213_vm11, %v6782_v50, %v1969_v24 }
 0x302   : > { %v7307_v61 = vpop.f32.mrf.mxu0  ;;  %4683 = vmatpush.xpose.msk.msra.mxu2 %vm2213_vm11, %v7730_v3  ;;  %v2023_v42 = vpop.permute.xlu1 %2022  ;;  %v7322_v17 = vadd.f32 %v6990_v7, %v3439_v44 }
 0x303   : > { %v2447_v13 = vsel %vm2257_vm12, %v2405_v58, %v2023_v42  ;;  %v3035_v26 = vsel %vm2530_vm10, %v3009_v25, %v3034_v1  ;;  %v7734_v42 = vmax.f32 %v6932_v23, 0.0 }
 0x304   : > { %v2489_v46 = vsel %vm2300_vm13, %v2447_v13, %v2167_v4  ;;  %3369 = vmatmul.bf16.gmra.mxu2 %v3035_v26  ;;  %v3625_v35 = vmax.f32 %v7322_v17, 0.0 }
 0x305   : > { %v3036_v51 = vshrl.u32 %v2489_v46, 16  ;;  %v3039_v39 = vshll.u32 %v2489_v46, 16  ;;  %v3766_v50 = vpop.f32.mrf.mxu1  ;;  %v7735_v46 = vmax.f32 %v6828_v48, 0.0 }
 0x306   : > { %v3767_v29 = vadd.f32 %v7245_v47, %v3766_v50  ;;  %4684 = vmatpush.xpose.msk.msra.mxu2 %vm2213_vm11, %v7731_v40 }
 0x307   : > { %v3038_v12 = vrot.slane %v3036_v51, 2  ;;  %v3041_v25 = vrot.slane %v3039_v39, 3  ;;  %v3330_v19 = vpop.f32.mrf.mxu2  ;;  %v3440_v21 = vpop.f32.mrf.mxu3 }
 0x308   : > { %v4855_v8 = vpack.c.bf16 %v3767_v29, %v3765_v6  ;;  %v3441_v34 = vadd.f32 %v3440_v21, %v3328_v49  ;;  %v7736_v29 = vmax.f32 %v6822_v30, 0.0 }
 0x309   : > { %v3042_v62 = vor.u32 %v3041_v25, %v3038_v12 }
 0x30a   : > { %5046 = vst [vmem:[%s7271_s28 + $0x8] sm:$0xff] %v4855_v8   ;;  %v7326_v31 = vadd.f32 %v7028_v53, %v3441_v34  ;;  %v7328_v55 = vpop.f32.mrf.mxu0  ;;  %4685 = vmatpush.xpose.msk.msra.mxu2 %vm2213_vm11, %v7732_v36 }
 0x30b   : > { %v3043_v59 = vsel %vm2530_vm10, %v3017_v60, %v3042_v62  ;;  %v3331_v60 = vadd.f32 %v7250_v22, %v3330_v19 }
 0x30c   : > { %v3626_v7 = vmax.f32 %v7326_v31, 0.0  ;;  %3482 = vmatmul.bf16.gmra.mxu3 %v3043_v59 }
 0x30d   : > { %v3769_v24 = vpop.f32.mrf.mxu1 }
 0x30e   : > { %v3656_v53 = vpack.c.bf16 %v3626_v7, %v3625_v35  ;;  %4686 = vmatpush.xpose.msk.msra.mxu2 %vm2213_vm11, %v7733_v2  ;;  %v3770_v18 = vadd.f32 %v7245_v47, %v3769_v24 }
 0x30f   : > { %v3332_v5 = vpop.f32.mrf.mxu2  ;;  %v3443_v58 = vpop.f32.mrf.mxu3 }
 0x310   : > { %4663 = vmatmul.msk.bf16.gmra.mxu1 %vm2213_vm11, %v3656_v53  ;;  %v3444_v4 = vadd.f32 %v3443_v58, %v3331_v60  ;;  %v3333_v26 = vadd.f32 %v7250_v22, %v3332_v5 }
 0x312   : > { %v7345_v3 = vpop.f32.mrf.mxu0  ;;  %4687 = vmatpush.xpose.msk.msra.mxu2 %vm2213_vm11, %v7734_v42  ;;  %v7357_v50 = vadd.f32 %v7058_v20, %v3444_v4 }
 0x314   : > { %3374 = vmatmul.bf16.gmra.mxu2 %v3034_v1  ;;  %v3627_v48 = vmax.f32 %v7357_v50, 0.0 }
 0x315   : > { %v3771_v13 = vpop.f32.mrf.mxu1 }
 0x316   : > { %v3772_v44 = vadd.f32 %v7245_v47, %v3771_v13  ;;  %4688 = vmatpush.xpose.msk.msra.mxu2 %vm2213_vm11, %v7735_v46 }
 0x317   : > { %v3335_v51 = vpop.f32.mrf.mxu2  ;;  %v3445_v39 = vpop.f32.mrf.mxu3 }
 0x318   : > { %v4860_v23 = vpack.c.bf16 %v3772_v44, %v3770_v18  ;;  %v3446_v6 = vadd.f32 %v3445_v39, %v3333_v26  ;;  %v3336_v30 = vadd.f32 %v7250_v22, %v3335_v51 }
 0x31a   : > { %5047 = vst [vmem:[%s7271_s28 + $0x10] sm:$0xff] %v4860_v23   ;;  %v7361_v1 = vadd.f32 %v7081_v28, %v3446_v6  ;;  %v7363_v49 = vpop.f32.mrf.mxu0  ;;  %4689 = vmatpush.xpose.msk.msra.mxu2 %vm2213_vm11, %v7736_v29 }
 0x31c   : > { %v3628_v40 = vmax.f32 %v7361_v1, 0.0  ;;  %3487 = vmatmul.bf16.gmra.mxu3 %v3042_v62 }
 0x31d   : > { %v3774_v12 = vpop.f32.mrf.mxu1 }
 0x31e   : > { %v3657_v20 = vpack.c.bf16 %v3628_v40, %v3627_v48  ;;  %v3775_v34 = vadd.f32 %v7245_v47, %v3774_v12 }
 0x31f   : > { %v3337_v28 = vpop.f32.mrf.mxu2  ;;  %v3448_v25 = vpop.f32.mrf.mxu3 }
 0x320   : > { %4664 = vmatmul.msk.bf16.gmra.mxu1 %vm2213_vm11, %v3657_v20  ;;  %v3449_v21 = vadd.f32 %v3448_v25, %v3336_v30  ;;  %v3338_v62 = vadd.f32 %v7250_v22, %v3337_v28 }
 0x322   : > { %v7376_v19 = vpop.f32.mrf.mxu0  ;;  %v7382_v53 = vadd.f32 %v7098_v45, %v3449_v21 }
 0x324   : > { %v3629_v42 = vmax.f32 %v7382_v53, 0.0 }
 0x325   : > { %v3776_v8 = vpop.f32.mrf.mxu1 }
 0x326   : > { %v3777_v36 = vadd.f32 %v7245_v47, %v3776_v8 }
 0x327   : > { %v3340_v59 = vpop.f32.mrf.mxu2  ;;  %v3450_v24 = vpop.f32.mrf.mxu3 }
 0x328   : > { %v4865_v2 = vpack.c.bf16 %v3777_v36, %v3775_v34  ;;  %v3451_v5 = vadd.f32 %v3450_v24, %v3338_v62  ;;  %v3341_v44 = vadd.f32 %v7250_v22, %v3340_v59 }
 0x32a   : > { %5048 = vst [vmem:[%s7271_s28 + $0x18] sm:$0xff] %v4865_v2   ;;  %v7386_v58 = vadd.f32 %v7113_v43, %v3451_v5  ;;  %v3603_v60 = vpop.f32.mrf.mxu0 }
 0x32c   : > { %v3630_v4 = vmax.f32 %v7386_v58, 0.0 }
 0x32d   : > { %v3779_v13 = vpop.f32.mrf.mxu1 }
 0x32e   : > { %v3658_v18 = vpack.c.bf16 %v3630_v4, %v3629_v42  ;;  %v3780_v51 = vadd.f32 %v7245_v47, %v3779_v13 }
 0x32f   : > { %v3342_v45 = vpop.f32.mrf.mxu2  ;;  %v3453_v26 = vpop.f32.mrf.mxu3 }
 0x330   : > { %4665 = vmatmul.msk.bf16.gmra.mxu1 %vm2213_vm11, %v3658_v18  ;;  %v3454_v43 = vadd.f32 %v3453_v26, %v3341_v44  ;;  %v3343_v39 = vadd.f32 %v7250_v22, %v3342_v45 }
 0x332   : > { %v7400_v12 = vadd.f32 %v7129_v52, %v3454_v43 }
 0x334   : > { %v3631_v30 = vmax.f32 %v7400_v12, 0.0 }
 0x335   : > { %v3781_v46 = vpop.f32.mrf.mxu1 }
 0x336   : > { %v3782_v23 = vadd.f32 %v7245_v47, %v3781_v46 }
 0x337   : > { %v3345_v6 = vpop.f32.mrf.mxu2  ;;  %v3455_v29 = vpop.f32.mrf.mxu3 }
 0x338   : > { %v4870_v20 = vpack.c.bf16 %v3782_v23, %v3780_v51  ;;  %v3456_v28 = vadd.f32 %v3455_v29, %v3343_v39  ;;  %v3346_v36 = vadd.f32 %v7250_v22, %v3345_v6 }
 0x33a   : > { %5049 = vst [vmem:[%s7271_s28 + $0x20] sm:$0xff] %v4870_v20   ;;  %v7404_v25 = vadd.f32 %v7142_v14, %v3456_v28 }
 0x33c   : > { %v3632_v21 = vmax.f32 %v7404_v25, 0.0 }
 0x33d   : > { %v3784_v8 = vpop.f32.mrf.mxu1 }
 0x33e   : > { %v3659_v34 = vpack.c.bf16 %v3632_v21, %v3631_v30  ;;  %v3785_v24 = vadd.f32 %v7245_v47, %v3784_v8 }
 0x33f   : > { %v3347_v62 = vpop.f32.mrf.mxu2  ;;  %v3458_v52 = vpop.f32.mrf.mxu3 }
 0x340   : > { %4666 = vmatmul.msk.bf16.gmra.mxu1 %vm2213_vm11, %v3659_v34  ;;  %v3459_v59 = vadd.f32 %v3458_v52, %v3346_v36  ;;  %v3348_v2 = vadd.f32 %v7250_v22, %v3347_v62 }
 0x342   : > { %v3572_v18 = vadd.f32 %v7157_v0, %v3459_v59 }
 0x344   : > { %v3633_v43 = vmax.f32 %v3572_v18, 0.0 }
 0x345   : > { %v3786_v14 = vpop.f32.mrf.mxu1 }
 0x346   : > { %v3787_v5 = vadd.f32 %v7245_v47, %v3786_v14 }
 0x347   : > { %v3350_v60 = vpop.f32.mrf.mxu2  ;;  %v3460_v13 = vpop.f32.mrf.mxu3 }
 0x348   : > { %v4875_v45 = vpack.c.bf16 %v3787_v5, %v3785_v24  ;;  %v3461_v26 = vadd.f32 %v3460_v13, %v3348_v2  ;;  %v3351_v29 = vadd.f32 %v7250_v22, %v3350_v60 }
 0x34a   : > { %5050 = vst [vmem:[%s7271_s28 + $0x28] sm:$0xff] %v4875_v45   ;;  %v3574_v44 = vadd.f32 %v7170_v10, %v3461_v26 }
 0x34c   : > { %v3634_v46 = vmax.f32 %v3574_v44, 0.0 }
 0x34d   : > { %v3789_v51 = vpop.f32.mrf.mxu1 }
 0x34e   : > { %v3660_v39 = vpack.c.bf16 %v3634_v46, %v3633_v43  ;;  %v3790_v0 = vadd.f32 %v7245_v47, %v3789_v51 }
 0x34f   : > { %v3352_v23 = vpop.f32.mrf.mxu2  ;;  %v3463_v6 = vpop.f32.mrf.mxu3 }
 0x350   : > { %4667 = vmatmul.msk.bf16.gmra.mxu1 %vm2213_vm11, %v3660_v39  ;;  %v3464_v20 = vadd.f32 %v3463_v6, %v3351_v29  ;;  %v3353_v8 = vadd.f32 %v7250_v22, %v3352_v23 }
 0x352   : > { %v3577_v52 = vadd.f32 %v7185_v57, %v3464_v20 }
 0x354   : > { %v3635_v24 = vmax.f32 %v3577_v52, 0.0 }
 0x355   : > { %v3791_v28 = vpop.f32.mrf.mxu1 }
 0x356   : > { %v3792_v34 = vadd.f32 %v7245_v47, %v3791_v28 }
 0x357   : > { %v3355_v10 = vpop.f32.mrf.mxu2  ;;  %v3465_v62 = vpop.f32.mrf.mxu3 }
 0x358   : > { %v4880_v36 = vpack.c.bf16 %v3792_v34, %v3790_v0  ;;  %v3466_v59 = vadd.f32 %v3465_v62, %v3353_v8  ;;  %v3356_v45 = vadd.f32 %v7250_v22, %v3355_v10 }
 0x35a   : > { %5051 = vst [vmem:[%s7271_s28 + $0x30] sm:$0xff] %v4880_v36   ;;  %v3579_v14 = vadd.f32 %v7194_v32, %v3466_v59 }
 0x35c   : > { %v3636_v2 = vmax.f32 %v3579_v14, 0.0 }
 0x35d   : > { %v3794_v5 = vpop.f32.mrf.mxu1 }
 0x35e   : > { %v3661_v60 = vpack.c.bf16 %v3636_v2, %v3635_v24  ;;  %4692 = vmatpush.xpose.msk.msra.mxu3 %vm2213_vm11, %v3636_v2  ;;  %v3795_v44 = vadd.f32 %v7245_v47, %v3794_v5 }
 0x35f   : > { %v3357_v13 = vpop.f32.mrf.mxu2  ;;  %v3468_v18 = vpop.f32.mrf.mxu3 }
 0x360   : > { %4668 = vmatmul.msk.bf16.gmra.mxu1 %vm2213_vm11, %v3661_v60  ;;  %v3469_v57 = vadd.f32 %v3468_v18, %v3356_v45  ;;  %v3358_v32 = vadd.f32 %v7250_v22, %v3357_v13 }
 0x362   : > { %4693 = vmatpush.xpose.msk.msra.mxu3 %vm2213_vm11, %v3635_v24  ;;  %v3582_v6 = vadd.f32 %v7204_v41, %v3469_v57 }
 0x364   : > { %v7440_v0 = vmax.f32 %v3582_v6, 0.0 }
 0x365   : > { %v3796_v26 = vpop.f32.mrf.mxu1 }
 0x366   : > { %v3797_v51 = vadd.f32 %v7245_v47, %v3796_v26  ;;  %4694 = vmatpush.xpose.msk.msra.mxu3 %vm2213_vm11, %v3634_v46 }
 0x367   : > { %v3360_v39 = vpop.f32.mrf.mxu2  ;;  %v3470_v23 = vpop.f32.mrf.mxu3 }
 0x368   : > { %v4885_v29 = vpack.c.bf16 %v3797_v51, %v3795_v44  ;;  %v3471_v20 = vadd.f32 %v3470_v23, %v3358_v32 }
 0x36a   : > { %5052 = vst [vmem:[%s7271_s28 + $0x38] sm:$0xff] %v4885_v29   ;;  %v3584_v28 = vadd.f32 %v7223_v37, %v3471_v20  ;;  %4695 = vmatpush.xpose.msk.msra.mxu3 %vm2213_vm11, %v3633_v43  ;;  %v3361_v37 = vadd.f32 %v7250_v22, %v3360_v39 }
 0x36c   : > { %v7442_v8 = vmax.f32 %v3584_v28, 0.0 }
 0x36d   : > { %v3799_v34 = vpop.f32.mrf.mxu1 }
 0x36e   : > { %4696 = vmatpush.xpose.msk.msra.mxu3 %vm2213_vm11, %v3632_v21  ;;  %v3662_v46 = vpack.c.bf16 %v7442_v8, %v7440_v0  ;;  %v3800_v25 = vadd.f32 %v7245_v47, %v3799_v34 }
 0x36f   : > { %v3362_v41 = vpop.f32.mrf.mxu2  ;;  %v3473_v10 = vpop.f32.mrf.mxu3 }
 0x370   : > { %4669 = vmatmul.msk.bf16.gmra.mxu1 %vm2213_vm11, %v3662_v46  ;;  %v3474_v43 = vadd.f32 %v3473_v10, %v3361_v37  ;;  %v3363_v21 = vadd.f32 %v7250_v22, %v3362_v41 }
 0x372   : > { %4697 = vmatpush.xpose.msk.msra.mxu3 %vm2213_vm11, %v3631_v30  ;;  %v3587_v14 = vadd.f32 %v7255_v16, %v3474_v43 }
 0x374   : > { %v7466_v2 = vmax.f32 %v3587_v14, 0.0  ;;  %v3945_v14 = vld [vmem:[%s7674_s7] sm:$0xff] }
 0x375   : > { %v3801_v62 = vpop.f32.mrf.mxu1  ;;  %4690 = vmatmul.msk.f32.vlgmr.msra.gmra.mxu2 %vm2213_vm11, %v3945_v14 }
 0x376   : > { %v3802_v52 = vadd.f32 %v7245_v47, %v3801_v62  ;;  %4698 = vmatpush.xpose.msk.msra.mxu3 %vm2213_vm11, %v3630_v4 }
 0x377   : > { %v3365_v36 = vpop.f32.mrf.mxu2  ;;  %v3475_v59 = vpop.f32.mrf.mxu3 }
 0x378   : > { %v4890_v24 = vpack.c.bf16 %v3802_v52, %v3800_v25  ;;  %v3476_v12 = vadd.f32 %v3475_v59, %v3363_v21 }
 0x37a   : > { %5053 = vst [vmem:[%s7271_s28 + $0x40] sm:$0xff] %v4890_v24   ;;  %v3589_v30 = vadd.f32 %v7285_v54, %v3476_v12  ;;  %4699 = vmatpush.xpose.msk.msra.mxu3 %vm2213_vm11, %v3629_v42  ;;  %v3366_v54 = vadd.f32 %v7250_v22, %v3365_v36  ;;  %v3946_v12 = vld [vmem:[%s7674_s7 + $0x8] sm:$0xff] }
 0x37c   : > { %v7468_v5 = vmax.f32 %v3589_v30, 0.0 }
 0x37d   : > { %v3804_v58 = vpop.f32.mrf.mxu1  ;;  %4691 = vmatmul.msk.f32.gmra.mxu2 %vm2213_vm11, %v3946_v12 }
 0x37e   : > { %4700 = vmatpush.xpose.msk.msra.mxu3 %vm2213_vm11, %v3628_v40  ;;  %v3663_v16 = vpack.c.bf16 %v7468_v5, %v7466_v2  ;;  %v3805_v1 = vadd.f32 %v7245_v47, %v3804_v58 }
 0x37f   : > { %v3367_v4 = vpop.f32.mrf.mxu2  ;;  %v3478_v60 = vpop.f32.mrf.mxu3 }
 0x380   : > { %4670 = vmatmul.msk.bf16.gmra.mxu1 %vm2213_vm11, %v3663_v16  ;;  %v3479_v53 = vadd.f32 %v3478_v60, %v3366_v54  ;;  %v3368_v40 = vadd.f32 %v7250_v22, %v3367_v4  ;;  %v3948_v16 = vld [vmem:[%s7675_s8 + $0x8] sm:$0xff]  ;;  %v3947_v4 = vld [vmem:[%s7675_s8] sm:$0xff] }
 0x381   : > { %3956 = vperm.xlu1 %5143, %v3948_v16   ;;  %3951 = vperm.xlu0 %5142, %v3947_v4  }
 0x382   : > { %4701 = vmatpush.xpose.msk.msra.mxu3 %vm2213_vm11, %v3627_v48  ;;  %v3592_v57 = vadd.f32 %v7307_v61, %v3479_v53 }
 0x384   : > { %v3641_v44 = vmax.f32 %v3592_v57, 0.0 }
 0x385   : > { %v3806_v42 = vpop.f32.mrf.mxu1 }
 0x386   : > { %v3807_v13 = vadd.f32 %v7245_v47, %v3806_v42  ;;  %4702 = vmatpush.xpose.msk.msra.mxu3 %vm2213_vm11, %v3626_v7 }
 0x387   : > { %v3370_v18 = vpop.f32.mrf.mxu2  ;;  %v3480_v45 = vpop.f32.mrf.mxu3 }
 0x388   : > { %v4895_v26 = vpack.c.bf16 %v3807_v13, %v3805_v1  ;;  %v3481_v50 = vadd.f32 %v3480_v45, %v3368_v40  ;;  %v3371_v39 = vadd.f32 %v7250_v22, %v3370_v18 }
 0x38a   : > { %5054 = vst [vmem:[%s7271_s28 + $0x48] sm:$0xff] %v4895_v26   ;;  %v3594_v48 = vadd.f32 %v7328_v55, %v3481_v50  ;;  %4703 = vmatpush.xpose.msk.msra.mxu3 %vm2213_vm11, %v3625_v35 }
 0x38c   : > { %v3642_v32 = vmax.f32 %v3594_v48, 0.0 }
 0x38d   : > { %v3809_v51 = vpop.f32.mrf.mxu1 }
 0x38e   : > { %4704 = vmatpush.xpose.msk.msra.mxu3 %vm2213_vm11, %v3624_v9  ;;  %v3664_v31 = vpack.c.bf16 %v3642_v32, %v3641_v44  ;;  %v3810_v35 = vadd.f32 %v7245_v47, %v3809_v51 }
 0x38f   : > { %v3372_v7 = vpop.f32.mrf.mxu2  ;;  %v3483_v61 = vpop.f32.mrf.mxu3 }
 0x390   : > { %4671 = vmatmul.msk.bf16.gmra.mxu1 %vm2213_vm11, %v3664_v31  ;;  %v3484_v17 = vadd.f32 %v3483_v61, %v3371_v39  ;;  %v3373_v56 = vadd.f32 %v7250_v22, %v3372_v7 }
 0x392   : > { %4705 = vmatpush.xpose.msk.msra.mxu3 %vm2213_vm11, %v3623_v38  ;;  %v3597_v29 = vadd.f32 %v7345_v3, %v3484_v17 }
 0x394   : > { %v3643_v28 = vmax.f32 %v3597_v29, 0.0 }
 0x395   : > { %v3811_v55 = vpop.f32.mrf.mxu1 }
 0x396   : > { %v3812_v9 = vadd.f32 %v7245_v47, %v3811_v55  ;;  %4706 = vmatpush.xpose.msk.msra.mxu3 %vm2213_vm11, %v3622_v15 }
 0x397   : > { %v3375_v23 = vpop.f32.mrf.mxu2  ;;  %v3485_v6 = vpop.f32.mrf.mxu3 }
 0x398   : > { %v4900_v20 = vpack.c.bf16 %v3812_v9, %v3810_v35  ;;  %v3486_v63 = vadd.f32 %v3485_v6, %v3373_v56  ;;  %v3376_v27 = vadd.f32 %v7250_v22, %v3375_v23 }
 0x39a   : > { %5055 = vst [vmem:[%s7271_s28 + $0x50] sm:$0xff] %v4900_v20   ;;  %v3599_v38 = vadd.f32 %v7363_v49, %v3486_v63  ;;  %4707 = vmatpush.xpose.msk.msra.mxu3 %vm2213_vm11, %v3621_v33 }
 0x39c   : > { %v3644_v34 = vmax.f32 %v3599_v38, 0.0 }
 0x39d   : > { %v3814_v46 = vpop.f32.mrf.mxu1  ;;  %4708 = vmatmul.msk.f32.vlgmr.msra.gmra.mxu3 %vm2213_vm11, %v3945_v14 }
 0x39e   : > { %v3665_v15 = vpack.c.bf16 %v3644_v34, %v3643_v28  ;;  %v3815_v11 = vadd.f32 %v7245_v47, %v3814_v46 }
 0x39f   : > { %v3377_v41 = vpop.f32.mrf.mxu2  ;;  %v3488_v10 = vpop.f32.mrf.mxu3 }
 0x3a0   : > { %v3489_v37 = vadd.f32 %v3488_v10, %v3376_v27  ;;  %4672 = vmatmul.msk.bf16.gmra.mxu1 %vm2213_vm11, %v3665_v15 }
 0x3a2   : > { %v3602_v3 = vadd.f32 %v7376_v19, %v3489_v37 }
 0x3a4   : > { %v3645_v43 = vmax.f32 %v3602_v3, 0.0 }
 0x3a5   : > { %v3816_v49 = vpop.f32.mrf.mxu1  ;;  %4709 = vmatmul.msk.f32.gmra.mxu3 %vm2213_vm11, %v3946_v12 }
 0x3a6   : > { %v3817_v33 = vadd.f32 %v7245_v47, %v3816_v49  ;;  %4710 = vmatpush.xpose.msk.msrb.mxu2 %vm2213_vm11, %v3645_v43  ;;  %5103 = vmatpush.xpose.msk.msrb.mxu3 %vm2213_vm11, %v3645_v43  ;;  %v3666_v19 = vpack.c.bf16 %v3645_v43, %v3645_v43 }
 0x3a7   : > { %v3490_v62 = vpop.f32.mrf.mxu3 }
 0x3a8   : > { %v4905_v22 = vpack.c.bf16 %v3817_v33, %v3815_v11 }
 0x3aa   : > { %5056 = vst [vmem:[%s7271_s28 + $0x58] sm:$0xff] %v4905_v22   ;;  %4711 = vmatpush.xpose.msk.msrb.mxu2 %vm2213_vm11, %v3644_v34  ;;  %5104 = vmatpush.xpose.msk.msrb.mxu3 %vm2213_vm11, %v3644_v34 }
 0x3ad   : > { %v3819_v25 = vpop.f32.mrf.mxu1 }
 0x3ae   : > { %4712 = vmatpush.xpose.msk.msrb.mxu2 %vm2213_vm11, %v3643_v28  ;;  %5105 = vmatpush.xpose.msk.msrb.mxu3 %vm2213_vm11, %v3643_v28  ;;  %v3820_v52 = vadd.f32 %v7245_v47, %v3819_v25  ;;  %v4177_v25 = vlaneseq }
 0x3b0   : > { %4673 = vmatmul.msk.bf16.gmra.mxu1 %vm2213_vm11, %v3666_v19 }
 0x3b2   : > { %4713 = vmatpush.xpose.msk.msrb.mxu2 %vm2213_vm11, %v3642_v32  ;;  %5106 = vmatpush.xpose.msk.msrb.mxu3 %vm2213_vm11, %v3642_v32 }
 0x3b5   : > { %v3821_v21 = vpop.f32.mrf.mxu1 }
 0x3b6   : > { %v3822_v36 = vadd.f32 %v7245_v47, %v3821_v21  ;;  %4714 = vmatpush.xpose.msk.msrb.mxu2 %vm2213_vm11, %v3641_v44  ;;  %5107 = vmatpush.xpose.msk.msrb.mxu3 %vm2213_vm11, %v3641_v44 }
 0x3b8   : > { %v4910_v59 = vpack.c.bf16 %v3822_v36, %v3820_v52 }
 0x3ba   : > { %5057 = vst [vmem:[%s7271_s28 + $0x60] sm:$0xff] %v4910_v59   ;;  %4715 = vmatpush.xpose.msk.msrb.mxu2 %vm2213_vm11, %v7468_v5  ;;  %5108 = vmatpush.xpose.msk.msrb.mxu3 %vm2213_vm11, %v7468_v5 }
 0x3bd   : > { %v3824_v24 = vpop.f32.mrf.mxu1 }
 0x3be   : > { %4716 = vmatpush.xpose.msk.msrb.mxu2 %vm2213_vm11, %v7466_v2  ;;  %5109 = vmatpush.xpose.msk.msrb.mxu3 %vm2213_vm11, %v7466_v2  ;;  %v3825_v5 = vadd.f32 %v7245_v47, %v3824_v24 }
 0x3c2   : > { %4717 = vmatpush.xpose.msk.msrb.mxu2 %vm2213_vm11, %v7442_v8  ;;  %5110 = vmatpush.xpose.msk.msrb.mxu3 %vm2213_vm11, %v7442_v8 }
 0x3c5   : > { %v3826_v30 = vpop.f32.mrf.mxu1 }
 0x3c6   : > { %v3827_v58 = vadd.f32 %v7245_v47, %v3826_v30  ;;  %4718 = vmatpush.xpose.msk.msrb.mxu2 %vm2213_vm11, %v7440_v0  ;;  %5111 = vmatpush.xpose.msk.msrb.mxu3 %vm2213_vm11, %v7440_v0 }
 0x3c8   : > { %v4915_v2 = vpack.c.bf16 %v3827_v58, %v3825_v5  ;;  %v4178_v58 = vshrl.u32 %v4177_v25, 7 }
 0x3c9   : > { %4720 = vmatmul.msk.f32.vlgmr.msrb.gmra.mxu3 %vm2213_vm11, %v3946_v12  ;;  %4719 = vmatmul.msk.f32.vlgmr.msrb.gmra.mxu2 %vm2213_vm11, %v3945_v14 }
 0x3ca   : > { %5058 = vst [vmem:[%s7271_s28 + $0x68] sm:$0xff] %v4915_v2  }
 0x3cd   : > { %v3829_v8 = vpop.f32.mrf.mxu1 }
 0x3ce   : > { %v3830_v0 = vadd.f32 %v7245_v47, %v3829_v8 }
 0x3d5   : > { %v3831_v60 = vpop.f32.mrf.mxu1 }
 0x3d6   : > { %v3832_v54 = vadd.f32 %v7245_v47, %v3831_v60 }
 0x3d8   : > { %v4920_v53 = vpack.c.bf16 %v3832_v54, %v3830_v0 }
 0x3da   : > { %5059 = vst [vmem:[%s7271_s28 + $0x70] sm:$0xff] %v4920_v53  }
 0x3dd   : > { %v3834_v42 = vpop.f32.mrf.mxu1 }
 0x3de   : > { %v3835_v40 = vadd.f32 %v7245_v47, %v3834_v42  ;;  %v4179_v42 = vcvt.s32.f32 %v4178_v58 }
 0x3e5   : > { %v3836_v1 = vpop.f32.mrf.mxu1 }
 0x3e6   : > { %v3837_v13 = vadd.f32 %v7245_v47, %v3836_v1 }
 0x3e8   : > { %v4925_v18 = vpack.c.bf16 %v3837_v13, %v3835_v40 }
 0x3ea   : > { %5060 = vst [vmem:[%s7271_s28 + $0x78] sm:$0xff] %v4925_v18  }
 0x3ed   : > { %v3839_v45 = vpop.f32.mrf.mxu1 }
 0x3ee   : > { %v3840_v26 = vadd.f32 %v7245_v47, %v3839_v45 }
 0x3f3   : > { %v3957_v27 = vpop.permute.xlu1 %3956  ;;  %v3952_v3 = vpop.permute.xlu0 %3951 }
 0x3f5   : > { %v3841_v57 = vpop.f32.mrf.mxu1 }
 0x3f6   : > { %v3842_v50 = vadd.f32 %v7245_v47, %v3841_v57 }
 0x3f8   : > { %v4930_v48 = vpack.c.bf16 %v3842_v50, %v3840_v26  ;;  %v4105_v46 = vpop.f32.mrf.mxu2 }
 0x3f9   : > { %v4106_v33 = vadd.f32 %v4105_v46, %v3952_v3 }
 0x3fa   : > { %5061 = vst [vmem:[%s7271_s28 + $0x80] sm:$0xff] %v4930_v48  }
 0x3fb   : > { %v4157_v22 = vrot.slane %v4106_v33, 4 }
 0x3fd   : > { %v3844_v44 = vpop.f32.mrf.mxu1  ;;  %v4158_v19 = vmax.f32 %v4106_v33, %v4157_v22 }
 0x3fe   : > { %v3845_v51 = vadd.f32 %v7245_v47, %v3844_v44 }
 0x3ff   : > { %v4159_v24 = vrot.slane %v4158_v19, 2 }
 0x400   : > { %v4108_v41 = vpop.f32.mrf.mxu2 }
 0x401   : > { %v4109_v10 = vadd.f32 %v4108_v41, %v3957_v27  ;;  %v4160_v2 = vmax.f32 %v4158_v19, %v4159_v24 }
 0x403   : > { %v4721_v49 = vmul.f32 -1.442695, %v4109_v10  ;;  %v4161_v54 = vrot.slane %v4160_v2, 1 }
 0x405   : > { %v3846_v32 = vpop.f32.mrf.mxu1  ;;  %5146 = vpow2.f32 %v4721_v49  ;;  %v7594_v1 = vmax.f32 %v4160_v2, %v4161_v54 }
 0x406   : > { %v3847_v31 = vadd.f32 %v7245_v47, %v3846_v32 }
 0x407   : > { %vm4180_vm2 = vcmp.eq.f32.partialorder %v4106_v33, %v7594_v1 }
 0x408   : > { %v4935_v7 = vpack.c.bf16 %v3847_v31, %v3845_v51  ;;  %v4183_v57 = vsel %vm4180_vm2, %v4179_v42, 8.0 }
 0x409   : > { %v4186_v44 = vrot.slane %v4183_v57, 4 }
 0x40a   : > { %5062 = vst [vmem:[%s7271_s28 + $0x88] sm:$0xff] %v4935_v7  }
 0x40b   : > { %v5147_v30 = vpop.eup %5146 }
 0x40c   : > { %v7591_v4 = vadd.f32 1.0, %v5147_v30 }
 0x40d   : > { %v3849_v61 = vpop.f32.mrf.mxu1 }
 0x40e   : > { %v3850_v17 = vadd.f32 %v7245_v47, %v3849_v61  ;;  %vm4222_vm7 = vweird.f32 %v7591_v4  ;;  %v4226_v49 = vand.u32 2147483647, %v7591_v4 }
 0x410   : > { %vm4227_vm14 = vcmp.eq.f32.partialorder %v4226_v49, 8.507059e+37 }
 0x415   : > { %v3851_v39 = vpop.f32.mrf.mxu1 }
 0x416   : > { %v3852_v55 = vadd.f32 %v7245_v47, %v3851_v39 }
 0x418   : > { %v4940_v35 = vpack.c.bf16 %v3852_v55, %v3850_v17 }
 0x41a   : > { %5063 = vst [vmem:[%s7271_s28 + $0x90] sm:$0xff] %v4940_v35  }
 0x41d   : > { %v3854_v56 = vpop.f32.mrf.mxu1 }
 0x41e   : > { %v3855_v23 = vadd.f32 %v7245_v47, %v3854_v56 }
 0x420   : > { %v4128_v34 = vpop.f32.mrf.mxu3 }
 0x421   : > { %v4129_v43 = vadd.f32 %v4128_v34, %v3952_v3 }
 0x423   : > { %v4163_v62 = vrot.slane %v4129_v43, 4 }
 0x425   : > { %v3856_v9 = vpop.f32.mrf.mxu1 }
 0x426   : > { %v3857_v6 = vadd.f32 %v7245_v47, %v3856_v9  ;;  %v4187_v9 = vmin.f32 %v4183_v57, %v4186_v44 }
 0x428   : > { %v4945_v29 = vpack.c.bf16 %v3857_v6, %v3855_v23  ;;  %v4131_v15 = vpop.f32.mrf.mxu3  ;;  %v4228_v6 = vand.u32 2147483648, %v7591_v4 }
 0x429   : > { %v4132_v37 = vadd.f32 %v4131_v15, %v3957_v27 }
 0x42a   : > { %5064 = vst [vmem:[%s7271_s28 + $0x98] sm:$0xff] %v4945_v29  }
 0x42b   : > { %v4722_v11 = vmul.f32 -1.442695, %v4132_v37 }
 0x42d   : > { %v3859_v20 = vpop.f32.mrf.mxu1  ;;  %5148 = vpow2.f32 %v4722_v11 }
 0x42e   : > { %v3860_v63 = vadd.f32 %v7245_v47, %v3859_v20  ;;  %v4164_v47 = vmax.f32 %v4129_v43, %v4163_v62 }
 0x430   : > { %v3903_v38 = vpack.c.bf16 %v3860_v63, %v3860_v63  ;;  %v4165_v36 = vrot.slane %v4164_v47, 2 }
 0x432   : > { %3944 = vst [vmem:[%s7271_s28 + $0xa0] sm:$0x3] %v3903_v38  ;;  %v4166_v12 = vmax.f32 %v4164_v47, %v4165_v36  ;;  %v4188_v38 = vrot.slane %v4187_v9, 2 }
 0x433   : > { %v5149_v16 = vpop.eup %5148 }
 0x434   : > { %v4167_v60 = vrot.slane %v4166_v12, 1  ;;  %v4215_v0 = vadd.f32 1.0, %v5149_v16  ;;  %v4189_v37 = vmin.f32 %v4187_v9, %v4188_v38 }
 0x435   : > { %v3861_v28 = vpop.f32.mrf.mxu1 }
 0x436   : > { %v4168_v40 = vmax.f32 %v4166_v12, %v4167_v60  ;;  %vm4237_vm5 = vweird.f32 %v4215_v0  ;;  %v4241_v17 = vand.u32 2147483647, %v4215_v0  ;;  %v4243_v55 = vand.u32 2147483648, %v4215_v0 }
 0x437   : > { %v4190_v22 = vrot.slane %v4189_v37, 1 }
 0x438   : > { %vm4181_vm4 = vcmp.eq.f32.partialorder %v4129_v43, %v4168_v40  ;;  %vm7613_vm10 = vcmp.eq.f32.partialorder %v4241_v17, 8.507059e+37 }
 0x439   : > { %v4184_v26 = vsel %vm4181_vm4, %v4179_v42, 8.0 }
 0x43a   : > { %v4192_v32 = vrot.slane %v4184_v26, 4 }
 0x43c   : > { %v4193_v23 = vmin.f32 %v4184_v26, %v4192_v32 }
 0x43e   : > { %v4194_v28 = vrot.slane %v4193_v23, 2 }
 0x44c   : > { %v4154_v21 = vpop.f32.mrf.mxu3  ;;  %v4151_v52 = vpop.f32.mrf.mxu2 }
 0x44d   : > { %v4155_v59 = vadd.f32 %v4154_v21, %v3957_v27  ;;  %v4152_v14 = vadd.f32 %v4151_v52, %v3952_v3  ;;  %v4244_v27 = vor.u32 1.1754944e-38, %v4243_v55  ;;  %v4195_v3 = vmin.f32 %v4193_v23, %v4194_v28 }
 0x44f   : > { %v4723_v5 = vmul.f32 -1.442695, %v4155_v59  ;;  %v4170_v8 = vsel %vm4169_vm1, %v4152_v14, -inf  ;;  %v4196_v47 = vrot.slane %v4195_v3, 1  ;;  %v4229_v59 = vor.u32 1.1754944e-38, %v4228_v6 }
 0x450   : > { %v4171_v53 = vrot.slane %v4170_v8, 4 }
 0x451   : > { %5150 = vpow2.f32 %v4723_v5  ;;  %v4197_v12 = vmin.f32 %v4195_v3, %v4196_v47 }
 0x452   : > { %5152 = vrcp.f32 %v7591_v4  ;;  %v4172_v13 = vmax.f32 %v4170_v8, %v4171_v53  ;;  %v4191_v8 = vmin.f32 %v4189_v37, %v4190_v22 }
 0x453   : > { %5154 = vrcp.f32 %v4215_v0  ;;  %v5120_v60 = vceil.f32 %v4197_v12  ;;  %v5121_v54 = vfloor.f32 %v4197_v12 }
 0x454   : > { %v4173_v45 = vrot.slane %v4172_v13, 2  ;;  %v5116_v57 = vfloor.f32 %v4191_v8 }
 0x456   : > { %v4174_v7 = vmax.f32 %v4172_v13, %v4173_v45  ;;  %v5115_v45 = vceil.f32 %v4191_v8 }
 0x457   : > { %v5151_v18 = vpop.eup %5150 }
 0x458   : > { %v7597_v50 = vpop.eup %5152  ;;  %v7599_v48 = vadd.f32 1.0, %v5151_v18  ;;  %v4175_v35 = vrot.slane %v4174_v7, 1 }
 0x459   : > { %v5155_v51 = vpop.eup %5154  ;;  %v4218_v31 = vmul.f32 %v7597_v50, %v7591_v4  ;;  %vm4223_vm8 = vweird.f32 %v7597_v50 }
 0x45a   : > { %v4233_v61 = vmul.f32 %v5155_v51, %v4215_v0  ;;  %5156 = vrcp.f32 %v7599_v48  ;;  %vm4238_vm6 = vweird.f32 %v5155_v51  ;;  %v4176_v29 = vmax.f32 %v4174_v7, %v4175_v35  ;;  %vm7627_vm12 = vmor %vm4222_vm7, %vm4223_vm8 }
 0x45b   : > { %v4219_v39 = vsub.f32 1.0, %v4218_v31  ;;  %vm7609_vm9 = vmor %vm4237_vm5, %vm4238_vm6  ;;  %v4258_v24 = vand.u32 2147483648, %v7599_v48  ;;  %vm4252_vm15 = vweird.f32 %v7599_v48  ;;  %vm5114_vm5 = vcmp.lt.s32.totalorder %v4191_v8, 0 }
 0x45c   : > { %v4234_v56 = vsub.f32 1.0, %v4233_v61  ;;  %vm4182_vm11 = vcmp.eq.f32.partialorder %v4152_v14, %v4176_v29  ;;  %v4256_v14 = vand.u32 2147483647, %v7599_v48  ;;  %vm7647_vm6 = vcmp.lt.s32.totalorder %v4177_v25, 324 }
 0x45d   : > { %v4220_v20 = vmul.f32 %v7597_v50, %v4219_v39  ;;  %v4185_v10 = vsel %vm4182_vm11, %v4179_v42, 8.0  ;;  %v4259_v0 = vor.u32 1.1754944e-38, %v4258_v24  ;;  %v5117_v39 = vsel %vm5114_vm5, %v5115_v45, %v5116_v57 }
 0x45e   : > { %v4235_v63 = vmul.f32 %v5155_v51, %v4234_v56  ;;  %v4198_v11 = vsel %vm4169_vm1, %v4185_v10, inf  ;;  %vm5119_vm1 = vcmp.lt.s32.totalorder %v4197_v12, 0  ;;  %vm4257_vm4 = vcmp.eq.f32.partialorder %v4256_v14, 8.507059e+37 }
 0x45f   : > { %v4221_v33 = vadd.f32 %v7597_v50, %v4220_v20  ;;  %v4199_v36 = vrot.slane %v4198_v11, 4  ;;  %v5122_v26 = vsel %vm5119_vm1, %v5120_v60, %v5121_v54  ;;  %v5118_v35 = vcvt.f32.s32 %v5117_v39 }
 0x460   : > { %v5157_v15 = vpop.eup %5156  ;;  %v4236_v41 = vadd.f32 %v5155_v51, %v4235_v63  ;;  %v5123_v7 = vcvt.f32.s32 %v5122_v26 }
 0x461   : > { %v4248_v43 = vmul.f32 %v5157_v15, %v7599_v48  ;;  %vm4253_vm13 = vweird.f32 %v5157_v15  ;;  %v4200_v5 = vmin.f32 %v4198_v11, %v4199_v36  ;;  %v4225_v2 = vsel %vm7627_vm12, %v7597_v50, %v4221_v33 }
 0x462   : > { %v4240_v62 = vsel %vm7609_vm9, %v5155_v51, %v4236_v41  ;;  %vm4254_vm2 = vmor %vm4252_vm15, %vm4253_vm13  ;;  %v4230_v53 = vsel %vm4227_vm14, %v4229_v59, %v4225_v2  ;;  %v4281_v25 = vrot.slane %v5123_v7, 7 }
 0x463   : > { %v4249_v19 = vsub.f32 1.0, %v4248_v43  ;;  %v4245_v52 = vsel %vm7613_vm10, %v4244_v27, %v4240_v62  ;;  %v4201_v4 = vrot.slane %v4200_v5, 2  ;;  %v4262_v44 = vmul.f32 %v4230_v53, %v7594_v1 }
 0x464   : > { %v4263_v58 = vmul.f32 %v4245_v52, %v4168_v40  ;;  %v4283_v6 = vsel %vm903_vm3, %v5118_v35, %v4281_v25 }
 0x465   : > { %v4250_v30 = vmul.f32 %v5157_v15, %v4249_v19  ;;  %v4202_v40 = vmin.f32 %v4200_v5, %v4201_v4 }
 0x466   : > { %v4268_v13 = vrot.slane %v4263_v58, 7 }
 0x467   : > { %v4251_v16 = vadd.f32 %v5157_v15, %v4250_v30  ;;  %v4203_v50 = vrot.slane %v4202_v40, 1 }
 0x468   : > { %v4270_v61 = vsel %vm903_vm3, %v4262_v44, %v4268_v13 }
 0x469   : > { %v4255_v42 = vsel %vm4254_vm2, %v5157_v15, %v4251_v16  ;;  %v4204_v51 = vmin.f32 %v4202_v40, %v4203_v50 }
 0x46a   : > { %v4260_v18 = vsel %vm4257_vm4, %v4259_v0, %v4255_v42 }
 0x46b   : > { %v4264_v48 = vmul.f32 %v4260_v18, %v4176_v29  ;;  %vm5124_vm7 = vcmp.lt.s32.totalorder %v4204_v51, 0  ;;  %v5125_v1 = vceil.f32 %v4204_v51  ;;  %v5126_v55 = vfloor.f32 %v4204_v51 }
 0x46d   : > { %v4269_v31 = vrot.slane %v4264_v48, 6  ;;  %v5127_v56 = vsel %vm5124_vm7, %v5125_v1, %v5126_v55 }
 0x46e   : > { %v5128_v9 = vcvt.f32.s32 %v5127_v56 }
 0x46f   : > { %v4271_v17 = vsel %vm637_vm0, %v4270_v61, %v4269_v31 }
 0x470   : > { %4277 = vst.msk [vmem:[%s403_s19] sm:$0x7] %vm7647_vm6, %v4271_v17  ;;  %v4282_v23 = vrot.slane %v5128_v9, 6 }
 0x472   : > { %v4284_v29 = vsel %vm637_vm0, %v4283_v6, %v4282_v23 }
 0x473   : > { %4285 = vst.msk [vmem:[%s407_s26] sm:$0x7] %vm7647_vm6, %v4284_v29 }
 0x474 PF: > { %s22_s17 = sadd.s32 1, %s5183_s17  }
 0x475   : > { %p19_p4 = scmp.ge.s32.totalorder %s22_s17, 4  }
 0x477   :  { %21 = sbr.rel (!%p19_p4) target bundleno = 1 (0x1), region = 110 }

</bundles_post_ra>
